<compile_context>
chip_gen: v6e
topology: v6e:2x2x1
jax: 0.10.0
libtpu: 0.0.40
codegen_flags: <defaults>
</compile_context>

<pallas_src>
import functools
import math

import numpy as np
import jax
import jax.numpy as jnp
from jax import lax
from jax.experimental import pallas as pl
from jax.experimental.pallas import tpu as pltpu

# ----------------------- small-config (mirrors SAM's structure) --------------
EMBED_DIM = 128                   # stands in for SAM's 256 (full vreg lanes)
EMB_H, EMB_W = 8, 8               # image_embedding_size (64x64 in SAM)
PATCH = 8                         # ViT patch size (16 in SAM)
IMG_SIZE = EMB_H * PATCH          # image_encoder.img_size (1024 in SAM)
LOW_RES = 4 * EMB_H               # low-res mask side (256 in SAM)
INPUT_SIZE = (64, 48)             # valid (unpadded) region inside IMG_SIZE
ORIGINAL_SIZE = (48, 80)          # (1080, 1920) in SAM
UC = EMBED_DIM // 8               # upscaled-embedding channels
HIDDEN_PROMPT = 128               # prompt_encoder.output_dim (stand-in)
N_OUT_TOKENS = 2                  # iou token + 1 mask token (multimask_output=False)
PROMPT_HW = 16                    # prompt image spatial size
IMG_C = 3
HW = EMB_H * EMB_W


# ------------- probe: single-buffered invariant operands (Buffered(1)) -------
def _probe_buffered_one():
    """Check whether pipeline_mode=pl.Buffered(1) is supported. Runs a tiny
    kernel eagerly so any lowering error is caught here rather than inside the
    jitted forward."""
    try:
        def _k(x_ref, o_ref):
            o_ref[...] = x_ref[...] + 1.0

        x = jnp.zeros((8, 128), jnp.float32)
        y = pl.pallas_call(
            _k,
            out_shape=jax.ShapeDtypeStruct((8, 128), jnp.float32),
            grid=(1,),
            in_specs=[pl.BlockSpec((8, 128), lambda i: (0, 0),
                                   pipeline_mode=pl.Buffered(1))],
            out_specs=pl.BlockSpec((8, 128), lambda i: (0, 0)),
        )(x)
        jax.block_until_ready(y)
        return True
    except Exception:
        return False


_USE_SINGLE_BUFFER_INVARIANTS = _probe_buffered_one()


# ----------------------------- generic linear kernel -------------------------
def _linear_kernel(x_ref, w_ref, b_ref, o_ref, *, relu):
    y = jnp.dot(x_ref[...], w_ref[...], preferred_element_type=jnp.float32)
    y = y + b_ref[...]
    if relu:
        y = jnp.maximum(y, 0.0)
    o_ref[...] = y.astype(o_ref.dtype)


def linear_pallas(x, w, b, relu=False, block_m=512):
    m, k = x.shape
    _, n = w.shape
    if block_m is not None and m > block_m and m % block_m == 0:
        tm = block_m
    else:
        tm = m
    grid_m = m // tm
    return pl.pallas_call(
        functools.partial(_linear_kernel, relu=relu),
        out_shape=jax.ShapeDtypeStruct((m, n), jnp.float32),
        grid=(grid_m,),
        in_specs=[
            pl.BlockSpec((tm, k), lambda i: (i, 0)),
            pl.BlockSpec((k, n), lambda i: (0, 0)),
            pl.BlockSpec((1, n), lambda i: (0, 0)),
        ],
        out_specs=pl.BlockSpec((tm, n), lambda i: (i, 0)),
        compiler_params=pltpu.CompilerParams(dimension_semantics=("parallel",)),
    )(x, w, b)


# -------------------- fused 2-layer MLP (prompt encoder) ---------------------
def _mlp2_kernel(x_ref, w1_ref, b1_ref, w2_ref, b2_ref, o_ref):
    h = jnp.dot(x_ref[...], w1_ref[...], preferred_element_type=jnp.float32)
    h = jnp.maximum(h + b1_ref[...], 0.0)
    y = jnp.dot(h, w2_ref[...], preferred_element_type=jnp.float32) + b2_ref[...]
    o_ref[...] = y.astype(o_ref.dtype)


def mlp2_pallas(x, w1, b1, w2, b2):
    m, kin = x.shape
    hid = w1.shape[1]
    n = w2.shape[1]
    return pl.pallas_call(
        _mlp2_kernel,
        out_shape=jax.ShapeDtypeStruct((m, n), jnp.float32),
        grid=(1,),
        in_specs=[
            pl.BlockSpec((m, kin), lambda i: (0, 0)),
            pl.BlockSpec((kin, hid), lambda i: (0, 0)),
            pl.BlockSpec((1, hid), lambda i: (0, 0)),
            pl.BlockSpec((hid, n), lambda i: (0, 0)),
            pl.BlockSpec((1, n), lambda i: (0, 0)),
        ],
        out_specs=pl.BlockSpec((m, n), lambda i: (0, 0)),
    )(x, w1, b1, w2, b2)


# ------------ fused mask decoder + IoU head + postprocess (grid = B) ---------
def _mask_decoder_kernel(feat_ref, pe_ref, nomask_ref, tok_ref,
                         wq_ref, wk_ref, wv_ref, wo_ref,
                         gamma_ref, beta_ref,
                         wup_ref, bup_ref, whyp_ref, bhyp_ref,
                         wiou_ref, biou_ref,
                         ulow_ref, ufull_ref,
                         low_ref, mask_ref, iou_ref):
    K, T_pad, E = tok_ref.shape

    # ---- per-image work (shared by every class k) ----
    src = feat_ref[0] + nomask_ref[...]              # dense (no-mask) prompt broadcast
    key_in = src + pe_ref[...]
    k_mat = jnp.dot(key_in, wk_ref[...], preferred_element_type=jnp.float32)
    v_mat = jnp.dot(src, wv_ref[...], preferred_element_type=jnp.float32)
    upf = jnp.maximum(
        jnp.dot(src, wup_ref[...], preferred_element_type=jnp.float32)
        + bup_ref[...], 0.0)                          # [HW, UC]

    # ---- all K classes at once: tokens as one (K*T_pad, E) row block ----
    tokens = tok_ref[...].reshape(K * T_pad, E)       # leading-dim merge, no relayout

    # token -> image cross attention (single head).  1/sqrt(E) is pre-folded
    # into wq, so no runtime scale here.
    q = jnp.dot(tokens, wq_ref[...], preferred_element_type=jnp.float32)
    logits = lax.dot_general(q, k_mat, (((1,), (1,)), ((), ())),
                             preferred_element_type=jnp.float32)
    logits = logits - jnp.max(logits, axis=-1, keepdims=True)
    p = jnp.exp(logits)
    p = p * pl.reciprocal(jnp.sum(p, axis=-1, keepdims=True), approx=True)
    attn = jnp.dot(jnp.dot(p, v_mat, preferred_element_type=jnp.float32),
                   wo_ref[...], preferred_element_type=jnp.float32)
    tokens = tokens + attn

    # LayerNorm over channels (f32 elementwise)
    mu = jnp.mean(tokens, axis=-1, keepdims=True)
    var = jnp.mean((tokens - mu) ** 2, axis=-1, keepdims=True)
    tokens = (tokens - mu) * lax.rsqrt(var + 1e-6)
    tokens = tokens * gamma_ref[...] + beta_ref[...]

    # extract the iou / mask token rows of every class (contiguous sublane
    # slices + concat; K is small and static)
    iou_rows = []
    msk_rows = []
    for k in range(K):
        base = k * T_pad
        iou_rows.append(tokens[base:base + 1])
        msk_rows.append(tokens[base + 1:base + 2])
    iou_tok = jnp.concatenate(iou_rows, axis=0)       # [K, E]
    mask_tok = jnp.concatenate(msk_rows, axis=0)      # [K, E]

    # hypernetwork weights from the mask tokens
    hyper = jnp.maximum(
        jnp.dot(mask_tok, whyp_ref[...], preferred_element_type=jnp.float32)
        + bhyp_ref[...], 0.0)                         # [K, UC]

    # per-grid-cell mask values for all classes in one matmul -> [K, HW]
    m_small = lax.dot_general(hyper, upf, (((1,), (1,)), ((), ())),
                              preferred_element_type=jnp.float32)

    # precomposed bilinear upsample (low-res mask, f32) and full postprocess
    # (resize -> crop -> resize, bf16 operator), both lane-dense matmuls with
    # the MXU M dimension filled by the K classes.
    low = jnp.dot(m_small, ulow_ref[...], preferred_element_type=jnp.float32)
    full = jnp.dot(m_small.astype(jnp.bfloat16), ufull_ref[...],
                   preferred_element_type=jnp.float32)

    # IoU prediction head (folded in; no extra pallas_call / HBM round trip)
    iou = jnp.dot(iou_tok, wiou_ref[...],
                  preferred_element_type=jnp.float32) + biou_ref[...]

    low_ref[0] = low                                  # [K, L*L]   (1024 lanes)
    mask_ref[0] = full                                # [K, OH*OW] (3840 lanes)
    iou_ref[0] = iou                                  # [K, 1]


def mask_decoder_pallas(feat, pe, no_mask, tokens, params):
    B, hw, E = feat.shape
    K, T_pad, _ = tokens.shape
    LL = LOW_RES * LOW_RES
    OHW = ORIGINAL_SIZE[0] * ORIGINAL_SIZE[1]

    def fixed(shape):
        # grid-invariant operand: constant index_map; single-buffer it when the
        # JAX version supports Buffered(1) (frees the dead second pipeline
        # buffer -- matters once dims scale toward real SAM / v7x's 64 MiB VMEM).
        zeros = (0,) * len(shape)
        if _USE_SINGLE_BUFFER_INVARIANTS:
            return pl.BlockSpec(shape, lambda b, _z=zeros: _z,
                                pipeline_mode=pl.Buffered(1))
        return pl.BlockSpec(shape, lambda b, _z=zeros: _z)

    in_specs = [
        pl.BlockSpec((1, hw, E), lambda b: (b, 0, 0)),           # feat (per image)
        fixed((hw, E)),                                          # dense positional enc
        fixed((1, E)),                                           # no_mask_embed
        fixed((K, T_pad, E)),                                    # all class tokens
        fixed((E, E)), fixed((E, E)), fixed((E, E)), fixed((E, E)),  # wq wk wv wo
        fixed((1, E)), fixed((1, E)),                            # gamma, beta
        fixed((E, UC)), fixed((1, UC)),                          # wup, bup
        fixed((E, UC)), fixed((1, UC)),                          # whyp, bhyp
        fixed((E, 1)), fixed((1, 1)),                            # wiou, biou
        fixed((hw, LL)),                                         # ulow  (f32)
        fixed((hw, OHW)),                                        # ufull (bf16)
    ]
    out_specs = (
        pl.BlockSpec((1, K, LL), lambda b: (b, 0, 0)),
        pl.BlockSpec((1, K, OHW), lambda b: (b, 0, 0)),
        pl.BlockSpec((1, K, 1), lambda b: (b, 0, 0)),
    )
    out_shape = (
        jax.ShapeDtypeStruct((B, K, LL), jnp.float32),
        jax.ShapeDtypeStruct((B, K, OHW), jnp.float32),
        jax.ShapeDtypeStruct((B, K, 1), jnp.float32),
    )
    return pl.pallas_call(
        _mask_decoder_kernel,
        out_shape=out_shape,
        grid=(B,),
        in_specs=in_specs,
        out_specs=out_specs,
        compiler_params=pltpu.CompilerParams(
            dimension_semantics=("parallel",)),   # 2-way TC split on v7x; serial elsewhere
    )(feat, pe, no_mask, tokens,
      params["wq"], params["wk"], params["wv"], params["wo"],
      params["gamma"], params["beta"],
      params["wup"], params["bup"], params["whyp"], params["bhyp"],
      params["wiou"], params["biou"],
      params["ulow"], params["ufull"])


# ---------------------------- glue / parameter setup -------------------------
def bilinear_matrix(out_size, in_size):
    """Row-stochastic matrix for 1-D bilinear resize, align_corners=False
    (matches torch.nn.functional.interpolate semantics). Returns float64 np."""
    A = np.zeros((out_size, in_size), np.float64)
    scale = in_size / out_size
    for i in range(out_size):
        s = max((i + 0.5) * scale - 0.5, 0.0)
        i0 = min(int(np.floor(s)), in_size - 1)
        i1 = min(i0 + 1, in_size - 1)
        w1 = s - i0
        A[i, i0] += 1.0 - w1
        A[i, i1] += w1
    return A


def build_resize_operators():
    """Pre-compose (upsample -> resize -> crop -> resize) into two constant
    matrices acting on the flattened [K, HW] embedding-grid mask rows.

    TODO(synk): at real SAM dims (HW=4096, OHW=1080*1920) the kron form is
    infeasible; switch to separable H/W bilinear matmuls with the output lane
    axis tiled in multiple-of-128 blocks."""
    IH, IW = INPUT_SIZE
    OH, OW = ORIGINAL_SIZE
    uh = bilinear_matrix(LOW_RES, EMB_H)          # [L, h]
    uw = bilinear_matrix(LOW_RES, EMB_W)          # [L, w]
    a1h = bilinear_matrix(IMG_SIZE, LOW_RES)      # [IMG, L]
    a1w = bilinear_matrix(IMG_SIZE, LOW_RES)      # [IMG, L]
    a2h = bilinear_matrix(OH, IH)                 # [OH, IH]
    a2w = bilinear_matrix(OW, IW)                 # [OW, IW]
    AH = a2h @ a1h[:IH, :]                        # [OH, L]   rows: resize+crop+resize
    AW = (a2w @ a1w[:IW, :]).T                    # [L, OW]   cols: resize+crop+resize
    GH = AH @ uh                                  # [OH, h]
    GW = AW.T @ uw                                # [OW, w]
    # ulow[(h*W + w), (a*L + b)] = uh[a, h] * uw[b, w]
    ulow = np.kron(uh, uw).T                      # [HW, L*L]
    # ufull[(h*W + w), (oi*OW + oj)] = GH[oi, h] * GW[oj, w]
    ufull = np.kron(GH, GW).T                     # [HW, OH*OW]
    # low-res path stays f32 (threshold parity); big full-res operator bf16.
    return (jnp.asarray(ulow, jnp.float32),
            jnp.asarray(ufull, jnp.bfloat16))


def get_dense_pe(gaussian):
    """PositionEmbeddingRandom-style dense PE, returned as [H*W, E]."""
    ys = (jnp.arange(EMB_H, dtype=jnp.float32) + 0.5) / EMB_H
    xs = (jnp.arange(EMB_W, dtype=jnp.float32) + 0.5) / EMB_W
    gy, gx = jnp.meshgrid(ys, xs, indexing="ij")
    coords = jnp.stack([gx, gy], axis=-1)              # (x, y), like SAM
    coords = 2.0 * coords - 1.0
    proj = 2.0 * jnp.pi * (coords @ gaussian)          # [H, W, E/2]
    pe = jnp.concatenate([jnp.sin(proj), jnp.cos(proj)], axis=-1)
    return pe.reshape(HW, EMBED_DIM)


def init_params(key):
    def nrm(k, shape, scale=0.05):
        return scale * jax.random.normal(k, shape, jnp.float32)

    ks = jax.random.split(key, 20)
    E = EMBED_DIM
    ulow, ufull = build_resize_operators()
    params = {
        # image_encoder (synthetic patch-embed stem)
        "patch_w": nrm(ks[0], (IMG_C * PATCH * PATCH, E)),
        "patch_b": nrm(ks[1], (1, E)),
        # prompt_encoder backbone + Linear(output_dim, embed_dim)
        "pe_w1": nrm(ks[2], (IMG_C * PROMPT_HW * PROMPT_HW, HIDDEN_PROMPT)),
        "pe_b1": nrm(ks[3], (1, HIDDEN_PROMPT)),
        "pe_w2": nrm(ks[4], (HIDDEN_PROMPT, E)),
        "pe_b2": nrm(ks[5], (1, E)),
        # prompt_encoder.no_mask_embed / pe_layer
        "no_mask_embed": nrm(ks[6], (1, E)),
        "pe_gaussian": jax.random.normal(ks[7], (2, E // 2), jnp.float32),
        # mask decoder (1/sqrt(E) attention scale folded into wq at init)
        "out_tokens": nrm(ks[8], (N_OUT_TOKENS, E)),
        "wq": nrm(ks[9], (E, E)) * (1.0 / math.sqrt(E)),
        "wk": nrm(ks[10], (E, E)),
        "wv": nrm(ks[11], (E, E)),
        "wo": nrm(ks[12], (E, E)),
        "gamma": jnp.ones((1, E), jnp.float32),
        "beta": jnp.zeros((1, E), jnp.float32),
        "wup": nrm(ks[13], (E, UC)),
        "bup": nrm(ks[14], (1, UC)),
        "whyp": nrm(ks[15], (E, UC)),
        "bhyp": nrm(ks[16], (1, UC)),
        "wiou": nrm(ks[17], (E, 1)),
        "biou": nrm(ks[18], (1, 1)),
        # precomposed bilinear upsample / postprocess operators
        "ulow": ulow,
        "ufull": ufull,
    }
    return params


def in_context_sam_forward(params, few_shot_prompt, batch_images,
                           return_logits=True):
    """few_shot_prompt: [K, N, C, Hp, Wp] (NCHW), batch_images: [B, C, H, W]."""
    K, N, C, Hp, Wp = few_shot_prompt.shape
    B, Ci, _, _ = batch_images.shape
    E = EMBED_DIM

    # ---- image_encoder(batch_images) -> features [B, HW, E] ----
    gh, gw = IMG_SIZE // PATCH, IMG_SIZE // PATCH
    # TODO(synk): at real SAM scale (1024x1024, patch 16) fold this patch
    # rearrangement into the patch-embed kernel (per-patch-row BlockSpec
    # index_map / strided reads) instead of an XLA-side transpose, to avoid
    # the extra HBM read+write of the full image.
    patches = batch_images.reshape(B, Ci, gh, PATCH, gw, PATCH)
    patches = patches.transpose(0, 2, 4, 1, 3, 5).reshape(
        B * gh * gw, Ci * PATCH * PATCH)
    feat = linear_pallas(patches, params["patch_w"], params["patch_b"])
    feat = feat.reshape(B, HW, E)

    # ---- prompt_encoder(few_shot_prompt.view(K*N, C, H, W)): fused MLP ----
    p = few_shot_prompt.reshape(K * N, C * Hp * Wp)
    sparse = mlp2_pallas(p, params["pe_w1"], params["pe_b1"],
                         params["pe_w2"], params["pe_b2"])
    sparse = sparse.reshape(K, N, E)

    # ---- tokens: learned [iou, mask] tokens + sparse prompts (padded to 8) ----
    out_tok = jnp.broadcast_to(params["out_tokens"][None], (K, N_OUT_TOKENS, E))
    tokens = jnp.concatenate([out_tok, sparse], axis=1)      # [K, 2+N, E]
    T = N_OUT_TOKENS + N
    T_pad = ((T + 7) // 8) * 8
    tokens = jnp.pad(tokens, ((0, 0), (0, T_pad - T), (0, 0)))

    # ---- get_dense_pe() ----
    pe_dense = get_dense_pe(params["pe_gaussian"])           # [HW, E]

    # ---- fused mask decoder + IoU head + postprocess (grid over images) ----
    low_flat, mask_flat, iou_predictions = mask_decoder_pallas(
        feat, pe_dense, params["no_mask_embed"], tokens, params)

    low_res_masks = low_flat.reshape(B, K, LOW_RES, LOW_RES)
    masks = mask_flat.reshape(B, K, ORIGINAL_SIZE[0], ORIGINAL_SIZE[1])

    if not return_logits:
        masks = masks > 0.0
    return masks, iou_predictions, low_res_masks


# ------------------------------------ main ------------------------------------
if __name__ == "__main__":
    key = jax.random.PRNGKey(0)
    pkey, k1, k2 = jax.random.split(key, 3)
    params = init_params(pkey)

    K, N, B = 2, 2, 2
    few_shot_prompt = jax.random.normal(
        k1, (K, N, IMG_C, PROMPT_HW, PROMPT_HW), jnp.float32)
    batch_images = jax.random.normal(
        k2, (B, IMG_C, IMG_SIZE, IMG_SIZE), jnp.float32)

    fwd = jax.jit(in_context_sam_forward)
    masks, iou_predictions, low_res_masks = fwd(params, few_shot_prompt, batch_images)
    jax.block_until_ready((masks, iou_predictions, low_res_masks))

    assert masks.shape == (B, K, ORIGINAL_SIZE[0], ORIGINAL_SIZE[1])
    assert iou_predictions.shape == (B, K, 1)
    assert low_res_masks.shape == (B, K, LOW_RES, LOW_RES)
    assert bool(jnp.all(jnp.isfinite(masks)))
    assert bool(jnp.all(jnp.isfinite(low_res_masks)))
    assert bool(jnp.all(jnp.isfinite(iou_predictions)))
    print("KERNEL_OK")
</pallas_src>

<mosaic_0001>
module attributes {stable_mosaic.version = 11 : i64} {
  func.func @_k(%arg0: i32, %arg1: memref<8x128xf32, #tpu.memory_space<vmem>>, %arg2: memref<8x128xf32, #tpu.memory_space<vmem>>) attributes {dimension_semantics = [#tpu.dimension_semantics<arbitrary>], iteration_bounds = array<i64: 1>, scalar_prefetch = 0 : i64, scratch_operands = 0 : i64, tpu.core_type = #tpu.core_type<tc>, window_params = [{pipeline_mode = #tpu.pipeline_mode<synchronous>, transform_indices = @transform_0, window_bounds = array<i64: 8, 128>}, {pipeline_mode = #tpu.pipeline_mode<synchronous>, transform_indices = @transform_1, window_bounds = array<i64: 8, 128>}]} {
    %c0 = arith.constant 0 : index
    %c0_0 = arith.constant 0 : index
    %0 = vector.load %arg1[%c0, %c0_0] : memref<8x128xf32, #tpu.memory_space<vmem>>, vector<8x128xf32>
    %cst = arith.constant 1.000000e+00 : f32
    %1 = vector.broadcast %cst : f32 to vector<8x128xf32>
    %2 = arith.addf %0, %1 : vector<8x128xf32>
    %c0_1 = arith.constant 0 : index
    %c0_2 = arith.constant 0 : index
    %3 = vector.load %arg2[%c0_1, %c0_2] : memref<8x128xf32, #tpu.memory_space<vmem>>, vector<8x128xf32>
    tpu.vector_store %arg2[%c0_1, %c0_2], %2 {strides = array<i32>} : memref<8x128xf32, #tpu.memory_space<vmem>>, vector<8x128xf32>,
    return
  }
  func.func @transform_0(%arg0: i32) -> (i32, i32) {
    %c0_i32 = arith.constant 0 : i32
    %c0_i32_0 = arith.constant 0 : i32
    %c0_i32_1 = arith.constant 0 : i32
    return %c0_i32, %c0_i32_0 : i32, i32
  }
  func.func @transform_1(%arg0: i32) -> (i32, i32) {
    %c0_i32 = arith.constant 0 : i32
    %c0_i32_0 = arith.constant 0 : i32
    %c0_i32_1 = arith.constant 0 : i32
    return %c0_i32, %c0_i32_0 : i32, i32
  }
}

module attributes {stable_mosaic.version = 11 : i64} {
  func.func @_linear_kernel(%arg0: i32, %arg1: memref<128x192xf32, #tpu.memory_space<vmem>>, %arg2: memref<192x128xf32, #tpu.memory_space<vmem>>, %arg3: memref<1x128xf32, #tpu.memory_space<vmem>>, %arg4: memref<128x128xf32, #tpu.memory_space<vmem>>) attributes {dimension_semantics = [#tpu.dimension_semantics<parallel>], iteration_bounds = array<i64: 1>, scalar_prefetch = 0 : i64, scratch_operands = 0 : i64, tpu.core_type = #tpu.core_type<tc>, window_params = [{transform_indices = @transform_0, window_bounds = array<i64: 128, 192>}, {pipeline_mode = #tpu.pipeline_mode<synchronous>, transform_indices = @transform_1, window_bounds = array<i64: 192, 128>}, {pipeline_mode = #tpu.pipeline_mode<synchronous>, transform_indices = @transform_2, window_bounds = array<i64: 1, 128>}, {transform_indices = @transform_3, window_bounds = array<i64: 128, 128>}]} {
    %c0 = arith.constant 0 : index
    %c0_0 = arith.constant 0 : index
    %0 = vector.load %arg1[%c0, %c0_0] : memref<128x192xf32, #tpu.memory_space<vmem>>, vector<128x192xf32>
    %c0_1 = arith.constant 0 : index
    %c0_2 = arith.constant 0 : index
    %1 = vector.load %arg2[%c0_1, %c0_2] : memref<192x128xf32, #tpu.memory_space<vmem>>, vector<192x128xf32>
    %cst = arith.constant dense<0.000000e+00> : vector<128x128xf32>
    %2 = tpu.matmul %0, %1, %cst {dimension_numbers = #tpu.dot_dimension_numbers<[1], [0], [0], [1], [0, 0, 1, 1], [], []>} : vector<128x192xf32>, vector<192x128xf32>, vector<128x128xf32> -> vector<128x128xf32>
    %c0_3 = arith.constant 0 : index
    %c0_4 = arith.constant 0 : index
    %3 = vector.load %arg3[%c0_3, %c0_4] : memref<1x128xf32, #tpu.memory_space<vmem>>, vector<1x128xf32>
    %4 = vector.broadcast %3 : vector<1x128xf32> to vector<128x128xf32>
    %5 = arith.addf %2, %4 : vector<128x128xf32>
    %c0_5 = arith.constant 0 : index
    %c0_6 = arith.constant 0 : index
    %6 = vector.load %arg4[%c0_5, %c0_6] : memref<128x128xf32, #tpu.memory_space<vmem>>, vector<128x128xf32>
    tpu.vector_store %arg4[%c0_5, %c0_6], %5 {strides = array<i32>} : memref<128x128xf32, #tpu.memory_space<vmem>>, vector<128x128xf32>,
    return
  }
  func.func @transform_0(%arg0: i32) -> (i32, i32) {
    %c0_i32 = arith.constant 0 : i32
    %c0_i32_0 = arith.constant 0 : i32
    return %arg0, %c0_i32 : i32, i32
  }
  func.func @transform_1(%arg0: i32) -> (i32, i32) {
    %c0_i32 = arith.constant 0 : i32
    %c0_i32_0 = arith.constant 0 : i32
    %c0_i32_1 = arith.constant 0 : i32
    return %c0_i32, %c0_i32_0 : i32, i32
  }
  func.func @transform_2(%arg0: i32) -> (i32, i32) {
    %c0_i32 = arith.constant 0 : i32
    %c0_i32_0 = arith.constant 0 : i32
    %c0_i32_1 = arith.constant 0 : i32
    return %c0_i32, %c0_i32_0 : i32, i32
  }
  func.func @transform_3(%arg0: i32) -> (i32, i32) {
    %c0_i32 = arith.constant 0 : i32
    %c0_i32_0 = arith.constant 0 : i32
    return %arg0, %c0_i32 : i32, i32
  }
}

module attributes {stable_mosaic.version = 11 : i64} {
  func.func @_mlp2_kernel(%arg0: i32, %arg1: memref<4x768xf32, #tpu.memory_space<vmem>>, %arg2: memref<768x128xf32, #tpu.memory_space<vmem>>, %arg3: memref<1x128xf32, #tpu.memory_space<vmem>>, %arg4: memref<128x128xf32, #tpu.memory_space<vmem>>, %arg5: memref<1x128xf32, #tpu.memory_space<vmem>>, %arg6: memref<4x128xf32, #tpu.memory_space<vmem>>) attributes {dimension_semantics = [#tpu.dimension_semantics<arbitrary>], iteration_bounds = array<i64: 1>, scalar_prefetch = 0 : i64, scratch_operands = 0 : i64, tpu.core_type = #tpu.core_type<tc>, window_params = [{pipeline_mode = #tpu.pipeline_mode<synchronous>, transform_indices = @transform_0, window_bounds = array<i64: 4, 768>}, {pipeline_mode = #tpu.pipeline_mode<synchronous>, transform_indices = @transform_1, window_bounds = array<i64: 768, 128>}, {pipeline_mode = #tpu.pipeline_mode<synchronous>, transform_indices = @transform_2, window_bounds = array<i64: 1, 128>}, {pipeline_mode = #tpu.pipeline_mode<synchronous>, transform_indices = @transform_3, window_bounds = array<i64: 128, 128>}, {pipeline_mode = #tpu.pipeline_mode<synchronous>, transform_indices = @transform_4, window_bounds = array<i64: 1, 128>}, {pipeline_mode = #tpu.pipeline_mode<synchronous>, transform_indices = @transform_5, window_bounds = array<i64: 4, 128>}]} {
    %c0 = arith.constant 0 : index
    %c0_0 = arith.constant 0 : index
    %0 = vector.load %arg1[%c0, %c0_0] : memref<4x768xf32, #tpu.memory_space<vmem>>, vector<4x768xf32>
    %c0_1 = arith.constant 0 : index
    %c0_2 = arith.constant 0 : index
    %1 = vector.load %arg2[%c0_1, %c0_2] : memref<768x128xf32, #tpu.memory_space<vmem>>, vector<768x128xf32>
    %cst = arith.constant dense<0.000000e+00> : vector<4x128xf32>
    %2 = tpu.matmul %0, %1, %cst {dimension_numbers = #tpu.dot_dimension_numbers<[1], [0], [0], [1], [0, 0, 1, 1], [], []>} : vector<4x768xf32>, vector<768x128xf32>, vector<4x128xf32> -> vector<4x128xf32>
    %c0_3 = arith.constant 0 : index
    %c0_4 = arith.constant 0 : index
    %3 = vector.load %arg3[%c0_3, %c0_4] : memref<1x128xf32, #tpu.memory_space<vmem>>, vector<1x128xf32>
    %4 = vector.broadcast %3 : vector<1x128xf32> to vector<4x128xf32>
    %5 = arith.addf %2, %4 : vector<4x128xf32>
    %cst_5 = arith.constant 0.000000e+00 : f32
    %6 = vector.broadcast %cst_5 : f32 to vector<4x128xf32>
    %7 = arith.maximumf %5, %6 : vector<4x128xf32>
    %c0_6 = arith.constant 0 : index
    %c0_7 = arith.constant 0 : index
    %8 = vector.load %arg4[%c0_6, %c0_7] : memref<128x128xf32, #tpu.memory_space<vmem>>, vector<128x128xf32>
    %cst_8 = arith.constant dense<0.000000e+00> : vector<4x128xf32>
    %9 = tpu.matmul %7, %8, %cst_8 {dimension_numbers = #tpu.dot_dimension_numbers<[1], [0], [0], [1], [0, 0, 1, 1], [], []>} : vector<4x128xf32>, vector<128x128xf32>, vector<4x128xf32> -> vector<4x128xf32>
    %c0_9 = arith.constant 0 : index
    %c0_10 = arith.constant 0 : index
    %10 = vector.load %arg5[%c0_9, %c0_10] : memref<1x128xf32, #tpu.memory_space<vmem>>, vector<1x128xf32>
    %11 = vector.broadcast %10 : vector<1x128xf32> to vector<4x128xf32>
    %12 = arith.addf %9, %11 : vector<4x128xf32>
    %c0_11 = arith.constant 0 : index
    %c0_12 = arith.constant 0 : index
    %13 = vector.load %arg6[%c0_11, %c0_12] : memref<4x128xf32, #tpu.memory_space<vmem>>, vector<4x128xf32>
    tpu.vector_store %arg6[%c0_11, %c0_12], %12 {strides = array<i32>} : memref<4x128xf32, #tpu.memory_space<vmem>>, vector<4x128xf32>,
    return
  }
  func.func @transform_0(%arg0: i32) -> (i32, i32) {
    %c0_i32 = arith.constant 0 : i32
    %c0_i32_0 = arith.constant 0 : i32
    %c0_i32_1 = arith.constant 0 : i32
    return %c0_i32, %c0_i32_0 : i32, i32
  }
  func.func @transform_1(%arg0: i32) -> (i32, i32) {
    %c0_i32 = arith.constant 0 : i32
    %c0_i32_0 = arith.constant 0 : i32
    %c0_i32_1 = arith.constant 0 : i32
    return %c0_i32, %c0_i32_0 : i32, i32
  }
  func.func @transform_2(%arg0: i32) -> (i32, i32) {
    %c0_i32 = arith.constant 0 : i32
    %c0_i32_0 = arith.constant 0 : i32
    %c0_i32_1 = arith.constant 0 : i32
    return %c0_i32, %c0_i32_0 : i32, i32
  }
  func.func @transform_3(%arg0: i32) -> (i32, i32) {
    %c0_i32 = arith.constant 0 : i32
    %c0_i32_0 = arith.constant 0 : i32
    %c0_i32_1 = arith.constant 0 : i32
    return %c0_i32, %c0_i32_0 : i32, i32
  }
  func.func @transform_4(%arg0: i32) -> (i32, i32) {
    %c0_i32 = arith.constant 0 : i32
    %c0_i32_0 = arith.constant 0 : i32
    %c0_i32_1 = arith.constant 0 : i32
    return %c0_i32, %c0_i32_0 : i32, i32
  }
  func.func @transform_5(%arg0: i32) -> (i32, i32) {
    %c0_i32 = arith.constant 0 : i32
    %c0_i32_0 = arith.constant 0 : i32
    %c0_i32_1 = arith.constant 0 : i32
    return %c0_i32, %c0_i32_0 : i32, i32
  }
}

module attributes {stable_mosaic.version = 11 : i64} {
  func.func @_mask_decoder_kernel(%arg0: i32, %arg1: memref<1x64x128xf32, #tpu.memory_space<vmem>>, %arg2: memref<64x128xf32, #tpu.memory_space<vmem>>, %arg3: memref<1x128xf32, #tpu.memory_space<vmem>>, %arg4: memref<2x8x128xf32, #tpu.memory_space<vmem>>, %arg5: memref<128x128xf32, #tpu.memory_space<vmem>>, %arg6: memref<128x128xf32, #tpu.memory_space<vmem>>, %arg7: memref<128x128xf32, #tpu.memory_space<vmem>>, %arg8: memref<128x128xf32, #tpu.memory_space<vmem>>, %arg9: memref<1x128xf32, #tpu.memory_space<vmem>>, %arg10: memref<1x128xf32, #tpu.memory_space<vmem>>, %arg11: memref<128x16xf32, #tpu.memory_space<vmem>>, %arg12: memref<1x16xf32, #tpu.memory_space<vmem>>, %arg13: memref<128x16xf32, #tpu.memory_space<vmem>>, %arg14: memref<1x16xf32, #tpu.memory_space<vmem>>, %arg15: memref<128x1xf32, #tpu.memory_space<vmem>>, %arg16: memref<1x1xf32, #tpu.memory_space<vmem>>, %arg17: memref<64x1024xf32, #tpu.memory_space<vmem>>, %arg18: memref<64x3840xbf16, #tpu.memory_space<vmem>>, %arg19: memref<1x2x1024xf32, #tpu.memory_space<vmem>>, %arg20: memref<1x2x3840xf32, #tpu.memory_space<vmem>>, %arg21: memref<1x2x1xf32, #tpu.memory_space<vmem>>) attributes {dimension_semantics = [#tpu.dimension_semantics<parallel>], iteration_bounds = array<i64: 2>, scalar_prefetch = 0 : i64, scratch_operands = 0 : i64, tpu.core_type = #tpu.core_type<tc>, window_params = [{transform_indices = @transform_0, window_bounds = array<i64: 1, 64, 128>}, {pipeline_mode = #tpu.pipeline_mode<synchronous>, transform_indices = @transform_1, window_bounds = array<i64: 64, 128>}, {pipeline_mode = #tpu.pipeline_mode<synchronous>, transform_indices = @transform_2, window_bounds = array<i64: 1, 128>}, {pipeline_mode = #tpu.pipeline_mode<synchronous>, transform_indices = @transform_3, window_bounds = array<i64: 2, 8, 128>}, {pipeline_mode = #tpu.pipeline_mode<synchronous>, transform_indices = @transform_4, window_bounds = array<i64: 128, 128>}, {pipeline_mode = #tpu.pipeline_mode<synchronous>, transform_indices = @transform_5, window_bounds = array<i64: 128, 128>}, {pipeline_mode = #tpu.pipeline_mode<synchronous>, transform_indices = @transform_6, window_bounds = array<i64: 128, 128>}, {pipeline_mode = #tpu.pipeline_mode<synchronous>, transform_indices = @transform_7, window_bounds = array<i64: 128, 128>}, {pipeline_mode = #tpu.pipeline_mode<synchronous>, transform_indices = @transform_8, window_bounds = array<i64: 1, 128>}, {pipeline_mode = #tpu.pipeline_mode<synchronous>, transform_indices = @transform_9, window_bounds = array<i64: 1, 128>}, {pipeline_mode = #tpu.pipeline_mode<synchronous>, transform_indices = @transform_10, window_bounds = array<i64: 128, 16>}, {pipeline_mode = #tpu.pipeline_mode<synchronous>, transform_indices = @transform_11, window_bounds = array<i64: 1, 16>}, {pipeline_mode = #tpu.pipeline_mode<synchronous>, transform_indices = @transform_12, window_bounds = array<i64: 128, 16>}, {pipeline_mode = #tpu.pipeline_mode<synchronous>, transform_indices = @transform_13, window_bounds = array<i64: 1, 16>}, {pipeline_mode = #tpu.pipeline_mode<synchronous>, transform_indices = @transform_14, window_bounds = array<i64: 128, 1>}, {pipeline_mode = #tpu.pipeline_mode<synchronous>, transform_indices = @transform_15, window_bounds = array<i64: 1, 1>}, {pipeline_mode = #tpu.pipeline_mode<synchronous>, transform_indices = @transform_16, window_bounds = array<i64: 64, 1024>}, {pipeline_mode = #tpu.pipeline_mode<synchronous>, transform_indices = @transform_17, window_bounds = array<i64: 64, 3840>}, {transform_indices = @transform_18, window_bounds = array<i64: 1, 2, 1024>}, {transform_indices = @transform_19, window_bounds = array<i64: 1, 2, 3840>}, {transform_indices = @transform_20, window_bounds = array<i64: 1, 2, 1>}]} {
    %c0 = arith.constant 0 : index
    %c0_0 = arith.constant 0 : index
    %c0_1 = arith.constant 0 : index
    %0 = vector.load %arg1[%c0, %c0_0, %c0_1] : memref<1x64x128xf32, #tpu.memory_space<vmem>>, vector<1x64x128xf32>
    %1 = vector.shape_cast %0 : vector<1x64x128xf32> to vector<64x128xf32>
    %c0_2 = arith.constant 0 : index
    %c0_3 = arith.constant 0 : index
    %2 = vector.load %arg3[%c0_2, %c0_3] : memref<1x128xf32, #tpu.memory_space<vmem>>, vector<1x128xf32>
    %3 = vector.broadcast %2 : vector<1x128xf32> to vector<64x128xf32>
    %4 = arith.addf %1, %3 : vector<64x128xf32>
    %c0_4 = arith.constant 0 : index
    %c0_5 = arith.constant 0 : index
    %5 = vector.load %arg2[%c0_4, %c0_5] : memref<64x128xf32, #tpu.memory_space<vmem>>, vector<64x128xf32>
    %6 = arith.addf %4, %5 : vector<64x128xf32>
    %c0_6 = arith.constant 0 : index
    %c0_7 = arith.constant 0 : index
    %7 = vector.load %arg6[%c0_6, %c0_7] : memref<128x128xf32, #tpu.memory_space<vmem>>, vector<128x128xf32>
    %cst = arith.constant dense<0.000000e+00> : vector<64x128xf32>
    %8 = tpu.matmul %6, %7, %cst {dimension_numbers = #tpu.dot_dimension_numbers<[1], [0], [0], [1], [0, 0, 1, 1], [], []>} : vector<64x128xf32>, vector<128x128xf32>, vector<64x128xf32> -> vector<64x128xf32>
    %c0_8 = arith.constant 0 : index
    %c0_9 = arith.constant 0 : index
    %9 = vector.load %arg7[%c0_8, %c0_9] : memref<128x128xf32, #tpu.memory_space<vmem>>, vector<128x128xf32>
    %cst_10 = arith.constant dense<0.000000e+00> : vector<64x128xf32>
    %10 = tpu.matmul %4, %9, %cst_10 {dimension_numbers = #tpu.dot_dimension_numbers<[1], [0], [0], [1], [0, 0, 1, 1], [], []>} : vector<64x128xf32>, vector<128x128xf32>, vector<64x128xf32> -> vector<64x128xf32>
    %c0_11 = arith.constant 0 : index
    %c0_12 = arith.constant 0 : index
    %11 = vector.load %arg11[%c0_11, %c0_12] : memref<128x16xf32, #tpu.memory_space<vmem>>, vector<128x16xf32>
    %cst_13 = arith.constant dense<0.000000e+00> : vector<64x16xf32>
    %12 = tpu.matmul %4, %11, %cst_13 {dimension_numbers = #tpu.dot_dimension_numbers<[1], [0], [0], [1], [0, 0, 1, 1], [], []>} : vector<64x128xf32>, vector<128x16xf32>, vector<64x16xf32> -> vector<64x16xf32>
    %c0_14 = arith.constant 0 : index
    %c0_15 = arith.constant 0 : index
    %13 = vector.load %arg12[%c0_14, %c0_15] : memref<1x16xf32, #tpu.memory_space<vmem>>, vector<1x16xf32>
    %14 = vector.broadcast %13 : vector<1x16xf32> to vector<64x16xf32>
    %15 = arith.addf %12, %14 : vector<64x16xf32>
    %cst_16 = arith.constant 0.000000e+00 : f32
    %16 = vector.broadcast %cst_16 : f32 to vector<64x16xf32>
    %17 = arith.maximumf %15, %16 : vector<64x16xf32>
    %c0_17 = arith.constant 0 : index
    %c0_18 = arith.constant 0 : index
    %c0_19 = arith.constant 0 : index
    %18 = vector.load %arg4[%c0_17, %c0_18, %c0_19] : memref<2x8x128xf32, #tpu.memory_space<vmem>>, vector<2x8x128xf32>
    %19 = vector.shape_cast %18 : vector<2x8x128xf32> to vector<16x128xf32>
    %c0_20 = arith.constant 0 : index
    %c0_21 = arith.constant 0 : index
    %20 = vector.load %arg5[%c0_20, %c0_21] : memref<128x128xf32, #tpu.memory_space<vmem>>, vector<128x128xf32>
    %cst_22 = arith.constant dense<0.000000e+00> : vector<16x128xf32>
    %21 = tpu.matmul %19, %20, %cst_22 {dimension_numbers = #tpu.dot_dimension_numbers<[1], [0], [0], [1], [0, 0, 1, 1], [], []>} : vector<16x128xf32>, vector<128x128xf32>, vector<16x128xf32> -> vector<16x128xf32>
    %cst_23 = arith.constant dense<0.000000e+00> : vector<16x64xf32>
    %22 = tpu.matmul %21, %8, %cst_23 {dimension_numbers = #tpu.dot_dimension_numbers<[1], [1], [0], [0], [0, 0, 1, 0], [], []>} : vector<16x128xf32>, vector<64x128xf32>, vector<16x64xf32> -> vector<16x64xf32>
    %cst_24 = arith.constant dense<0xFF800000> : vector<16xf32>
    %23 = vector.multi_reduction <maximumf>, %22, %cst_24 [1] : vector<16x64xf32> to vector<16xf32>
    %24 = vector.shape_cast %23 : vector<16xf32> to vector<16x1xf32>
    %25 = vector.broadcast %24 : vector<16x1xf32> to vector<16x64xf32>
    %26 = arith.subf %22, %25 : vector<16x64xf32>
    %27 = math.exp %26 : vector<16x64xf32>
    %cst_25 = arith.constant dense<0.000000e+00> : vector<16xf32>
    %28 = vector.multi_reduction <add>, %27, %cst_25 [1] : vector<16x64xf32> to vector<16xf32>
    %29 = vector.shape_cast %28 : vector<16xf32> to vector<16x1xf32>
    %30 = tpu.reciprocal %29 {approx = true} : vector<16x1xf32> -> vector<16x1xf32>
    %31 = vector.broadcast %30 : vector<16x1xf32> to vector<16x64xf32>
    %32 = arith.mulf %27, %31 : vector<16x64xf32>
    %cst_26 = arith.constant dense<0.000000e+00> : vector<16x128xf32>
    %33 = tpu.matmul %32, %10, %cst_26 {dimension_numbers = #tpu.dot_dimension_numbers<[1], [0], [0], [1], [0, 0, 1, 1], [], []>} : vector<16x64xf32>, vector<64x128xf32>, vector<16x128xf32> -> vector<16x128xf32>
    %c0_27 = arith.constant 0 : index
    %c0_28 = arith.constant 0 : index
    %34 = vector.load %arg8[%c0_27, %c0_28] : memref<128x128xf32, #tpu.memory_space<vmem>>, vector<128x128xf32>
    %cst_29 = arith.constant dense<0.000000e+00> : vector<16x128xf32>
    %35 = tpu.matmul %33, %34, %cst_29 {dimension_numbers = #tpu.dot_dimension_numbers<[1], [0], [0], [1], [0, 0, 1, 1], [], []>} : vector<16x128xf32>, vector<128x128xf32>, vector<16x128xf32> -> vector<16x128xf32>
    %36 = arith.addf %19, %35 : vector<16x128xf32>
    %cst_30 = arith.constant dense<0.000000e+00> : vector<16xf32>
    %37 = vector.multi_reduction <add>, %36, %cst_30 [1] : vector<16x128xf32> to vector<16xf32>
    %38 = vector.shape_cast %37 : vector<16xf32> to vector<16x1xf32>
    %cst_31 = arith.constant 1.280000e+02 : f32
    %39 = vector.broadcast %cst_31 : f32 to vector<16x1xf32>
    %40 = arith.divf %38, %39 : vector<16x1xf32>
    %41 = vector.broadcast %40 : vector<16x1xf32> to vector<16x128xf32>
    %42 = arith.subf %36, %41 : vector<16x128xf32>
    %43 = arith.mulf %42, %42 : vector<16x128xf32>
    %cst_32 = arith.constant dense<0.000000e+00> : vector<16xf32>
    %44 = vector.multi_reduction <add>, %43, %cst_32 [1] : vector<16x128xf32> to vector<16xf32>
    %45 = vector.shape_cast %44 : vector<16xf32> to vector<16x1xf32>
    %cst_33 = arith.constant 1.280000e+02 : f32
    %46 = vector.broadcast %cst_33 : f32 to vector<16x1xf32>
    %47 = arith.divf %45, %46 : vector<16x1xf32>
    %48 = vector.broadcast %40 : vector<16x1xf32> to vector<16x128xf32>
    %49 = arith.subf %36, %48 : vector<16x128xf32>
    %cst_34 = arith.constant 9.99999997E-7 : f32
    %50 = vector.broadcast %cst_34 : f32 to vector<16x1xf32>
    %51 = arith.addf %47, %50 : vector<16x1xf32>
    %52 = math.rsqrt %51 : vector<16x1xf32>
    %53 = vector.broadcast %52 : vector<16x1xf32> to vector<16x128xf32>
    %54 = arith.mulf %49, %53 : vector<16x128xf32>
    %c0_35 = arith.constant 0 : index
    %c0_36 = arith.constant 0 : index
    %55 = vector.load %arg9[%c0_35, %c0_36] : memref<1x128xf32, #tpu.memory_space<vmem>>, vector<1x128xf32>
    %56 = vector.broadcast %55 : vector<1x128xf32> to vector<16x128xf32>
    %57 = arith.mulf %54, %56 : vector<16x128xf32>
    %c0_37 = arith.constant 0 : index
    %c0_38 = arith.constant 0 : index
    %58 = vector.load %arg10[%c0_37, %c0_38] : memref<1x128xf32, #tpu.memory_space<vmem>>, vector<1x128xf32>
    %59 = vector.broadcast %58 : vector<1x128xf32> to vector<16x128xf32>
    %60 = arith.addf %57, %59 : vector<16x128xf32>
    %61 = vector.extract_strided_slice %60 {offsets = [0, 0], sizes = [1, 128], strides = [1, 1]} : vector<16x128xf32> to vector<1x128xf32>
    %62 = vector.extract_strided_slice %60 {offsets = [1, 0], sizes = [1, 128], strides = [1, 1]} : vector<16x128xf32> to vector<1x128xf32>
    %63 = vector.extract_strided_slice %60 {offsets = [8, 0], sizes = [1, 128], strides = [1, 1]} : vector<16x128xf32> to vector<1x128xf32>
    %64 = vector.extract_strided_slice %60 {offsets = [9, 0], sizes = [1, 128], strides = [1, 1]} : vector<16x128xf32> to vector<1x128xf32>
    %65 = tpu.concatenate %61, %63 in 0 : vector<1x128xf32>, vector<1x128xf32> -> vector<2x128xf32>
    %66 = tpu.concatenate %62, %64 in 0 : vector<1x128xf32>, vector<1x128xf32> -> vector<2x128xf32>
    %c0_39 = arith.constant 0 : index
    %c0_40 = arith.constant 0 : index
    %67 = vector.load %arg13[%c0_39, %c0_40] : memref<128x16xf32, #tpu.memory_space<vmem>>, vector<128x16xf32>
    %cst_41 = arith.constant dense<0.000000e+00> : vector<2x16xf32>
    %68 = tpu.matmul %66, %67, %cst_41 {dimension_numbers = #tpu.dot_dimension_numbers<[1], [0], [0], [1], [0, 0, 1, 1], [], []>} : vector<2x128xf32>, vector<128x16xf32>, vector<2x16xf32> -> vector<2x16xf32>
    %c0_42 = arith.constant 0 : index
    %c0_43 = arith.constant 0 : index
    %69 = vector.load %arg14[%c0_42, %c0_43] : memref<1x16xf32, #tpu.memory_space<vmem>>, vector<1x16xf32>
    %70 = vector.broadcast %69 : vector<1x16xf32> to vector<2x16xf32>
    %71 = arith.addf %68, %70 : vector<2x16xf32>
    %cst_44 = arith.constant 0.000000e+00 : f32
    %72 = vector.broadcast %cst_44 : f32 to vector<2x16xf32>
    %73 = arith.maximumf %71, %72 : vector<2x16xf32>
    %cst_45 = arith.constant dense<0.000000e+00> : vector<2x64xf32>
    %74 = tpu.matmul %73, %17, %cst_45 {dimension_numbers = #tpu.dot_dimension_numbers<[1], [1], [0], [0], [0, 0, 1, 0], [], []>} : vector<2x16xf32>, vector<64x16xf32>, vector<2x64xf32> -> vector<2x64xf32>
    %c0_46 = arith.constant 0 : index
    %c0_47 = arith.constant 0 : index
    %75 = vector.load %arg17[%c0_46, %c0_47] : memref<64x1024xf32, #tpu.memory_space<vmem>>, vector<64x1024xf32>
    %cst_48 = arith.constant dense<0.000000e+00> : vector<2x1024xf32>
    %76 = tpu.matmul %74, %75, %cst_48 {dimension_numbers = #tpu.dot_dimension_numbers<[1], [0], [0], [1], [0, 0, 1, 1], [], []>} : vector<2x64xf32>, vector<64x1024xf32>, vector<2x1024xf32> -> vector<2x1024xf32>
    %77 = arith.truncf %74 : vector<2x64xf32> to vector<2x64xbf16>
    %c0_49 = arith.constant 0 : index
    %c0_50 = arith.constant 0 : index
    %78 = vector.load %arg18[%c0_49, %c0_50] : memref<64x3840xbf16, #tpu.memory_space<vmem>>, vector<64x3840xbf16>
    %cst_51 = arith.constant dense<0.000000e+00> : vector<2x3840xf32>
    %79 = tpu.matmul %77, %78, %cst_51 {dimension_numbers = #tpu.dot_dimension_numbers<[1], [0], [0], [1], [0, 0, 1, 1], [], []>} : vector<2x64xbf16>, vector<64x3840xbf16>, vector<2x3840xf32> -> vector<2x3840xf32>
    %c0_52 = arith.constant 0 : index
    %c0_53 = arith.constant 0 : index
    %80 = vector.load %arg15[%c0_52, %c0_53] : memref<128x1xf32, #tpu.memory_space<vmem>>, vector<128x1xf32>
    %cst_54 = arith.constant dense<0.000000e+00> : vector<2x1xf32>
    %81 = tpu.matmul %65, %80, %cst_54 {dimension_numbers = #tpu.dot_dimension_numbers<[1], [0], [0], [1], [0, 0, 1, 1], [], []>} : vector<2x128xf32>, vector<128x1xf32>, vector<2x1xf32> -> vector<2x1xf32>
    %c0_55 = arith.constant 0 : index
    %c0_56 = arith.constant 0 : index
    %82 = vector.load %arg16[%c0_55, %c0_56] : memref<1x1xf32, #tpu.memory_space<vmem>>, vector<1x1xf32>
    %83 = vector.broadcast %82 : vector<1x1xf32> to vector<2x1xf32>
    %84 = arith.addf %81, %83 : vector<2x1xf32>
    %c0_57 = arith.constant 0 : index
    %c0_58 = arith.constant 0 : index
    %c0_59 = arith.constant 0 : index
    %85 = vector.load %arg19[%c0_57, %c0_58, %c0_59] : memref<1x2x1024xf32, #tpu.memory_space<vmem>>, vector<1x2x1024xf32>
    %86 = vector.shape_cast %85 : vector<1x2x1024xf32> to vector<2x1024xf32>
    %87 = vector.shape_cast %76 : vector<2x1024xf32> to vector<1x2x1024xf32>
    tpu.vector_store %arg19[%c0_57, %c0_58, %c0_59], %87 {strides = array<i32>} : memref<1x2x1024xf32, #tpu.memory_space<vmem>>, vector<1x2x1024xf32>,
    %c0_60 = arith.constant 0 : index
    %c0_61 = arith.constant 0 : index
    %c0_62 = arith.constant 0 : index
    %88 = vector.load %arg20[%c0_60, %c0_61, %c0_62] : memref<1x2x3840xf32, #tpu.memory_space<vmem>>, vector<1x2x3840xf32>
    %89 = vector.shape_cast %88 : vector<1x2x3840xf32> to vector<2x3840xf32>
    %90 = vector.shape_cast %79 : vector<2x3840xf32> to vector<1x2x3840xf32>
    tpu.vector_store %arg20[%c0_60, %c0_61, %c0_62], %90 {strides = array<i32>} : memref<1x2x3840xf32, #tpu.memory_space<vmem>>, vector<1x2x3840xf32>,
    %c0_63 = arith.constant 0 : index
    %c0_64 = arith.constant 0 : index
    %c0_65 = arith.constant 0 : index
    %91 = vector.load %arg21[%c0_63, %c0_64, %c0_65] : memref<1x2x1xf32, #tpu.memory_space<vmem>>, vector<1x2x1xf32>
    %92 = vector.shape_cast %91 : vector<1x2x1xf32> to vector<2x1xf32>
    %93 = vector.shape_cast %84 : vector<2x1xf32> to vector<1x2x1xf32>
    tpu.vector_store %arg21[%c0_63, %c0_64, %c0_65], %93 {strides = array<i32>} : memref<1x2x1xf32, #tpu.memory_space<vmem>>, vector<1x2x1xf32>,
    return
  }
  func.func @transform_0(%arg0: i32) -> (i32, i32, i32) {
    %c0_i32 = arith.constant 0 : i32
    %c0_i32_0 = arith.constant 0 : i32
    %c0_i32_1 = arith.constant 0 : i32
    return %arg0, %c0_i32, %c0_i32_0 : i32, i32, i32
  }
  func.func @transform_1(%arg0: i32) -> (i32, i32) {
    %c0_i32 = arith.constant 0 : i32
    %c0_i32_0 = arith.constant 0 : i32
    %c0_i32_1 = arith.constant 0 : i32
    return %c0_i32, %c0_i32_0 : i32, i32
  }
  func.func @transform_2(%arg0: i32) -> (i32, i32) {
    %c0_i32 = arith.constant 0 : i32
    %c0_i32_0 = arith.constant 0 : i32
    %c0_i32_1 = arith.constant 0 : i32
    return %c0_i32, %c0_i32_0 : i32, i32
  }
  func.func @transform_3(%arg0: i32) -> (i32, i32, i32) {
    %c0_i32 = arith.constant 0 : i32
    %c0_i32_0 = arith.constant 0 : i32
    %c0_i32_1 = arith.constant 0 : i32
    %c0_i32_2 = arith.constant 0 : i32
    return %c0_i32, %c0_i32_0, %c0_i32_1 : i32, i32, i32
  }
  func.func @transform_4(%arg0: i32) -> (i32, i32) {
    %c0_i32 = arith.constant 0 : i32
    %c0_i32_0 = arith.constant 0 : i32
    %c0_i32_1 = arith.constant 0 : i32
    return %c0_i32, %c0_i32_0 : i32, i32
  }
  func.func @transform_5(%arg0: i32) -> (i32, i32) {
    %c0_i32 = arith.constant 0 : i32
    %c0_i32_0 = arith.constant 0 : i32
    %c0_i32_1 = arith.constant 0 : i32
    return %c0_i32, %c0_i32_0 : i32, i32
  }
  func.func @transform_6(%arg0: i32) -> (i32, i32) {
    %c0_i32 = arith.constant 0 : i32
    %c0_i32_0 = arith.constant 0 : i32
    %c0_i32_1 = arith.constant 0 : i32
    return %c0_i32, %c0_i32_0 : i32, i32
  }
  func.func @transform_7(%arg0: i32) -> (i32, i32) {
    %c0_i32 = arith.constant 0 : i32
    %c0_i32_0 = arith.constant 0 : i32
    %c0_i32_1 = arith.constant 0 : i32
    return %c0_i32, %c0_i32_0 : i32, i32
  }
  func.func @transform_8(%arg0: i32) -> (i32, i32) {
    %c0_i32 = arith.constant 0 : i32
    %c0_i32_0 = arith.constant 0 : i32
    %c0_i32_1 = arith.constant 0 : i32
    return %c0_i32, %c0_i32_0 : i32, i32
  }
  func.func @transform_9(%arg0: i32) -> (i32, i32) {
    %c0_i32 = arith.constant 0 : i32
    %c0_i32_0 = arith.constant 0 : i32
    %c0_i32_1 = arith.constant 0 : i32
    return %c0_i32, %c0_i32_0 : i32, i32
  }
  func.func @transform_10(%arg0: i32) -> (i32, i32) {
    %c0_i32 = arith.constant 0 : i32
    %c0_i32_0 = arith.constant 0 : i32
    %c0_i32_1 = arith.constant 0 : i32
    return %c0_i32, %c0_i32_0 : i32, i32
  }
  func.func @transform_11(%arg0: i32) -> (i32, i32) {
    %c0_i32 = arith.constant 0 : i32
    %c0_i32_0 = arith.constant 0 : i32
    %c0_i32_1 = arith.constant 0 : i32
    return %c0_i32, %c0_i32_0 : i32, i32
  }
  func.func @transform_12(%arg0: i32) -> (i32, i32) {
    %c0_i32 = arith.constant 0 : i32
    %c0_i32_0 = arith.constant 0 : i32
    %c0_i32_1 = arith.constant 0 : i32
    return %c0_i32, %c0_i32_0 : i32, i32
  }
  func.func @transform_13(%arg0: i32) -> (i32, i32) {
    %c0_i32 = arith.constant 0 : i32
    %c0_i32_0 = arith.constant 0 : i32
    %c0_i32_1 = arith.constant 0 : i32
    return %c0_i32, %c0_i32_0 : i32, i32
  }
  func.func @transform_14(%arg0: i32) -> (i32, i32) {
    %c0_i32 = arith.constant 0 : i32
    %c0_i32_0 = arith.constant 0 : i32
    %c0_i32_1 = arith.constant 0 : i32
    return %c0_i32, %c0_i32_0 : i32, i32
  }
  func.func @transform_15(%arg0: i32) -> (i32, i32) {
    %c0_i32 = arith.constant 0 : i32
    %c0_i32_0 = arith.constant 0 : i32
    %c0_i32_1 = arith.constant 0 : i32
    return %c0_i32, %c0_i32_0 : i32, i32
  }
  func.func @transform_16(%arg0: i32) -> (i32, i32) {
    %c0_i32 = arith.constant 0 : i32
    %c0_i32_0 = arith.constant 0 : i32
    %c0_i32_1 = arith.constant 0 : i32
    return %c0_i32, %c0_i32_0 : i32, i32
  }
  func.func @transform_17(%arg0: i32) -> (i32, i32) {
    %c0_i32 = arith.constant 0 : i32
    %c0_i32_0 = arith.constant 0 : i32
    %c0_i32_1 = arith.constant 0 : i32
    return %c0_i32, %c0_i32_0 : i32, i32
  }
  func.func @transform_18(%arg0: i32) -> (i32, i32, i32) {
    %c0_i32 = arith.constant 0 : i32
    %c0_i32_0 = arith.constant 0 : i32
    %c0_i32_1 = arith.constant 0 : i32
    return %arg0, %c0_i32, %c0_i32_0 : i32, i32, i32
  }
  func.func @transform_19(%arg0: i32) -> (i32, i32, i32) {
    %c0_i32 = arith.constant 0 : i32
    %c0_i32_0 = arith.constant 0 : i32
    %c0_i32_1 = arith.constant 0 : i32
    return %arg0, %c0_i32, %c0_i32_0 : i32, i32, i32
  }
  func.func @transform_20(%arg0: i32) -> (i32, i32, i32) {
    %c0_i32 = arith.constant 0 : i32
    %c0_i32_0 = arith.constant 0 : i32
    %c0_i32_1 = arith.constant 0 : i32
    return %arg0, %c0_i32, %c0_i32_0 : i32, i32, i32
  }
}

</mosaic_0001>

<bundles_post_ra>
// kernel: tpu_custom_call.1
= control target key start
LH: loop header
LB: loop body
LE: loop exit
PB: predicated region body
PF: predicated region fallthrough
CT: control target
= control target key end

     0   :  { %6 = vsyncpa [#allocation3], 0  ;;  %s103_s0 = inlined_call_operand.hbm [shape: f32[8,128], index: 0, kind: input, shape index: {}]   ;;  %s104_s1 = inlined_call_operand.hbm [shape: f32[8,128], index: 1, kind: output, shape index: {}]  }
   0x1   :  { %7 = vsyncpa [#allocation4], 0  ;;  %s85_s6 = smov [#allocation2]  }
   0x2   :  { %s14_s7 = sshll.u32 %s85_s6, 4  ;;  %s15_s7 = int_to_ptr.vmem [resolvable:$true] %s14_s7 }
   0x3   :  { %s49_s8 = scalar_lea.vmem %s15_s7, 128  ;;  %p54_p1 = scmp.lt.s32.totalorder %s15_s7, %s15_s7 }
   0x4   :  { %p50_p0 = scmp.ne.s32.totalorder %s15_s7, %s49_s8  ;;  %p55_p2 = scmp.lt.s32.totalorder %s49_s8, %s49_s8 }
   0x6   :  { %p56_p3 = por %p55_p2, %p54_p1 }
   0x8   :  { %p57_p4 = pnand %p56_p3, %p50_p0 }
   0xa   :  { %60 = shalt.err (!%p57_p4)
}
   0xb   :  { %17 = dma.hbm_to_vmem [thread:$0]  %s103_s0, 128, %s15_s7, [#allocation3]  }
   0xc   :  { %81 = dma.done.wait [#allocation3], 128  }
   0xd   :  { %82 = vsyncadd [#allocation3], 4294967168  ;;  %s86_s11 = smov [#allocation5]   ;;  %v21_v0 = vld [vmem:[#allocation2] sm:$0xff] }
   0xe   :  { %s30_s12 = sshll.u32 %s86_s11, 4  ;;  %v22_v1 = vadd.f32 1.0, %v21_v0  ;;  %s31_s12 = int_to_ptr.vmem [resolvable:$true] %s30_s12 }
   0xf   :  { %s61_s13 = scalar_lea.vmem %s31_s12, 128  ;;  %p66_p6 = scmp.lt.s32.totalorder %s31_s12, %s31_s12 }
  0x10   :  { %23 = vst [vmem:[#allocation5] sm:$0xff] %v22_v1  ;;  %p62_p5 = scmp.ne.s32.totalorder %s31_s12, %s61_s13  ;;  %p67_p7 = scmp.lt.s32.totalorder %s61_s13, %s61_s13 }
  0x12   :  { %p68_p8 = por %p67_p7, %p66_p6 }
  0x14   :  { %p69_p9 = pnand %p68_p8, %p62_p5 }
  0x16   :  { %72 = shalt.err (!%p69_p9)
}
  0x17   :  { %33 = dma.vmem_to_hbm [thread:$0]  %s31_s12, 128, %s104_s1, [#allocation4]  }
  0x18   :  { %83 = dma.done.wait [#allocation4], 128  }
  0x19   :  { %84 = vsyncadd [#allocation4], 4294967168 }
  0x1a   :  { %37 = vsyncpa [#allocation3], 1 }
  0x1b   :  { %38 = vsyncpa [#allocation4], 1 }

// kernel: in_context_sam_forward.3
= control target key start
LH: loop header
LB: loop body
LE: loop exit
PB: predicated region body
PF: predicated region fallthrough
CT: control target
= control target key end

     0   :  { %v357_v0 = vmov 0.0   ;;  %vm77_vm0 = vcmask 523264   ;;  %s661_s1 = inlined_call_operand.vmem [shape: f32[192,128], index: 1, kind: input, shape index: {}]   ;;  %s662_s0 = inlined_call_operand.vmem [shape: f32[128,192], index: 0, kind: input, shape index: {}]   ;;  %s663_s2 = inlined_call_operand.vmem [shape: f32[1,128], index: 2, kind: input, shape index: {}]   ;;  %s664_s3 = inlined_call_operand.vmem [shape: f32[128,128], index: 3, kind: output, shape index: {}]  }
   0x1   :  { %126 = vmatprep.subr.mxu0 %v357_v0  ;;  %308 = vmatprep.subr.mxu1 %v357_v0  ;;  %v61_v1 = vld [vmem:[%s661_s1 + $0x78] sm:$0xff]  ;;  %v60_v2 = vld [vmem:[%s661_s1 + $0x70] sm:$0xff]  ;;  %v59_v3 = vld [vmem:[%s661_s1 + $0x68] sm:$0xff] }
   0x2   :  { %127 = vmatpush1.msra.mxu0 %v61_v1  ;;  %332 = vmatpush1.msra.mxu1 %v61_v1  ;;  %v58_v4 = vld [vmem:[%s661_s1 + $0x60] sm:$0xff]  ;;  %v57_v5 = vld [vmem:[%s661_s1 + $0x58] sm:$0xff]  ;;  %v56_v6 = vld [vmem:[%s661_s1 + $0x50] sm:$0xff] }
   0x3   :  { %128 = vmatprep.subr.mxu0 %v357_v0  ;;  %309 = vmatprep.subr.mxu1 %v357_v0  ;;  %v55_v7 = vld [vmem:[%s661_s1 + $0x48] sm:$0xff]  ;;  %v54_v8 = vld [vmem:[%s661_s1 + $0x40] sm:$0xff]  ;;  %v53_v9 = vld [vmem:[%s661_s1 + $0x38] sm:$0xff] }
   0x4   :  { %129 = vmatpush1.msra.mxu0 %v60_v2  ;;  %333 = vmatpush1.msra.mxu1 %v60_v2  ;;  %v52_v10 = vld [vmem:[%s661_s1 + $0x30] sm:$0xff]  ;;  %v51_v11 = vld [vmem:[%s661_s1 + $0x28] sm:$0xff]  ;;  %v50_v12 = vld [vmem:[%s661_s1 + $0x20] sm:$0xff] }
   0x5   :  { %130 = vmatprep.subr.mxu0 %v357_v0  ;;  %310 = vmatprep.subr.mxu1 %v357_v0  ;;  %v49_v13 = vld [vmem:[%s661_s1 + $0x18] sm:$0xff]  ;;  %v48_v14 = vld [vmem:[%s661_s1 + $0x10] sm:$0xff]  ;;  %v47_v15 = vld [vmem:[%s661_s1 + $0x8] sm:$0xff] }
   0x6   :  { %131 = vmatpush1.msra.mxu0 %v59_v3  ;;  %334 = vmatpush1.msra.mxu1 %v59_v3  ;;  %v46_v16 = vld [vmem:[%s661_s1] sm:$0xff]  ;;  %v69_v17 = vld [vmem:[%s661_s1 + $0xb8] sm:$0xff]  ;;  %v68_v18 = vld [vmem:[%s661_s1 + $0xb0] sm:$0xff] }
   0x7   :  { %132 = vmatprep.subr.mxu0 %v357_v0  ;;  %311 = vmatprep.subr.mxu1 %v357_v0  ;;  %v67_v19 = vld [vmem:[%s661_s1 + $0xa8] sm:$0xff]  ;;  %v66_v20 = vld [vmem:[%s661_s1 + $0xa0] sm:$0xff]  ;;  %v65_v21 = vld [vmem:[%s661_s1 + $0x98] sm:$0xff] }
   0x8   :  { %133 = vmatpush1.msra.mxu0 %v58_v4  ;;  %335 = vmatpush1.msra.mxu1 %v58_v4  ;;  %v64_v22 = vld [vmem:[%s661_s1 + $0x90] sm:$0xff]  ;;  %v63_v23 = vld [vmem:[%s661_s1 + $0x88] sm:$0xff]  ;;  %v62_v24 = vld [vmem:[%s661_s1 + $0x80] sm:$0xff] }
   0x9   :  { %134 = vmatprep.subr.mxu0 %v357_v0  ;;  %312 = vmatprep.subr.mxu1 %v357_v0  ;;  %v15_v25 = vld [vmem:[%s662_s0 + $0x8] sm:$0xff]  ;;  %v14_v27 = vld [vmem:[%s662_s0] sm:$0xff]  ;;  %v17_v29 = vld [vmem:[%s662_s0 + $0x18] sm:$0xff] }
   0xa   :  { %135 = vmatpush1.msra.mxu0 %v57_v5  ;;  %336 = vmatpush1.msra.mxu1 %v57_v5  ;;  %v31_v26 = vld [vmem:[%s662_s0 + $0x88] sm:$0xff]  ;;  %v30_v28 = vld [vmem:[%s662_s0 + $0x80] sm:$0xff]  ;;  %v33_v30 = vld [vmem:[%s662_s0 + $0x98] sm:$0xff] }
   0xb   :  { %136 = vmatprep.subr.mxu0 %v357_v0  ;;  %313 = vmatprep.subr.mxu1 %v357_v0  ;;  %v16_v31 = vld [vmem:[%s662_s0 + $0x10] sm:$0xff]  ;;  %v19_v33 = vld [vmem:[%s662_s0 + $0x28] sm:$0xff]  ;;  %v18_v35 = vld [vmem:[%s662_s0 + $0x20] sm:$0xff] }
   0xc   :  { %137 = vmatpush1.msra.mxu0 %v56_v6  ;;  %337 = vmatpush1.msra.mxu1 %v56_v6  ;;  %v32_v32 = vld [vmem:[%s662_s0 + $0x90] sm:$0xff]  ;;  %v35_v34 = vld [vmem:[%s662_s0 + $0xa8] sm:$0xff]  ;;  %v34_v36 = vld [vmem:[%s662_s0 + $0xa0] sm:$0xff] }
   0xd   :  { %138 = vmatprep.subr.mxu0 %v357_v0  ;;  %314 = vmatprep.subr.mxu1 %v357_v0  ;;  %v21_v37 = vld [vmem:[%s662_s0 + $0x38] sm:$0xff]  ;;  %v20_v39 = vld [vmem:[%s662_s0 + $0x30] sm:$0xff]  ;;  %v23_v41 = vld [vmem:[%s662_s0 + $0x48] sm:$0xff] }
   0xe   :  { %139 = vmatpush1.msra.mxu0 %v55_v7  ;;  %338 = vmatpush1.msra.mxu1 %v55_v7  ;;  %v37_v38 = vld [vmem:[%s662_s0 + $0xb8] sm:$0xff]  ;;  %v36_v40 = vld [vmem:[%s662_s0 + $0xb0] sm:$0xff]  ;;  %v39_v42 = vld [vmem:[%s662_s0 + $0xc8] sm:$0xff] }
   0xf   :  { %140 = vmatprep.subr.mxu0 %v357_v0  ;;  %315 = vmatprep.subr.mxu1 %v357_v0  ;;  %v22_v43 = vld [vmem:[%s662_s0 + $0x40] sm:$0xff]  ;;  %v25_v45 = vld [vmem:[%s662_s0 + $0x58] sm:$0xff]  ;;  %v24_v47 = vld [vmem:[%s662_s0 + $0x50] sm:$0xff] }
  0x10   :  { %141 = vmatpush1.msra.mxu0 %v54_v8  ;;  %339 = vmatpush1.msra.mxu1 %v54_v8  ;;  %v38_v44 = vld [vmem:[%s662_s0 + $0xc0] sm:$0xff]  ;;  %v41_v46 = vld [vmem:[%s662_s0 + $0xd8] sm:$0xff]  ;;  %v40_v48 = vld [vmem:[%s662_s0 + $0xd0] sm:$0xff] }
  0x11   :  { %142 = vmatprep.subr.mxu0 %v357_v0  ;;  %316 = vmatprep.subr.mxu1 %v357_v0  ;;  %v27_v49 = vld [vmem:[%s662_s0 + $0x68] sm:$0xff]  ;;  %v26_v51 = vld [vmem:[%s662_s0 + $0x60] sm:$0xff]  ;;  %v29_v53 = vld [vmem:[%s662_s0 + $0x78] sm:$0xff] }
  0x12   :  { %143 = vmatpush1.msra.mxu0 %v53_v9  ;;  %340 = vmatpush1.msra.mxu1 %v53_v9  ;;  %v43_v50 = vld [vmem:[%s662_s0 + $0xe8] sm:$0xff]  ;;  %v42_v52 = vld [vmem:[%s662_s0 + $0xe0] sm:$0xff]  ;;  %v45_v54 = vld [vmem:[%s662_s0 + $0xf8] sm:$0xff] }
  0x13   :  { %144 = vmatprep.subr.mxu0 %v357_v0  ;;  %317 = vmatprep.subr.mxu1 %v357_v0  ;;  %v28_v55 = vld [vmem:[%s662_s0 + $0x70] sm:$0xff]  ;;  %v291_v57 = vld [vmem:[%s663_s2] ss:$0 sm:$0xff] }
  0x14   :  { %145 = vmatpush1.msra.mxu0 %v52_v10  ;;  %341 = vmatpush1.msra.mxu1 %v52_v10  ;;  %v44_v56 = vld [vmem:[%s662_s0 + $0xf0] sm:$0xff] }
  0x15   :  { %146 = vmatprep.subr.mxu0 %v357_v0  ;;  %318 = vmatprep.subr.mxu1 %v357_v0 }
  0x16   :  { %147 = vmatpush1.msra.mxu0 %v51_v11  ;;  %342 = vmatpush1.msra.mxu1 %v51_v11 }
  0x17   :  { %148 = vmatprep.subr.mxu0 %v357_v0  ;;  %319 = vmatprep.subr.mxu1 %v357_v0 }
  0x18   :  { %149 = vmatpush1.msra.mxu0 %v50_v12  ;;  %343 = vmatpush1.msra.mxu1 %v50_v12 }
  0x19   :  { %150 = vmatprep.subr.mxu0 %v357_v0  ;;  %320 = vmatprep.subr.mxu1 %v357_v0 }
  0x1a   :  { %151 = vmatpush1.msra.mxu0 %v49_v13  ;;  %344 = vmatpush1.msra.mxu1 %v49_v13 }
  0x1b   :  { %152 = vmatprep.subr.mxu0 %v357_v0  ;;  %321 = vmatprep.subr.mxu1 %v357_v0 }
  0x1c   :  { %153 = vmatpush1.msra.mxu0 %v48_v14  ;;  %345 = vmatpush1.msra.mxu1 %v48_v14 }
  0x1d   :  { %154 = vmatprep.subr.mxu0 %v357_v0  ;;  %322 = vmatprep.subr.mxu1 %v357_v0 }
  0x1e   :  { %155 = vmatpush1.msra.mxu0 %v47_v15  ;;  %346 = vmatpush1.msra.mxu1 %v47_v15 }
  0x1f   :  { %156 = vmatprep.subr.mxu0 %v357_v0  ;;  %323 = vmatprep.subr.mxu1 %v357_v0 }
  0x20   :  { %157 = vmatpush1.msra.mxu0 %v46_v16  ;;  %347 = vmatpush1.msra.mxu1 %v46_v16 }
  0x21   :  { %174 = vmatprep.subr.mxu0 %v357_v0  ;;  %324 = vmatprep.subr.mxu1 %v357_v0 }
  0x22   :  { %175 = vmatpush2.msra.mxu0 %v69_v17  ;;  %348 = vmatpush2.msra.mxu1 %v69_v17 }
  0x23   :  { %176 = vmatprep.subr.mxu0 %v357_v0  ;;  %325 = vmatprep.subr.mxu1 %v357_v0 }
  0x24   :  { %177 = vmatpush2.msra.mxu0 %v68_v18  ;;  %349 = vmatpush2.msra.mxu1 %v68_v18 }
  0x25   :  { %178 = vmatprep.subr.mxu0 %v357_v0  ;;  %326 = vmatprep.subr.mxu1 %v357_v0 }
  0x26   :  { %179 = vmatpush2.msra.mxu0 %v67_v19  ;;  %350 = vmatpush2.msra.mxu1 %v67_v19 }
  0x27   :  { %180 = vmatprep.subr.mxu0 %v357_v0  ;;  %327 = vmatprep.subr.mxu1 %v357_v0 }
  0x28   :  { %181 = vmatpush2.msra.mxu0 %v66_v20  ;;  %351 = vmatpush2.msra.mxu1 %v66_v20 }
  0x29   :  { %182 = vmatprep.subr.mxu0 %v357_v0  ;;  %328 = vmatprep.subr.mxu1 %v357_v0 }
  0x2a   :  { %183 = vmatpush2.msra.mxu0 %v65_v21  ;;  %352 = vmatpush2.msra.mxu1 %v65_v21 }
  0x2b   :  { %184 = vmatprep.subr.mxu0 %v357_v0  ;;  %329 = vmatprep.subr.mxu1 %v357_v0 }
  0x2c   :  { %185 = vmatpush2.msra.mxu0 %v64_v22  ;;  %353 = vmatpush2.msra.mxu1 %v64_v22 }
  0x2d   :  { %186 = vmatprep.subr.mxu0 %v357_v0  ;;  %330 = vmatprep.subr.mxu1 %v357_v0 }
  0x2e   :  { %187 = vmatpush2.msra.mxu0 %v63_v23  ;;  %354 = vmatpush2.msra.mxu1 %v63_v23 }
  0x2f   :  { %188 = vmatprep.subr.mxu0 %v357_v0  ;;  %331 = vmatprep.subr.mxu1 %v357_v0 }
  0x30   :  { %189 = vmatpush2.msra.mxu0 %v62_v24  ;;  %355 = vmatpush2.msra.mxu1 %v62_v24 }
  0x31   :  { %292 = vmatprep.mubr.msk.f32.mxu0 %vm77_vm0, %v15_v25  ;;  %300 = vmatprep.mubr.msk.f32.mxu1 %vm77_vm0, %v31_v26 }
  0x32   :  { %191 = vmatmul.mubr.f32.vlgmr.msra.gmra.mxu0 %v14_v27  ;;  %231 = vmatmul.mubr.f32.vlgmr.msra.gmra.mxu1 %v30_v28 }
  0x33   :  { %293 = vmatprep.mubr.msk.f32.mxu0 %vm77_vm0, %v17_v29  ;;  %301 = vmatprep.mubr.msk.f32.mxu1 %vm77_vm0, %v33_v30 }
  0x36   :  { %196 = vmatmul.mubr.f32.gmra.mxu0 %v16_v31  ;;  %236 = vmatmul.mubr.f32.gmra.mxu1 %v32_v32 }
  0x37   :  { %294 = vmatprep.mubr.msk.f32.mxu0 %vm77_vm0, %v19_v33  ;;  %302 = vmatprep.mubr.msk.f32.mxu1 %vm77_vm0, %v35_v34 }
  0x3a   :  { %201 = vmatmul.mubr.f32.gmra.mxu0 %v18_v35  ;;  %241 = vmatmul.mubr.f32.gmra.mxu1 %v34_v36 }
  0x3b   :  { %295 = vmatprep.mubr.msk.f32.mxu0 %vm77_vm0, %v21_v37  ;;  %303 = vmatprep.mubr.msk.f32.mxu1 %vm77_vm0, %v37_v38 }
  0x3e   :  { %206 = vmatmul.mubr.f32.gmra.mxu0 %v20_v39  ;;  %246 = vmatmul.mubr.f32.gmra.mxu1 %v36_v40 }
  0x3f   :  { %296 = vmatprep.mubr.msk.f32.mxu0 %vm77_vm0, %v23_v41  ;;  %304 = vmatprep.mubr.msk.f32.mxu1 %vm77_vm0, %v39_v42 }
  0x42   :  { %211 = vmatmul.mubr.f32.gmra.mxu0 %v22_v43  ;;  %251 = vmatmul.mubr.f32.gmra.mxu1 %v38_v44 }
  0x43   :  { %297 = vmatprep.mubr.msk.f32.mxu0 %vm77_vm0, %v25_v45  ;;  %305 = vmatprep.mubr.msk.f32.mxu1 %vm77_vm0, %v41_v46 }
  0x46   :  { %216 = vmatmul.mubr.f32.gmra.mxu0 %v24_v47  ;;  %256 = vmatmul.mubr.f32.gmra.mxu1 %v40_v48 }
  0x47   :  { %298 = vmatprep.mubr.msk.f32.mxu0 %vm77_vm0, %v27_v49  ;;  %306 = vmatprep.mubr.msk.f32.mxu1 %vm77_vm0, %v43_v50 }
  0x4a   :  { %221 = vmatmul.mubr.f32.gmra.mxu0 %v26_v51  ;;  %261 = vmatmul.mubr.f32.gmra.mxu1 %v42_v52 }
  0x4b   :  { %299 = vmatprep.mubr.msk.f32.mxu0 %vm77_vm0, %v29_v53  ;;  %307 = vmatprep.mubr.msk.f32.mxu1 %vm77_vm0, %v45_v54 }
  0x4e   :  { %226 = vmatmul.mubr.f32.gmra.mxu0 %v28_v55  ;;  %266 = vmatmul.mubr.f32.gmra.mxu1 %v44_v56 }
  0xf2   :  { %v192_v58 = vpop.f32.mrf.mxu0  ;;  %v232_v59 = vpop.f32.mrf.mxu1 }
  0xf3   :  { %v193_v60 = vadd.f32 %v291_v57, %v192_v58  ;;  %v233_v61 = vadd.f32 %v291_v57, %v232_v59 }
  0xf4   :  { %v194_v62 = vpop.f32.mrf.mxu0  ;;  %v234_v63 = vpop.f32.mrf.mxu1 }
  0xf5   :  { %271 = vst [vmem:[%s664_s3] sm:$0xff] %v193_v60  ;;  %279 = vst [vmem:[%s664_s3 + $0x40] sm:$0xff] %v233_v61 }
  0xf6   :  { %v197_v0 = vpop.f32.mrf.mxu0  ;;  %v237_v1 = vpop.f32.mrf.mxu1 }
  0xf7   :  { %v198_v2 = vadd.f32 %v291_v57, %v197_v0  ;;  %v238_v3 = vadd.f32 %v291_v57, %v237_v1 }
  0xf8   :  { %v199_v4 = vpop.f32.mrf.mxu0  ;;  %v239_v5 = vpop.f32.mrf.mxu1 }
  0xf9   :  { %272 = vst [vmem:[%s664_s3 + $0x8] sm:$0xff] %v198_v2  ;;  %280 = vst [vmem:[%s664_s3 + $0x48] sm:$0xff] %v238_v3 }
  0xfa   :  { %v202_v6 = vpop.f32.mrf.mxu0  ;;  %v242_v7 = vpop.f32.mrf.mxu1 }
  0xfb   :  { %v203_v8 = vadd.f32 %v291_v57, %v202_v6  ;;  %v243_v9 = vadd.f32 %v291_v57, %v242_v7 }
  0xfc   :  { %v204_v10 = vpop.f32.mrf.mxu0  ;;  %v244_v11 = vpop.f32.mrf.mxu1 }
  0xfd   :  { %273 = vst [vmem:[%s664_s3 + $0x10] sm:$0xff] %v203_v8  ;;  %281 = vst [vmem:[%s664_s3 + $0x50] sm:$0xff] %v243_v9 }
  0xfe   :  { %v207_v12 = vpop.f32.mrf.mxu0  ;;  %v247_v13 = vpop.f32.mrf.mxu1 }
  0xff   :  { %v208_v14 = vadd.f32 %v291_v57, %v207_v12  ;;  %v248_v15 = vadd.f32 %v291_v57, %v247_v13 }
 0x100   :  { %v209_v16 = vpop.f32.mrf.mxu0  ;;  %v249_v17 = vpop.f32.mrf.mxu1 }
 0x101   :  { %274 = vst [vmem:[%s664_s3 + $0x18] sm:$0xff] %v208_v14  ;;  %282 = vst [vmem:[%s664_s3 + $0x58] sm:$0xff] %v248_v15 }
 0x102   :  { %v212_v18 = vpop.f32.mrf.mxu0  ;;  %v252_v19 = vpop.f32.mrf.mxu1 }
 0x103   :  { %v213_v20 = vadd.f32 %v291_v57, %v212_v18  ;;  %v253_v21 = vadd.f32 %v291_v57, %v252_v19 }
 0x104   :  { %v214_v22 = vpop.f32.mrf.mxu0  ;;  %v254_v23 = vpop.f32.mrf.mxu1 }
 0x105   :  { %275 = vst [vmem:[%s664_s3 + $0x20] sm:$0xff] %v213_v20  ;;  %283 = vst [vmem:[%s664_s3 + $0x60] sm:$0xff] %v253_v21 }
 0x106   :  { %v217_v24 = vpop.f32.mrf.mxu0  ;;  %v257_v25 = vpop.f32.mrf.mxu1 }
 0x107   :  { %v218_v26 = vadd.f32 %v291_v57, %v217_v24  ;;  %v258_v27 = vadd.f32 %v291_v57, %v257_v25 }
 0x108   :  { %v219_v28 = vpop.f32.mrf.mxu0  ;;  %v259_v29 = vpop.f32.mrf.mxu1 }
 0x109   :  { %276 = vst [vmem:[%s664_s3 + $0x28] sm:$0xff] %v218_v26  ;;  %284 = vst [vmem:[%s664_s3 + $0x68] sm:$0xff] %v258_v27 }
 0x10a   :  { %v222_v30 = vpop.f32.mrf.mxu0  ;;  %v262_v31 = vpop.f32.mrf.mxu1 }
 0x10b   :  { %v223_v32 = vadd.f32 %v291_v57, %v222_v30  ;;  %v263_v33 = vadd.f32 %v291_v57, %v262_v31 }
 0x10c   :  { %v224_v34 = vpop.f32.mrf.mxu0  ;;  %v264_v35 = vpop.f32.mrf.mxu1 }
 0x10d   :  { %277 = vst [vmem:[%s664_s3 + $0x30] sm:$0xff] %v223_v32  ;;  %285 = vst [vmem:[%s664_s3 + $0x70] sm:$0xff] %v263_v33 }
 0x10e   :  { %v227_v36 = vpop.f32.mrf.mxu0  ;;  %v267_v37 = vpop.f32.mrf.mxu1 }
 0x10f   :  { %v228_v38 = vadd.f32 %v291_v57, %v227_v36  ;;  %v268_v39 = vadd.f32 %v291_v57, %v267_v37 }
 0x110   :  { %v229_v40 = vpop.f32.mrf.mxu0  ;;  %v269_v41 = vpop.f32.mrf.mxu1 }
 0x111   :  { %278 = vst [vmem:[%s664_s3 + $0x38] sm:$0xff] %v228_v38  ;;  %286 = vst [vmem:[%s664_s3 + $0x78] sm:$0xff] %v268_v39 }

// kernel: in_context_sam_forward.4
= control target key start
LH: loop header
LB: loop body
LE: loop exit
PB: predicated region body
PF: predicated region fallthrough
CT: control target
= control target key end

     0   :  { %vm609_vm0 = vmmov 0   ;;  %s999_s1 = inlined_call_operand.vmem [shape: f32[768,128], index: 1, kind: input, shape index: {}]   ;;  %s1000_s0 = inlined_call_operand.vmem [shape: f32[4,768], index: 0, kind: input, shape index: {}]   ;;  %s1001_s3 = inlined_call_operand.vmem [shape: f32[128,128], index: 3, kind: input, shape index: {}]   ;;  %s1002_s2 = inlined_call_operand.vmem [shape: f32[1,128], index: 2, kind: input, shape index: {}]   ;;  %s1003_s4 = inlined_call_operand.vmem [shape: f32[1,128], index: 4, kind: input, shape index: {}]   ;;  %s1004_s5 = inlined_call_operand.vmem [shape: f32[4,128], index: 5, kind: output, shape index: {}]  }
   0x1   :  { %v54_v0 = vld [vmem:[%s999_s1 + $0xf8] sm:$0xff]  ;;  %v53_v2 = vld [vmem:[%s999_s1 + $0xf0] sm:$0xff]  ;;  %v52_v6 = vld [vmem:[%s999_s1 + $0xe8] sm:$0xff] }
   0x2   :  { %v38_v1 = vld [vmem:[%s999_s1 + $0x78] sm:$0xff]  ;;  %446 = vmatprep.subr.mxu0 %v54_v0  ;;  %v37_v4 = vld [vmem:[%s999_s1 + $0x70] sm:$0xff]  ;;  %v36_v8 = vld [vmem:[%s999_s1 + $0x68] sm:$0xff] }
   0x3   :  { %v86_v3 = vld [vmem:[%s999_s1 + $0x1f8] sm:$0xff]  ;;  %447 = vmatpush3.msra.mxu0 %v38_v1  ;;  %v85_v7 = vld [vmem:[%s999_s1 + $0x1f0] sm:$0xff]  ;;  %v84_v10 = vld [vmem:[%s999_s1 + $0x1e8] sm:$0xff] }
   0x4   :  { %v70_v5 = vld [vmem:[%s999_s1 + $0x178] sm:$0xff]  ;;  %481 = vmatprep.subr.mxu1 %v86_v3  ;;  %448 = vmatprep.subr.mxu0 %v53_v2  ;;  %v69_v9 = vld [vmem:[%s999_s1 + $0x170] sm:$0xff]  ;;  %v51_v11 = vld [vmem:[%s999_s1 + $0xe0] sm:$0xff] }
   0x5   :  { %482 = vmatpush3.msra.mxu1 %v70_v5  ;;  %449 = vmatpush3.msra.mxu0 %v37_v4  ;;  %v68_v12 = vld [vmem:[%s999_s1 + $0x168] sm:$0xff]  ;;  %v35_v13 = vld [vmem:[%s999_s1 + $0x60] sm:$0xff]  ;;  %v50_v15 = vld [vmem:[%s999_s1 + $0xd8] sm:$0xff] }
   0x6   :  { %483 = vmatprep.subr.mxu1 %v85_v7  ;;  %450 = vmatprep.subr.mxu0 %v52_v6  ;;  %v83_v14 = vld [vmem:[%s999_s1 + $0x1e0] sm:$0xff]  ;;  %v34_v17 = vld [vmem:[%s999_s1 + $0x58] sm:$0xff]  ;;  %v49_v19 = vld [vmem:[%s999_s1 + $0xd0] sm:$0xff] }
   0x7   :  { %484 = vmatpush3.msra.mxu1 %v69_v9  ;;  %451 = vmatpush3.msra.mxu0 %v36_v8  ;;  %v67_v16 = vld [vmem:[%s999_s1 + $0x160] sm:$0xff]  ;;  %v82_v18 = vld [vmem:[%s999_s1 + $0x1d8] sm:$0xff]  ;;  %v33_v21 = vld [vmem:[%s999_s1 + $0x50] sm:$0xff] }
   0x8   :  { %485 = vmatprep.subr.mxu1 %v84_v10  ;;  %452 = vmatprep.subr.mxu0 %v51_v11  ;;  %v66_v20 = vld [vmem:[%s999_s1 + $0x158] sm:$0xff]  ;;  %v81_v22 = vld [vmem:[%s999_s1 + $0x1d0] sm:$0xff]  ;;  %v48_v23 = vld [vmem:[%s999_s1 + $0xc8] sm:$0xff] }
   0x9   :  { %486 = vmatpush3.msra.mxu1 %v68_v12  ;;  %453 = vmatpush3.msra.mxu0 %v35_v13  ;;  %v65_v24 = vld [vmem:[%s999_s1 + $0x150] sm:$0xff]  ;;  %v32_v25 = vld [vmem:[%s999_s1 + $0x48] sm:$0xff]  ;;  %v47_v27 = vld [vmem:[%s999_s1 + $0xc0] sm:$0xff] }
   0xa   :  { %487 = vmatprep.subr.mxu1 %v83_v14  ;;  %454 = vmatprep.subr.mxu0 %v50_v15  ;;  %v80_v26 = vld [vmem:[%s999_s1 + $0x1c8] sm:$0xff]  ;;  %v31_v29 = vld [vmem:[%s999_s1 + $0x40] sm:$0xff]  ;;  %v46_v31 = vld [vmem:[%s999_s1 + $0xb8] sm:$0xff] }
   0xb   :  { %488 = vmatpush3.msra.mxu1 %v67_v16  ;;  %455 = vmatpush3.msra.mxu0 %v34_v17  ;;  %v64_v28 = vld [vmem:[%s999_s1 + $0x148] sm:$0xff]  ;;  %v79_v30 = vld [vmem:[%s999_s1 + $0x1c0] sm:$0xff]  ;;  %v30_v33 = vld [vmem:[%s999_s1 + $0x38] sm:$0xff] }
   0xc   :  { %489 = vmatprep.subr.mxu1 %v82_v18  ;;  %456 = vmatprep.subr.mxu0 %v49_v19  ;;  %v63_v32 = vld [vmem:[%s999_s1 + $0x140] sm:$0xff]  ;;  %v78_v34 = vld [vmem:[%s999_s1 + $0x1b8] sm:$0xff]  ;;  %v45_v35 = vld [vmem:[%s999_s1 + $0xb0] sm:$0xff] }
   0xd   :  { %490 = vmatpush3.msra.mxu1 %v66_v20  ;;  %457 = vmatpush3.msra.mxu0 %v33_v21  ;;  %v62_v36 = vld [vmem:[%s999_s1 + $0x138] sm:$0xff]  ;;  %v29_v37 = vld [vmem:[%s999_s1 + $0x30] sm:$0xff]  ;;  %v44_v39 = vld [vmem:[%s999_s1 + $0xa8] sm:$0xff] }
   0xe   :  { %491 = vmatprep.subr.mxu1 %v81_v22  ;;  %458 = vmatprep.subr.mxu0 %v48_v23  ;;  %v77_v38 = vld [vmem:[%s999_s1 + $0x1b0] sm:$0xff]  ;;  %v28_v41 = vld [vmem:[%s999_s1 + $0x28] sm:$0xff]  ;;  %v43_v43 = vld [vmem:[%s999_s1 + $0xa0] sm:$0xff] }
   0xf   :  { %492 = vmatpush3.msra.mxu1 %v65_v24  ;;  %459 = vmatpush3.msra.mxu0 %v32_v25  ;;  %v61_v40 = vld [vmem:[%s999_s1 + $0x130] sm:$0xff]  ;;  %v76_v42 = vld [vmem:[%s999_s1 + $0x1a8] sm:$0xff]  ;;  %v27_v45 = vld [vmem:[%s999_s1 + $0x20] sm:$0xff] }
  0x10   :  { %493 = vmatprep.subr.mxu1 %v80_v26  ;;  %460 = vmatprep.subr.mxu0 %v47_v27  ;;  %v60_v44 = vld [vmem:[%s999_s1 + $0x128] sm:$0xff]  ;;  %v75_v46 = vld [vmem:[%s999_s1 + $0x1a0] sm:$0xff]  ;;  %v42_v47 = vld [vmem:[%s999_s1 + $0x98] sm:$0xff] }
  0x11   :  { %494 = vmatpush3.msra.mxu1 %v64_v28  ;;  %461 = vmatpush3.msra.mxu0 %v31_v29  ;;  %v59_v48 = vld [vmem:[%s999_s1 + $0x120] sm:$0xff]  ;;  %v26_v49 = vld [vmem:[%s999_s1 + $0x18] sm:$0xff]  ;;  %v41_v51 = vld [vmem:[%s999_s1 + $0x90] sm:$0xff] }
  0x12   :  { %495 = vmatprep.subr.mxu1 %v79_v30  ;;  %462 = vmatprep.subr.mxu0 %v46_v31  ;;  %v74_v50 = vld [vmem:[%s999_s1 + $0x198] sm:$0xff]  ;;  %v20_v53 = vld [vmem:[%s1000_s0] sm:$0xff]  ;;  %v25_v54 = vld [vmem:[%s999_s1 + $0x10] sm:$0xff] }
  0x13   :  { %496 = vmatpush3.msra.mxu1 %v63_v32  ;;  %463 = vmatpush3.msra.mxu0 %v30_v33  ;;  %v58_v52 = vld [vmem:[%s999_s1 + $0x118] sm:$0xff]  ;;  %v73_v55 = vld [vmem:[%s999_s1 + $0x190] sm:$0xff]  ;;  %v40_v56 = vld [vmem:[%s999_s1 + $0x88] sm:$0xff]  ;;  %v129_v60 = vcombine.high %v20_v53, %v20_v53 }
  0x14   :  { %497 = vmatprep.subr.mxu1 %v78_v34  ;;  %464 = vmatprep.subr.mxu0 %v45_v35  ;;  %v57_v57 = vld [vmem:[%s999_s1 + $0x110] sm:$0xff]  ;;  %v24_v58 = vld [vmem:[%s999_s1 + $0x8] sm:$0xff]  ;;  %v39_v61 = vld [vmem:[%s999_s1 + $0x80] sm:$0xff] }
  0x15   :  { %498 = vmatpush3.msra.mxu1 %v62_v36  ;;  %465 = vmatpush3.msra.mxu0 %v29_v37  ;;  %v72_v59 = vld [vmem:[%s999_s1 + $0x188] sm:$0xff]  ;;  %v23_v63 = vld [vmem:[%s999_s1] sm:$0xff]  ;;  %v118_v2 = vld [vmem:[%s999_s1 + $0x2f8] sm:$0xff] }
  0x16   :  { %499 = vmatprep.subr.mxu1 %v77_v38  ;;  %466 = vmatprep.subr.mxu0 %v44_v39  ;;  %v21_v62 = vld [vmem:[%s1000_s0 + $0x8] sm:$0xff]  ;;  %v71_v1 = vld [vmem:[%s999_s1 + $0x180] sm:$0xff]  ;;  %v102_v5 = vld [vmem:[%s999_s1 + $0x278] sm:$0xff]  ;;  %v608_v38 = vmov 0.0  }
  0x17   :  { %500 = vmatpush3.msra.mxu1 %v61_v40  ;;  %467 = vmatpush3.msra.mxu0 %v28_v41  ;;  %v56_v0 = vld [vmem:[%s999_s1 + $0x108] sm:$0xff]  ;;  %v55_v3 = vld [vmem:[%s999_s1 + $0x100] sm:$0xff]  ;;  %v130_v4 = vcombine.high %v21_v62, %v21_v62  ;;  %v847_v6 = vld [vmem:[%s1000_s0 + $0x10] sm:$0xff] }
  0x18   :  { %501 = vmatprep.subr.mxu1 %v76_v42  ;;  %468 = vmatprep.subr.mxu0 %v43_v43  ;;  %v117_v7 = vld [vmem:[%s999_s1 + $0x2f0] sm:$0xff]  ;;  %v131_v8 = vcombine.high %v847_v6, %v847_v6  ;;  %v116_v10 = vld [vmem:[%s999_s1 + $0x2e8] sm:$0xff]  ;;  %v115_v12 = vld [vmem:[%s999_s1 + $0x2e0] sm:$0xff] }
  0x19   :  { %502 = vmatpush3.msra.mxu1 %v60_v44  ;;  %469 = vmatpush3.msra.mxu0 %v27_v45  ;;  %v101_v9 = vld [vmem:[%s999_s1 + $0x270] sm:$0xff]  ;;  %v100_v11 = vld [vmem:[%s999_s1 + $0x268] sm:$0xff]  ;;  %v99_v13 = vld [vmem:[%s999_s1 + $0x260] sm:$0xff] }
  0x1a   :  { %503 = vmatprep.subr.mxu1 %v75_v46  ;;  %470 = vmatprep.subr.mxu0 %v42_v47  ;;  %v114_v14 = vld [vmem:[%s999_s1 + $0x2d8] sm:$0xff]  ;;  %v113_v16 = vld [vmem:[%s999_s1 + $0x2d0] sm:$0xff]  ;;  %v112_v18 = vld [vmem:[%s999_s1 + $0x2c8] sm:$0xff] }
  0x1b   :  { %504 = vmatpush3.msra.mxu1 %v59_v48  ;;  %471 = vmatpush3.msra.mxu0 %v26_v49  ;;  %v98_v15 = vld [vmem:[%s999_s1 + $0x258] sm:$0xff]  ;;  %v97_v17 = vld [vmem:[%s999_s1 + $0x250] sm:$0xff]  ;;  %v96_v19 = vld [vmem:[%s999_s1 + $0x248] sm:$0xff] }
  0x1c   :  { %505 = vmatprep.subr.mxu1 %v74_v50  ;;  %472 = vmatprep.subr.mxu0 %v41_v51  ;;  %v111_v20 = vld [vmem:[%s999_s1 + $0x2c0] sm:$0xff]  ;;  %v110_v22 = vld [vmem:[%s999_s1 + $0x2b8] sm:$0xff]  ;;  %v109_v24 = vld [vmem:[%s999_s1 + $0x2b0] sm:$0xff] }
  0x1d   :  { %506 = vmatpush3.msra.mxu1 %v58_v52  ;;  %473 = vmatpush3.msra.mxu0 %v25_v54  ;;  %v95_v21 = vld [vmem:[%s999_s1 + $0x240] sm:$0xff]  ;;  %v94_v23 = vld [vmem:[%s999_s1 + $0x238] sm:$0xff]  ;;  %v93_v25 = vld [vmem:[%s999_s1 + $0x230] sm:$0xff] }
  0x1e   :  { %507 = vmatprep.subr.mxu1 %v73_v55  ;;  %474 = vmatprep.subr.mxu0 %v40_v56  ;;  %v108_v26 = vld [vmem:[%s999_s1 + $0x2a8] sm:$0xff]  ;;  %v107_v28 = vld [vmem:[%s999_s1 + $0x2a0] sm:$0xff]  ;;  %v106_v30 = vld [vmem:[%s999_s1 + $0x298] sm:$0xff] }
  0x1f   :  { %508 = vmatpush3.msra.mxu1 %v57_v57  ;;  %475 = vmatpush3.msra.mxu0 %v24_v58  ;;  %v92_v27 = vld [vmem:[%s999_s1 + $0x228] sm:$0xff]  ;;  %v91_v29 = vld [vmem:[%s999_s1 + $0x220] sm:$0xff]  ;;  %v90_v31 = vld [vmem:[%s999_s1 + $0x218] sm:$0xff] }
  0x20   :  { %509 = vmatprep.subr.mxu1 %v72_v59  ;;  %476 = vmatprep.subr.mxu0 %v39_v61  ;;  %v105_v32 = vld [vmem:[%s999_s1 + $0x290] sm:$0xff]  ;;  %v104_v34 = vld [vmem:[%s999_s1 + $0x288] sm:$0xff]  ;;  %v103_v36 = vld [vmem:[%s999_s1 + $0x280] sm:$0xff] }
  0x21   :  { %199 = vmatprep.mubr.f32.mxu0 %v129_v60  ;;  %477 = vmatpush3.msra.mxu0 %v23_v63  ;;  %v89_v33 = vld [vmem:[%s999_s1 + $0x210] sm:$0xff]  ;;  %v88_v35 = vld [vmem:[%s999_s1 + $0x208] sm:$0xff]  ;;  %v87_v37 = vld [vmem:[%s999_s1 + $0x200] sm:$0xff] }
  0x22   :  { %510 = vmatpush3.msra.mxu1 %v56_v0  ;;  %200 = vmatmul.mubr.f32.vlgmr.msra.gmra.mxu0 %v20_v53  ;;  %v361_v39 = vld [vmem:[%s1001_s3 + $0x78] sm:$0xff]  ;;  %v360_v40 = vld [vmem:[%s1001_s3 + $0x70] sm:$0xff]  ;;  %v359_v41 = vld [vmem:[%s1001_s3 + $0x68] sm:$0xff] }
  0x23   :  { %511 = vmatprep.subr.mxu1 %v71_v1  ;;  %516 = vmatprep.subr.mxu0 %v118_v2  ;;  %v358_v42 = vld [vmem:[%s1001_s3 + $0x60] sm:$0xff]  ;;  %v357_v43 = vld [vmem:[%s1001_s3 + $0x58] sm:$0xff]  ;;  %v356_v44 = vld [vmem:[%s1001_s3 + $0x50] sm:$0xff] }
  0x24   :  { %512 = vmatpush3.msra.mxu1 %v55_v3  ;;  %269 = vmatprep.mubr.f32.mxu1 %v130_v4  ;;  %v355_v45 = vld [vmem:[%s1001_s3 + $0x48] sm:$0xff]  ;;  %v354_v46 = vld [vmem:[%s1001_s3 + $0x40] sm:$0xff]  ;;  %v353_v47 = vld [vmem:[%s1001_s3 + $0x38] sm:$0xff] }
  0x25   :  { %517 = vmatpush3.msra.mxu0 %v102_v5  ;;  %270 = vmatmul.mubr.f32.vlgmr.msra.gmra.mxu1 %v21_v62  ;;  %v352_v48 = vld [vmem:[%s1001_s3 + $0x30] sm:$0xff]  ;;  %v351_v49 = vld [vmem:[%s1001_s3 + $0x28] sm:$0xff]  ;;  %v350_v50 = vld [vmem:[%s1001_s3 + $0x20] sm:$0xff] }
  0x26   :  { %518 = vmatprep.subr.mxu0 %v117_v7  ;;  %339 = vmatprep.mubr.f32.mxu0 %v131_v8  ;;  %v349_v51 = vld [vmem:[%s1001_s3 + $0x18] sm:$0xff]  ;;  %v348_v52 = vld [vmem:[%s1001_s3 + $0x10] sm:$0xff]  ;;  %v347_v53 = vld [vmem:[%s1001_s3 + $0x8] sm:$0xff] }
  0x27   :  { %519 = vmatpush3.msra.mxu0 %v101_v9  ;;  %568 = vmatprep.subr.mxu1 %v608_v38  ;;  %v346_v54 = vld [vmem:[%s1001_s3] sm:$0xff] }
  0x28   :  { %520 = vmatprep.subr.mxu0 %v116_v10  ;;  %569 = vmatpush3.msra.mxu1 %v361_v39  ;;  %v444_v59 = vld [vmem:[%s1002_s2] ss:$0 sm:$0xff] }
  0x29   :  { %521 = vmatpush3.msra.mxu0 %v100_v11  ;;  %570 = vmatprep.subr.mxu1 %v608_v38  ;;  %v445_v5 = vld [vmem:[%s1003_s4] ss:$0 sm:$0xff] }
  0x2a   :  { %522 = vmatprep.subr.mxu0 %v115_v12  ;;  %571 = vmatpush3.msra.mxu1 %v360_v40 }
  0x2b   :  { %523 = vmatpush3.msra.mxu0 %v99_v13  ;;  %572 = vmatprep.subr.mxu1 %v608_v38 }
  0x2c   :  { %524 = vmatprep.subr.mxu0 %v114_v14  ;;  %573 = vmatpush3.msra.mxu1 %v359_v41 }
  0x2d   :  { %525 = vmatpush3.msra.mxu0 %v98_v15  ;;  %574 = vmatprep.subr.mxu1 %v608_v38 }
  0x2e   :  { %526 = vmatprep.subr.mxu0 %v113_v16  ;;  %575 = vmatpush3.msra.mxu1 %v358_v42 }
  0x2f   :  { %527 = vmatpush3.msra.mxu0 %v97_v17  ;;  %576 = vmatprep.subr.mxu1 %v608_v38 }
  0x30   :  { %528 = vmatprep.subr.mxu0 %v112_v18  ;;  %577 = vmatpush3.msra.mxu1 %v357_v43 }
  0x31   :  { %529 = vmatpush3.msra.mxu0 %v96_v19  ;;  %578 = vmatprep.subr.mxu1 %v608_v38 }
  0x32   :  { %530 = vmatprep.subr.mxu0 %v111_v20  ;;  %579 = vmatpush3.msra.mxu1 %v356_v44 }
  0x33   :  { %531 = vmatpush3.msra.mxu0 %v95_v21  ;;  %580 = vmatprep.subr.mxu1 %v608_v38 }
  0x34   :  { %532 = vmatprep.subr.mxu0 %v110_v22  ;;  %581 = vmatpush3.msra.mxu1 %v355_v45 }
  0x35   :  { %533 = vmatpush3.msra.mxu0 %v94_v23  ;;  %582 = vmatprep.subr.mxu1 %v608_v38 }
  0x36   :  { %534 = vmatprep.subr.mxu0 %v109_v24  ;;  %583 = vmatpush3.msra.mxu1 %v354_v46 }
  0x37   :  { %535 = vmatpush3.msra.mxu0 %v93_v25  ;;  %584 = vmatprep.subr.mxu1 %v608_v38 }
  0x38   :  { %536 = vmatprep.subr.mxu0 %v108_v26  ;;  %585 = vmatpush3.msra.mxu1 %v353_v47 }
  0x39   :  { %537 = vmatpush3.msra.mxu0 %v92_v27  ;;  %586 = vmatprep.subr.mxu1 %v608_v38 }
  0x3a   :  { %538 = vmatprep.subr.mxu0 %v107_v28  ;;  %587 = vmatpush3.msra.mxu1 %v352_v48 }
  0x3b   :  { %539 = vmatpush3.msra.mxu0 %v91_v29  ;;  %588 = vmatprep.subr.mxu1 %v608_v38 }
  0x3c   :  { %540 = vmatprep.subr.mxu0 %v106_v30  ;;  %589 = vmatpush3.msra.mxu1 %v351_v49 }
  0x3d   :  { %541 = vmatpush3.msra.mxu0 %v90_v31  ;;  %590 = vmatprep.subr.mxu1 %v608_v38 }
  0x3e   :  { %542 = vmatprep.subr.mxu0 %v105_v32  ;;  %591 = vmatpush3.msra.mxu1 %v350_v50 }
  0x3f   :  { %543 = vmatpush3.msra.mxu0 %v89_v33  ;;  %592 = vmatprep.subr.mxu1 %v608_v38 }
  0x40   :  { %544 = vmatprep.subr.mxu0 %v104_v34  ;;  %593 = vmatpush3.msra.mxu1 %v349_v51 }
  0x41   :  { %545 = vmatpush3.msra.mxu0 %v88_v35  ;;  %594 = vmatprep.subr.mxu1 %v608_v38 }
  0x42   :  { %546 = vmatprep.subr.mxu0 %v103_v36  ;;  %595 = vmatpush3.msra.mxu1 %v348_v52 }
  0x43   :  { %547 = vmatpush3.msra.mxu0 %v87_v37  ;;  %596 = vmatprep.subr.mxu1 %v608_v38 }
  0x44   :  { %340 = vmatmul.mubr.f32.vlgmr.msra.gmra.mxu0 %v847_v6  ;;  %597 = vmatpush3.msra.mxu1 %v347_v53 }
  0x45   :  { %598 = vmatprep.subr.mxu1 %v608_v38  ;;  %600 = vmatprep.mubr.msk.f32.mxu1 %vm609_vm0, %v608_v38 }
  0x46   :  { %599 = vmatpush3.msra.mxu1 %v346_v54 }
  0xe2   :  { %v478_v55 = vpop.f32.mrf.mxu0 }
  0xe4   :  { %v479_v56 = vpop.f32.mrf.mxu0 }
  0xe5   :  { %v513_v57 = vpop.f32.mrf.mxu1  ;;  %v480_v58 = vadd.f32 %v479_v56, %v478_v55 }
  0xe7   :  { %v514_v60 = vpop.f32.mrf.mxu1  ;;  %v202_v61 = vadd.f32 %v480_v58, %v444_v59 }
  0xe8   :  { %v515_v62 = vadd.f32 %v514_v60, %v513_v57 }
  0xea   :  { %v272_v1 = vadd.f32 %v515_v62, %v202_v61 }
 0x104   :  { %v548_v63 = vpop.f32.mrf.mxu0 }
 0x106   :  { %v549_v0 = vpop.f32.mrf.mxu0 }
 0x107   :  { %v550_v2 = vadd.f32 %v549_v0, %v548_v63 }
 0x109   :  { %v342_v3 = vadd.f32 %v550_v2, %v272_v1 }
 0x10b   :  { %v345_v4 = vmax.f32 %v342_v3, 0.0 }
 0x10d   :  { %601 = vmatmul.mubr.f32.vlgmr.msra.gmra.mxu1 %v345_v4 }
 0x1cd   :  { %v435_v6 = vpop.f32.mrf.mxu1 }
 0x1ce   :  { %v436_v7 = vadd.f32 %v445_v5, %v435_v6 }
 0x1cf   :  { %v602_v8 = vpop.f32.mrf.mxu1 }
 0x1d0   :  { %439 = vst [vmem:[%s1004_s5] sm:$0xf] %v436_v7 }

// kernel: in_context_sam_forward.5
= control target key start
LH: loop header
LB: loop body
LE: loop exit
PB: predicated region body
PF: predicated region fallthrough
CT: control target
= control target key end

     0   :  { %s4800_s23 = smov 0   ;;  %s6025_s0 = inlined_call_operand.vmem [shape: f32[2,64,128], index: 0, kind: input, shape index: {}]   ;;  %s6026_s1 = inlined_call_operand.vmem [shape: f32[64,128], index: 1, kind: input, shape index: {}]   ;;  %s6027_s2 = inlined_call_operand.vmem [shape: f32[1,128], index: 2, kind: input, shape index: {}]   ;;  %s6028_s3 = inlined_call_operand.vmem [shape: f32[2,8,128], index: 3, kind: input, shape index: {}]   ;;  %s6029_s4 = inlined_call_operand.vmem [shape: f32[128,128], index: 4, kind: input, shape index: {}]   ;;  %s6030_s5 = inlined_call_operand.vmem [shape: f32[128,128], index: 5, kind: input, shape index: {}]   ;;  %s6031_s6 = inlined_call_operand.vmem [shape: f32[128,128], index: 6, kind: input, shape index: {}]   ;;  %s6032_s7 = inlined_call_operand.vmem [shape: f32[128,128], index: 7, kind: input, shape index: {}]   ;;  %s6033_s8 = inlined_call_operand.vmem [shape: f32[1,128], index: 8, kind: input, shape index: {}]   ;;  %s6034_s9 = inlined_call_operand.vmem [shape: f32[1,128], index: 9, kind: input, shape index: {}]   ;;  %s6035_s10 = inlined_call_operand.vmem [shape: f32[128,16], index: 10, kind: input, shape index: {}]   ;;  %s6036_s11 = inlined_call_operand.vmem [shape: f32[1,16], index: 11, kind: input, shape index: {}]   ;;  %s6037_s12 = inlined_call_operand.vmem [shape: f32[128,16], index: 12, kind: input, shape index: {}]   ;;  %s6038_s13 = inlined_call_operand.vmem [shape: f32[1,16], index: 13, kind: input, shape index: {}]   ;;  %s6039_s14 = inlined_call_operand.vmem [shape: f32[128,1], index: 14, kind: input, shape index: {}]   ;;  %s6040_s15 = inlined_call_operand.<no memory space> [shape: f32[1,1], index: 15, kind: input, shape index: {}]   ;;  %s6041_s16 = inlined_call_operand.vmem [shape: f32[64,1024], index: 16, kind: input, shape index: {}]   ;;  %s6042_s17 = inlined_call_operand.vmem [shape: bf16[64,3840], index: 17, kind: input, shape index: {}]   ;;  %s6043_s18 = inlined_call_operand.vmem [shape: f32[2,2,1024], index: 18, kind: output, shape index: {0}]   ;;  %s6044_s19 = inlined_call_operand.vmem [shape: f32[2,2,3840], index: 19, kind: output, shape index: {1}]   ;;  %s6045_s20 = inlined_call_operand.vmem [shape: f32[2,2,1], index: 20, kind: output, shape index: {2}]  }
   0x1   :  { %6049 = sst [smem:[#allocation3_spill]] %s6025_s0  ;;  %v26_v0 = vstv %s6040_s15 }
   0x2   :  { %6050 = sst [smem:[#allocation4_spill]] %s6026_s1  ;;  %27 = vst [vmem:[#allocation2] sm:$0x1] %v26_v0 }
   0x3   :  { %6051 = sst [smem:[#allocation5_spill]] %s6027_s2 }
   0x4   :  { %6052 = sst [smem:[#allocation6_spill]] %s6028_s3 }
   0x5   :  { %6053 = sst [smem:[#allocation7_spill]] %s6029_s4 }
   0x6 LB: > { %s3803_s24 = sadd.s32 4294967295, %s4686_s23   ;;  %p3807_p0 = scmp.ge.s32.totalorder %s4686_s23, 1  ;;  %s4686_s23 = sphi %s4800_s23, %s33_s23  }
   0x7   : > { %p569_p1 = scmp.lt.s32.totalorder %s4686_s23, 3 }
   0x9   : > { %p570_p2 = pnand %p3807_p0, %p569_p1 }
   0xa   : > { %p636_p3 = scmp.lt.s32.totalorder (!%p570_p2), %s3803_s24, 1  ;;  %s6054_s27 = sld [smem:[#allocation3_spill]] (!%p570_p2) }
   0xb   : > { %573 = sbr.rel (%p570_p2) target bundleno = 2249 (0x8c9), region = 92  ;;  %s6055_s22 = sld [smem:[#allocation5_spill]] (!%p570_p2) }
   0xc   : > { %s6056_s25 = sld [smem:[#allocation4_spill]] (!%p570_p2) }
   0xd   : > { %s6057_s26 = sld [smem:[#allocation7_spill]] (!%p570_p2) }
  0x10   : > { %v710_v1 = vld [vmem:[%s6030_s5 + $0x78] sm:$0xff]  ;;  %v709_v3 = vld [vmem:[%s6030_s5 + $0x70] sm:$0xff]  ;;  %v708_v5 = vld [vmem:[%s6030_s5 + $0x68] sm:$0xff]  ;;  %s6060_s24 = smov (!%p636_p3, %s3803_s24), 1  ;;  %vm1241_vm0 = vcmask 523264   ;;  %vm1582_vm1 = vcmask 130048  }
  0x11   : > { %v831_v2 = vld [vmem:[%s6031_s6 + $0x78] sm:$0xff]  ;;  %4146 = vmatprep.subr.mxu0 %v710_v1  ;;  %v830_v4 = vld [vmem:[%s6031_s6 + $0x70] sm:$0xff]  ;;  %v829_v6 = vld [vmem:[%s6031_s6 + $0x68] sm:$0xff]  ;;  %s3973_s29 = sshll.u32 %s6060_s24, 6  ;;  %vm4689_vm2 = vmmov 0   ;;  %vm1482_vm3 = vcmask 1040384  }
  0x12   : > { %4190 = vmatprep.subr.mxu1 %v831_v2  ;;  %4147 = vmatpush3.msra.mxu0 %v710_v1  ;;  %v707_v7 = vld [vmem:[%s6030_s5 + $0x60] sm:$0xff]  ;;  %v706_v9 = vld [vmem:[%s6030_s5 + $0x58] sm:$0xff]  ;;  %v705_v11 = vld [vmem:[%s6030_s5 + $0x50] sm:$0xff]  ;;  %s4884_s28 = scalar_lea.vmem %s6054_s27, %s3973_s29  ;;  %s3974_s21 = sshll.u32 %s6060_s24, 4  ;;  %vm3682_vm4 = vcmask 1024  }
  0x13   : > { %4191 = vmatpush3.msra.mxu1 %v831_v2  ;;  %4148 = vmatprep.subr.mxu0 %v709_v3  ;;  %v828_v8 = vld [vmem:[%s6031_s6 + $0x60] sm:$0xff]  ;;  %v827_v10 = vld [vmem:[%s6031_s6 + $0x58] sm:$0xff]  ;;  %v826_v12 = vld [vmem:[%s6031_s6 + $0x50] sm:$0xff]  ;;  %s4475_s2 = smul.u32 60, %s6060_s24  ;;  %s3813_s4 = sshll.u32 %s6060_s24, 1 }
  0x14   : > { %4192 = vmatprep.subr.mxu1 %v830_v4  ;;  %4149 = vmatpush3.msra.mxu0 %v709_v3  ;;  %v704_v13 = vld [vmem:[%s6030_s5 + $0x48] sm:$0xff]  ;;  %v703_v15 = vld [vmem:[%s6030_s5 + $0x40] sm:$0xff]  ;;  %v702_v17 = vld [vmem:[%s6030_s5 + $0x38] sm:$0xff] }
  0x15   : > { %4193 = vmatpush3.msra.mxu1 %v830_v4  ;;  %4150 = vmatprep.subr.mxu0 %v708_v5  ;;  %v825_v14 = vld [vmem:[%s6031_s6 + $0x48] sm:$0xff]  ;;  %v824_v16 = vld [vmem:[%s6031_s6 + $0x40] sm:$0xff]  ;;  %v823_v18 = vld [vmem:[%s6031_s6 + $0x38] sm:$0xff]  ;;  %s5996_s27 = scalar_lea.vmem %s6044_s19, %s4475_s2 }
  0x16   : > { %4194 = vmatprep.subr.mxu1 %v829_v6  ;;  %4151 = vmatpush3.msra.mxu0 %v708_v5  ;;  %v701_v19 = vld [vmem:[%s6030_s5 + $0x30] sm:$0xff]  ;;  %v700_v21 = vld [vmem:[%s6030_s5 + $0x28] sm:$0xff]  ;;  %v699_v23 = vld [vmem:[%s6030_s5 + $0x20] sm:$0xff] }
  0x17   : > { %4195 = vmatpush3.msra.mxu1 %v829_v6  ;;  %4152 = vmatprep.subr.mxu0 %v707_v7  ;;  %v822_v20 = vld [vmem:[%s6031_s6 + $0x30] sm:$0xff]  ;;  %v821_v22 = vld [vmem:[%s6031_s6 + $0x28] sm:$0xff]  ;;  %v820_v24 = vld [vmem:[%s6031_s6 + $0x20] sm:$0xff] }
  0x18   : > { %4196 = vmatprep.subr.mxu1 %v828_v8  ;;  %4153 = vmatpush3.msra.mxu0 %v707_v7  ;;  %v656_v25 = vld [vmem:[%s4884_s28] sm:$0xff]  ;;  %v698_v27 = vld [vmem:[%s6030_s5 + $0x18] sm:$0xff]  ;;  %v697_v29 = vld [vmem:[%s6030_s5 + $0x10] sm:$0xff] }
  0x19   : > { %4197 = vmatpush3.msra.mxu1 %v828_v8  ;;  %4154 = vmatprep.subr.mxu0 %v706_v9  ;;  %v4896_v26 = vld [vmem:[%s6055_s22] ss:$0 sm:$0xff]  ;;  %v819_v28 = vld [vmem:[%s6031_s6 + $0x18] sm:$0xff]  ;;  %v818_v30 = vld [vmem:[%s6031_s6 + $0x10] sm:$0xff]  ;;  %s645_s22 = scalar_lea.vmem %s6043_s18, %s3974_s21  ;;  %s654_s21 = scalar_lea.vmem %s6045_s20, %s3813_s4 }
  0x1a   : > { %4198 = vmatprep.subr.mxu1 %v827_v10  ;;  %4155 = vmatpush3.msra.mxu0 %v706_v9  ;;  %v657_v31 = vld [vmem:[%s4884_s28 + $0x8] sm:$0xff]  ;;  %v4918_v34 = vadd.f32 %v4896_v26, %v656_v25  ;;  %v679_v35 = vld [vmem:[%s6056_s25] sm:$0xff]  ;;  %v658_v36 = vld [vmem:[%s4884_s28 + $0x10] sm:$0xff] }
  0x1b   : > { %4199 = vmatpush3.msra.mxu1 %v827_v10  ;;  %4156 = vmatprep.subr.mxu0 %v705_v11  ;;  %v696_v32 = vld [vmem:[%s6030_s5 + $0x8] sm:$0xff]  ;;  %v659_v38 = vld [vmem:[%s4884_s28 + $0x18] sm:$0xff]  ;;  %v695_v39 = vld [vmem:[%s6030_s5] sm:$0xff]  ;;  %v4935_v41 = vadd.f32 %v4896_v26, %v657_v31  ;;  %v4942_v44 = vadd.f32 %v4896_v26, %v658_v36 }
  0x1c   : > { %4200 = vmatprep.subr.mxu1 %v826_v12  ;;  %4157 = vmatpush3.msra.mxu0 %v705_v11  ;;  %v817_v33 = vld [vmem:[%s6031_s6 + $0x8] sm:$0xff]  ;;  %v816_v40 = vld [vmem:[%s6031_s6] sm:$0xff]  ;;  %v681_v42 = vld [vmem:[%s6056_s25 + $0x10] sm:$0xff]  ;;  %v687_v45 = vadd.f32 %v679_v35, %v4918_v34  ;;  %v4951_v49 = vadd.f32 %v4896_v26, %v659_v38 }
  0x1d   : > { %4201 = vmatpush3.msra.mxu1 %v826_v12  ;;  %4158 = vmatprep.subr.mxu0 %v704_v13  ;;  %v680_v37 = vld [vmem:[%s6056_s25 + $0x8] sm:$0xff]  ;;  %v660_v43 = vld [vmem:[%s4884_s28 + $0x20] sm:$0xff]  ;;  %v682_v46 = vld [vmem:[%s6056_s25 + $0x18] sm:$0xff]  ;;  %v689_v52 = vadd.f32 %v681_v42, %v4942_v44 }
  0x1e   : > { %4202 = vmatprep.subr.mxu1 %v825_v14  ;;  %4159 = vmatpush3.msra.mxu0 %v704_v13  ;;  %v661_v47 = vld [vmem:[%s4884_s28 + $0x28] sm:$0xff]  ;;  %v688_v48 = vadd.f32 %v680_v37, %v4935_v41  ;;  %v683_v50 = vld [vmem:[%s6056_s25 + $0x20] sm:$0xff]  ;;  %v662_v51 = vld [vmem:[%s4884_s28 + $0x30] sm:$0xff]  ;;  %v4959_v53 = vadd.f32 %v4896_v26, %v660_v43  ;;  %v690_v58 = vadd.f32 %v682_v46, %v4951_v49 }
  0x1f   : > { %4203 = vmatpush3.msra.mxu1 %v825_v14  ;;  %4160 = vmatprep.subr.mxu0 %v703_v15  ;;  %v1090_v54 = vld [vmem:[%s6057_s26 + $0x78] sm:$0xff]  ;;  %v684_v56 = vld [vmem:[%s6056_s25 + $0x28] sm:$0xff]  ;;  %v4975_v59 = vadd.f32 %v4896_v26, %v661_v47  ;;  %v685_v60 = vld [vmem:[%s6056_s25 + $0x30] sm:$0xff]  ;;  %v4986_v63 = vadd.f32 %v4896_v26, %v662_v51 }
  0x20   : > { %4204 = vmatprep.subr.mxu1 %v824_v16  ;;  %4161 = vmatpush3.msra.mxu0 %v703_v15  ;;  %v952_v55 = vld [vmem:[%s6035_s10 + $0x78] sm:$0xff]  ;;  %v691_v61 = vadd.f32 %v683_v50, %v4959_v53  ;;  %v1089_v62 = vld [vmem:[%s6057_s26 + $0x70] sm:$0xff]  ;;  %v1088_v5 = vld [vmem:[%s6057_s26 + $0x68] sm:$0xff] }
  0x21   : > { %4205 = vmatpush3.msra.mxu1 %v824_v16  ;;  %4162 = vmatprep.subr.mxu0 %v702_v17  ;;  %v663_v57 = vld [vmem:[%s4884_s28 + $0x38] sm:$0xff]  ;;  %v951_v0 = vld [vmem:[%s6035_s10 + $0x70] sm:$0xff]  ;;  %v692_v2 = vadd.f32 %v684_v56, %v4975_v59  ;;  %v693_v4 = vadd.f32 %v685_v60, %v4986_v63  ;;  %v950_v6 = vld [vmem:[%s6035_s10 + $0x68] sm:$0xff]  ;;  %s6058_s28 = sld [smem:[#allocation6_spill]] }
  0x22   : > { %4206 = vmatprep.subr.mxu1 %v823_v18  ;;  %4163 = vmatpush3.msra.mxu0 %v702_v17  ;;  %v686_v1 = vld [vmem:[%s6056_s25 + $0x38] sm:$0xff]  ;;  %v4997_v3 = vadd.f32 %v4896_v26, %v663_v57  ;;  %v1087_v8 = vld [vmem:[%s6057_s26 + $0x60] sm:$0xff]  ;;  %v1085_v13 = vld [vmem:[%s6057_s26 + $0x50] sm:$0xff] }
  0x23   : > { %4207 = vmatpush3.msra.mxu1 %v823_v18  ;;  %4164 = vmatprep.subr.mxu0 %v701_v19  ;;  %v949_v10 = vld [vmem:[%s6035_s10 + $0x60] sm:$0xff]  ;;  %v1086_v11 = vld [vmem:[%s6057_s26 + $0x58] sm:$0xff]  ;;  %v947_v14 = vld [vmem:[%s6035_s10 + $0x50] sm:$0xff] }
  0x24   : > { %4208 = vmatprep.subr.mxu1 %v822_v20  ;;  %4165 = vmatpush3.msra.mxu0 %v701_v19  ;;  %v694_v7 = vadd.f32 %v686_v1, %v4997_v3  ;;  %v948_v12 = vld [vmem:[%s6035_s10 + $0x58] sm:$0xff]  ;;  %v1084_v15 = vld [vmem:[%s6057_s26 + $0x48] sm:$0xff]  ;;  %v1083_v17 = vld [vmem:[%s6057_s26 + $0x40] sm:$0xff] }
  0x25   : > { %4209 = vmatpush3.msra.mxu1 %v822_v20  ;;  %4166 = vmatprep.subr.mxu0 %v700_v21  ;;  %v946_v16 = vld [vmem:[%s6035_s10 + $0x48] sm:$0xff]  ;;  %v945_v18 = vld [vmem:[%s6035_s10 + $0x40] sm:$0xff]  ;;  %v1082_v19 = vld [vmem:[%s6057_s26 + $0x38] sm:$0xff] }
  0x26   : > { %4210 = vmatprep.subr.mxu1 %v821_v22  ;;  %4167 = vmatpush3.msra.mxu0 %v700_v21  ;;  %v944_v20 = vld [vmem:[%s6035_s10 + $0x38] sm:$0xff]  ;;  %v1081_v21 = vld [vmem:[%s6057_s26 + $0x30] sm:$0xff]  ;;  %v941_v31 = vld [vmem:[%s6035_s10 + $0x20] sm:$0xff] }
  0x27   : > { %4211 = vmatpush3.msra.mxu1 %v821_v22  ;;  %4168 = vmatprep.subr.mxu0 %v699_v23  ;;  %v5015_v9 = vld [vmem:[%s6058_s28] sm:$0xff]  ;;  %v943_v22 = vld [vmem:[%s6035_s10 + $0x30] sm:$0xff]  ;;  %v1078_v25 = vld [vmem:[%s6057_s26 + $0x18] sm:$0xff] }
  0x28   : > { %4212 = vmatprep.subr.mxu1 %v820_v24  ;;  %4169 = vmatpush3.msra.mxu0 %v699_v23  ;;  %v1080_v23 = vld [vmem:[%s6057_s26 + $0x28] sm:$0xff]  ;;  %v1077_v26 = vld [vmem:[%s6057_s26 + $0x10] sm:$0xff]  ;;  %v937_v35 = vld [vmem:[%s6035_s10] sm:$0xff] }
  0x29   : > { %4213 = vmatpush3.msra.mxu1 %v820_v24  ;;  %4170 = vmatprep.subr.mxu0 %v698_v27  ;;  %v1079_v24 = vld [vmem:[%s6057_s26 + $0x20] sm:$0xff] }
  0x2a   : > { %4214 = vmatprep.subr.mxu1 %v819_v28  ;;  %4171 = vmatpush3.msra.mxu0 %v698_v27  ;;  %v1076_v27 = vld [vmem:[%s6057_s26 + $0x8] sm:$0xff] }
  0x2b   : > { %4215 = vmatpush3.msra.mxu1 %v819_v28  ;;  %4172 = vmatprep.subr.mxu0 %v697_v29  ;;  %v1075_v28 = vld [vmem:[%s6057_s26] sm:$0xff] }
  0x2c   : > { %4216 = vmatprep.subr.mxu1 %v818_v30  ;;  %4173 = vmatpush3.msra.mxu0 %v697_v29  ;;  %v5081_v29 = vld [vmem:[%s6058_s28 + $0x8] sm:$0xff] }
  0x2d   : > { %4217 = vmatpush3.msra.mxu1 %v818_v30  ;;  %4174 = vmatprep.subr.mxu0 %v696_v32  ;;  %v942_v30 = vld [vmem:[%s6035_s10 + $0x28] sm:$0xff] }
  0x2e   : > { %4218 = vmatprep.subr.mxu1 %v817_v33  ;;  %4175 = vmatpush3.msra.mxu0 %v696_v32  ;;  %v940_v32 = vld [vmem:[%s6035_s10 + $0x18] sm:$0xff] }
  0x2f   : > { %4219 = vmatpush3.msra.mxu1 %v817_v33  ;;  %4176 = vmatprep.subr.mxu0 %v695_v39  ;;  %v939_v33 = vld [vmem:[%s6035_s10 + $0x10] sm:$0xff] }
  0x30   : > { %4220 = vmatprep.subr.mxu1 %v816_v40  ;;  %4177 = vmatpush3.msra.mxu0 %v695_v39 }
  0x31   : > { %4178 = vmatprep.mubr.f32.mxu0 %v687_v45  ;;  %4221 = vmatpush3.msra.mxu1 %v816_v40 }
  0x32   : > { %4222 = vmatprep.mubr.f32.mxu1 %v4918_v34  ;;  %4179 = vmatmul.mubr.f32.vlgmr.msra.gmra.mxu0 %v688_v48 }
  0x33   : > { %4223 = vmatmul.mubr.f32.vlgmr.msra.gmra.mxu1 %v4935_v41  ;;  %4181 = vmatprep.mubr.f32.mxu0 %v689_v52 }
  0x34   : > { %4225 = vmatprep.mubr.f32.mxu1 %v4942_v44  ;;  %4278 = vmatprep.subr.mxu1 %v1090_v54 }
  0x35   : > { %4234 = vmatprep.subr.mxu0 %v952_v55  ;;  %4279 = vmatpush3.msra.mxu1 %v1090_v54 }
  0x36   : > { %4235 = vmatpush3.msra.mxu0 %v952_v55  ;;  %4280 = vmatprep.subr.mxu1 %v1089_v62 }
  0x37   : > { %4182 = vmatmul.mubr.f32.gmra.mxu0 %v690_v58  ;;  %4226 = vmatmul.mubr.f32.gmra.mxu1 %v4951_v49 }
  0x38   : > { %4184 = vmatprep.mubr.f32.mxu0 %v691_v61  ;;  %4228 = vmatprep.mubr.f32.mxu1 %v4959_v53 }
  0x39   : > { %4236 = vmatprep.subr.mxu0 %v951_v0  ;;  %4281 = vmatpush3.msra.mxu1 %v1089_v62 }
  0x3a   : > { %4237 = vmatpush3.msra.mxu0 %v951_v0  ;;  %4282 = vmatprep.subr.mxu1 %v1088_v5 }
  0x3b   : > { %4185 = vmatmul.mubr.f32.gmra.mxu0 %v692_v2  ;;  %4229 = vmatmul.mubr.f32.gmra.mxu1 %v4975_v59 }
  0x3c   : > { %4187 = vmatprep.mubr.f32.mxu0 %v693_v4  ;;  %4231 = vmatprep.mubr.f32.mxu1 %v4986_v63 }
  0x3d   : > { %4238 = vmatprep.subr.mxu0 %v950_v6  ;;  %4283 = vmatpush3.msra.mxu1 %v1088_v5 }
  0x3e   : > { %4239 = vmatpush3.msra.mxu0 %v950_v6  ;;  %4284 = vmatprep.subr.mxu1 %v1087_v8 }
  0x3f   : > { %4188 = vmatmul.mubr.f32.gmra.mxu0 %v694_v7  ;;  %4232 = vmatmul.mubr.f32.gmra.mxu1 %v4997_v3 }
  0x40   : > { %4310 = vmatprep.mubr.f32.mxu1 %v5015_v9  ;;  %4285 = vmatpush3.msra.mxu1 %v1087_v8 }
  0x41   : > { %4240 = vmatprep.subr.mxu0 %v949_v10  ;;  %4286 = vmatprep.subr.mxu1 %v1086_v11 }
  0x42   : > { %4241 = vmatpush3.msra.mxu0 %v949_v10  ;;  %4287 = vmatpush3.msra.mxu1 %v1086_v11 }
  0x43   : > { %4242 = vmatprep.subr.mxu0 %v948_v12  ;;  %4288 = vmatprep.subr.mxu1 %v1085_v13 }
  0x44   : > { %4243 = vmatpush3.msra.mxu0 %v948_v12  ;;  %4289 = vmatpush3.msra.mxu1 %v1085_v13  ;;  %v1360_v13 = vld [vmem:[%s6032_s7 + $0x78] sm:$0xff] }
  0x45   : > { %4244 = vmatprep.subr.mxu0 %v947_v14  ;;  %4290 = vmatprep.subr.mxu1 %v1084_v15 }
  0x46   : > { %4245 = vmatpush3.msra.mxu0 %v947_v14  ;;  %4291 = vmatpush3.msra.mxu1 %v1084_v15 }
  0x47   : > { %4246 = vmatprep.subr.mxu0 %v946_v16  ;;  %4292 = vmatprep.subr.mxu1 %v1083_v17 }
  0x48   : > { %4247 = vmatpush3.msra.mxu0 %v946_v16  ;;  %4293 = vmatpush3.msra.mxu1 %v1083_v17 }
  0x49   : > { %4248 = vmatprep.subr.mxu0 %v945_v18  ;;  %4294 = vmatprep.subr.mxu1 %v1082_v19 }
  0x4a   : > { %4249 = vmatpush3.msra.mxu0 %v945_v18  ;;  %4295 = vmatpush3.msra.mxu1 %v1082_v19 }
  0x4b   : > { %4250 = vmatprep.subr.mxu0 %v944_v20  ;;  %4296 = vmatprep.subr.mxu1 %v1081_v21 }
  0x4c   : > { %4251 = vmatpush3.msra.mxu0 %v944_v20  ;;  %4297 = vmatpush3.msra.mxu1 %v1081_v21  ;;  %v1359_v20 = vld [vmem:[%s6032_s7 + $0x70] sm:$0xff]  ;;  %v1358_v21 = vld [vmem:[%s6032_s7 + $0x68] sm:$0xff] }
  0x4d   : > { %4252 = vmatprep.subr.mxu0 %v943_v22  ;;  %4298 = vmatprep.subr.mxu1 %v1080_v23 }
  0x4e   : > { %4253 = vmatpush3.msra.mxu0 %v943_v22  ;;  %4299 = vmatpush3.msra.mxu1 %v1080_v23  ;;  %v1357_v22 = vld [vmem:[%s6032_s7 + $0x60] sm:$0xff]  ;;  %v1356_v23 = vld [vmem:[%s6032_s7 + $0x58] sm:$0xff] }
  0x4f   : > { %4266 = vmatprep.mubr.f32.mxu0 %v4918_v34  ;;  %4300 = vmatprep.subr.mxu1 %v1079_v24  ;;  %v938_v34 = vld [vmem:[%s6035_s10 + $0x8] sm:$0xff] }
  0x50   : > { %4301 = vmatpush3.msra.mxu1 %v1079_v24  ;;  %4254 = vmatprep.subr.mxu0 %v942_v30  ;;  %v1355_v24 = vld [vmem:[%s6032_s7 + $0x50] sm:$0xff] }
  0x51   : > { %4302 = vmatprep.subr.mxu1 %v1078_v25  ;;  %4255 = vmatpush3.msra.mxu0 %v942_v30  ;;  %v1350_v30 = vld [vmem:[%s6032_s7 + $0x28] sm:$0xff] }
  0x52   : > { %4303 = vmatpush3.msra.mxu1 %v1078_v25  ;;  %4256 = vmatprep.subr.mxu0 %v941_v31  ;;  %v1354_v25 = vld [vmem:[%s6032_s7 + $0x48] sm:$0xff] }
  0x53   : > { %4304 = vmatprep.subr.mxu1 %v1077_v26  ;;  %4257 = vmatpush3.msra.mxu0 %v941_v31  ;;  %v1349_v31 = vld [vmem:[%s6032_s7 + $0x20] sm:$0xff] }
  0x54   : > { %4305 = vmatpush3.msra.mxu1 %v1077_v26  ;;  %4258 = vmatprep.subr.mxu0 %v940_v32  ;;  %v1353_v26 = vld [vmem:[%s6032_s7 + $0x40] sm:$0xff] }
  0x55   : > { %4306 = vmatprep.subr.mxu1 %v1076_v27  ;;  %4259 = vmatpush3.msra.mxu0 %v940_v32  ;;  %v1348_v32 = vld [vmem:[%s6032_s7 + $0x18] sm:$0xff] }
  0x56   : > { %4307 = vmatpush3.msra.mxu1 %v1076_v27  ;;  %4260 = vmatprep.subr.mxu0 %v939_v33  ;;  %v1352_v27 = vld [vmem:[%s6032_s7 + $0x38] sm:$0xff] }
  0x57   : > { %4308 = vmatprep.subr.mxu1 %v1075_v28  ;;  %4261 = vmatpush3.msra.mxu0 %v939_v33  ;;  %v1347_v33 = vld [vmem:[%s6032_s7 + $0x10] sm:$0xff] }
  0x58   : > { %4309 = vmatpush3.msra.mxu1 %v1075_v28  ;;  %4262 = vmatprep.subr.mxu0 %v938_v34  ;;  %v1351_v28 = vld [vmem:[%s6032_s7 + $0x30] sm:$0xff] }
  0x59   : > { %4311 = vmatmul.mubr.f32.vlgmr.msra.gmra.mxu1 %v5081_v29  ;;  %4263 = vmatpush3.msra.mxu0 %v938_v34  ;;  %v1346_v34 = vld [vmem:[%s6032_s7 + $0x8] sm:$0xff] }
  0x5a   : > { %4264 = vmatprep.subr.mxu0 %v937_v35 }
  0x5b   : > { %4265 = vmatpush3.msra.mxu0 %v937_v35  ;;  %v1345_v35 = vld [vmem:[%s6032_s7] sm:$0xff] }
  0x5c   : > { %4267 = vmatmul.mubr.f32.vlgmr.msra.gmra.mxu0 %v4935_v41 }
  0x5d   : > { %4269 = vmatprep.mubr.f32.mxu0 %v4942_v44 }
  0x60   : > { %4270 = vmatmul.mubr.f32.gmra.mxu0 %v4951_v49 }
  0x61   : > { %4272 = vmatprep.mubr.f32.mxu0 %v4959_v53 }
  0x64   : > { %4273 = vmatmul.mubr.f32.gmra.mxu0 %v4975_v59 }
  0x65   : > { %4275 = vmatprep.mubr.f32.mxu0 %v4986_v63 }
  0x68   : > { %4276 = vmatmul.mubr.f32.gmra.mxu0 %v4997_v3 }
  0xf2   : > { %v4180_v36 = vpop.f32.mrf.mxu0 }
  0xf3   : > { %v4224_v37 = vpop.f32.mrf.mxu1 }
  0xf4   : > { %v777_v38 = vpop.f32.mrf.mxu0 }
  0xf5   : > { %v898_v39 = vpop.f32.mrf.mxu1 }
  0xf7   : > { %v4183_v40 = vpop.f32.mrf.mxu0  ;;  %v4227_v42 = vpop.f32.mrf.mxu1 }
  0xf9   : > { %v787_v43 = vpop.f32.mrf.mxu0  ;;  %v908_v41 = vpop.f32.mrf.mxu1 }
  0xfb   : > { %v4186_v45 = vpop.f32.mrf.mxu0  ;;  %v4230_v44 = vpop.f32.mrf.mxu1 }
  0xfd   : > { %v797_v46 = vpop.f32.mrf.mxu0  ;;  %v918_v47 = vpop.f32.mrf.mxu1 }
  0xff   : > { %v4189_v48 = vpop.f32.mrf.mxu0  ;;  %v4233_v49 = vpop.f32.mrf.mxu1 }
 0x100   : > { %4313 = vmatprep.subr.mxu0 %v4189_v48  ;;  %4332 = vmatprep.subr.mxu1 %v4233_v49 }
 0x101   : > { %v807_v50 = vpop.f32.mrf.mxu0  ;;  %v928_v51 = vpop.f32.mrf.mxu1  ;;  %4314 = vmatpush3.xpose.msra.mxu0 %v4189_v48  ;;  %4333 = vmatpush3.msra.mxu1 %v4233_v49 }
 0x102   : > { %4315 = vmatprep.subr.mxu0 %v807_v50  ;;  %4334 = vmatprep.subr.mxu1 %v928_v51 }
 0x103   : > { %4335 = vmatpush3.msra.mxu1 %v928_v51 }
 0x104   : > { %4336 = vmatprep.subr.mxu1 %v4230_v44 }
 0x105   : > { %4316 = vmatpush3.xpose.msra.mxu0 %v807_v50  ;;  %4337 = vmatpush3.msra.mxu1 %v4230_v44 }
 0x106   : > { %4317 = vmatprep.subr.mxu0 %v4186_v45  ;;  %4338 = vmatprep.subr.mxu1 %v918_v47 }
 0x107   : > { %4339 = vmatpush3.msra.mxu1 %v918_v47 }
 0x108   : > { %4340 = vmatprep.subr.mxu1 %v4227_v42 }
 0x109   : > { %4318 = vmatpush3.xpose.msra.mxu0 %v4186_v45  ;;  %4341 = vmatpush3.msra.mxu1 %v4227_v42 }
 0x10a   : > { %4319 = vmatprep.subr.mxu0 %v797_v46  ;;  %4342 = vmatprep.subr.mxu1 %v908_v41 }
 0x10b   : > { %4343 = vmatpush3.msra.mxu1 %v908_v41 }
 0x10c   : > { %4344 = vmatprep.subr.mxu1 %v4224_v37 }
 0x10d   : > { %4320 = vmatpush3.xpose.msra.mxu0 %v797_v46  ;;  %4345 = vmatpush3.msra.mxu1 %v4224_v37  ;;  %v3815_v37 = vld [vmem:[%s6036_s11] ss:$0 sm:$0xff] }
 0x10e   : > { %4321 = vmatprep.subr.mxu0 %v4183_v40  ;;  %4346 = vmatprep.subr.mxu1 %v898_v39 }
 0x10f   : > { %4347 = vmatpush3.msra.mxu1 %v898_v39 }
 0x110   : > { %4351 = vmatprep.subr.mxu1 %v1360_v13 }
 0x111   : > { %4322 = vmatpush3.xpose.msra.mxu0 %v4183_v40 }
 0x112   : > { %4323 = vmatprep.subr.mxu0 %v787_v43 }
 0x115   : > { %4324 = vmatpush3.xpose.msra.mxu0 %v787_v43 }
 0x116   : > { %4325 = vmatprep.subr.mxu0 %v4180_v36 }
 0x119   : > { %4326 = vmatpush3.xpose.msra.mxu0 %v4180_v36  ;;  %v4312_v52 = vpop.f32.mrf.mxu1  ;;  %v4688_v36 = vmov 0.0  }
 0x11a   : > { %4327 = vmatprep.subr.mxu0 %v777_v38 }
 0x11b   : > { %v1157_v53 = vpop.f32.mrf.mxu1 }
 0x11c   : > { %4329 = vmatprep.mubr.f32.mxu0 %v1157_v53  ;;  %v5109_v54 = vpop.f32.mrf.mxu0 }
 0x11d   : > { %4328 = vmatpush3.xpose.msra.mxu0 %v777_v38  ;;  %v1032_v51 = vadd.f32 %v5109_v54, %v3815_v37 }
 0x11e   : > { %v5111_v55 = vpop.f32.mrf.mxu0  ;;  %4386 = vmatprep.subr.mxu0 %v4688_v36 }
 0x11f   : > { %v1066_v53 = vmax.f32 %v1032_v51, 0.0  ;;  %v1706_v51 = vld [vmem:[%s6041_s16 + $0xd0] sm:$0xff] }
 0x120   : > { %4330 = vmatmul.mubr.f32.vlgmr.msra.gmra.mxu0 %v4312_v52  ;;  %v5113_v56 = vpop.f32.mrf.mxu0 }
 0x121   : > { %v1042_v47 = vadd.f32 %v5113_v56, %v3815_v37  ;;  %v1027_v56 = vadd.f32 %v3815_v37, %v5111_v55  ;;  %4418 = vmatprep.mubr.msk.f32.mxu0 %vm4689_vm2, %v4688_v36 }
 0x122   : > { %v5115_v57 = vpop.f32.mrf.mxu0 }
 0x123   : > { %v1068_v49 = vmax.f32 %v1042_v47, 0.0  ;;  %v1037_v50 = vadd.f32 %v3815_v37, %v5115_v57  ;;  %v1722_v47 = vld [vmem:[%s6041_s16 + $0x150] sm:$0xff] }
 0x124   : > { %v5117_v58 = vpop.f32.mrf.mxu0 }
 0x125   : > { %v1052_v41 = vadd.f32 %v5117_v58, %v3815_v37  ;;  %v1067_v52 = vmax.f32 %v1037_v50, 0.0  ;;  %v1065_v58 = vmax.f32 %v1027_v56, 0.0  ;;  %v1707_v50 = vld [vmem:[%s6041_s16 + $0xd8] sm:$0xff] }
 0x126   : > { %v5119_v59 = vpop.f32.mrf.mxu0  ;;  %v1691_v56 = vld [vmem:[%s6041_s16 + $0x58] sm:$0xff] }
 0x127   : > { %v1070_v44 = vmax.f32 %v1052_v41, 0.0  ;;  %v1047_v46 = vadd.f32 %v3815_v37, %v5119_v59  ;;  %v1738_v41 = vld [vmem:[%s6041_s16 + $0x1d0] sm:$0xff] }
 0x128   : > { %v5121_v60 = vpop.f32.mrf.mxu0 }
 0x129   : > { %v1062_v38 = vadd.f32 %v5121_v60, %v3815_v37  ;;  %v1069_v48 = vmax.f32 %v1047_v46, 0.0  ;;  %v1723_v46 = vld [vmem:[%s6041_s16 + $0x158] sm:$0xff] }
 0x12a   : > { %v5123_v61 = vpop.f32.mrf.mxu0 }
 0x12b   : > { %v1072_v42 = vmax.f32 %v1062_v38, 0.0  ;;  %v1057_v43 = vadd.f32 %v3815_v37, %v5123_v61  ;;  %v1503_v61 = vld [vmem:[%s6037_s12 + $0x78] sm:$0xff] }
 0x12c   : > { %4387 = vmatpush3.msra.mxu0 %v1503_v61 }
 0x12d   : > { %v1071_v45 = vmax.f32 %v1057_v43, 0.0  ;;  %4388 = vmatprep.subr.mxu0 %v4688_v36  ;;  %v1739_v43 = vld [vmem:[%s6041_s16 + $0x1d8] sm:$0xff] }
 0x1e0   : > { %v4331_v62 = vpop.f32.mrf.mxu0 }
 0x1e1   : > { %v1245_v1 = vsel %vm1241_vm0, %v4331_v62, -inf }
 0x1e2   : > { %v1232_v63 = vpop.f32.mrf.mxu0 }
 0x1e3   : > { %v1242_v0 = vsel %vm1241_vm0, %v1232_v63, -inf }
 0x1e4   : > { %1243 = vmax.xlane.f32.xlu0 %v1242_v0 }
 0x1e8   : > { %1246 = vmax.xlane.f32.xlu0 %v1245_v1 }
 0x26d   : > { %v1244_v2 = vpop.xlane.xlu0 %1243 }
 0x26e   : > { %v1248_v3 = vsub.f32 %v1232_v63, %v1244_v2 }
 0x270   : > { %v1250_v4 = vmul.f32 1.442695, %v1248_v3  ;;  %v1502_v3 = vld [vmem:[%s6037_s12 + $0x70] sm:$0xff] }
 0x271   : > { %v1247_v5 = vpop.xlane.xlu0 %1246  ;;  %4389 = vmatpush3.msra.mxu0 %v1502_v3  ;;  %v1712_v3 = vld [vmem:[%s6041_s16 + $0x100] sm:$0xff] }
 0x272   : > { %4668 = vpow2.f32 %v1250_v4  ;;  %v1249_v6 = vsub.f32 %v4331_v62, %v1247_v5  ;;  %4390 = vmatprep.subr.mxu0 %v4688_v36  ;;  %v1501_v4 = vld [vmem:[%s6037_s12 + $0x68] sm:$0xff]  ;;  %v1500_v5 = vld [vmem:[%s6037_s12 + $0x60] sm:$0xff] }
 0x273   : > { %4391 = vmatpush3.msra.mxu0 %v1501_v4  ;;  %v1705_v4 = vld [vmem:[%s6041_s16 + $0xc8] sm:$0xff] }
 0x274   : > { %v1252_v7 = vmul.f32 1.442695, %v1249_v6  ;;  %4392 = vmatprep.subr.mxu0 %v4688_v36  ;;  %v1499_v6 = vld [vmem:[%s6037_s12 + $0x58] sm:$0xff] }
 0x275   : > { %4393 = vmatpush3.msra.mxu0 %v1500_v5  ;;  %v1704_v5 = vld [vmem:[%s6041_s16 + $0xc0] sm:$0xff] }
 0x276   : > { %4670 = vpow2.f32 %v1252_v7  ;;  %4394 = vmatprep.subr.mxu0 %v4688_v36  ;;  %v1498_v7 = vld [vmem:[%s6037_s12 + $0x50] sm:$0xff] }
 0x277   : > { %4395 = vmatpush3.msra.mxu0 %v1499_v6  ;;  %v1697_v6 = vld [vmem:[%s6041_s16 + $0x88] sm:$0xff] }
 0x278   : > { %4396 = vmatprep.subr.mxu0 %v4688_v36 }
 0x279   : > { %4397 = vmatpush3.msra.mxu0 %v1498_v7  ;;  %v1696_v7 = vld [vmem:[%s6041_s16 + $0x80] sm:$0xff] }
 0x27a   : > { %4398 = vmatprep.subr.mxu0 %v4688_v36 }
 0x27f   : > { %v4669_v8 = vpop.eup %4668 }
 0x280   : > { %v1254_v10 = vsel %vm1241_vm0, %v4669_v8, 0.0 }
 0x281   : > { %1255 = vadd.xlane.f32.xlu1 %v1254_v10  ;;  %v1496_v10 = vld [vmem:[%s6037_s12 + $0x40] sm:$0xff] }
 0x283   : > { %v4671_v11 = vpop.eup %4670 }
 0x284   : > { %v1257_v12 = vsel %vm1241_vm0, %v4671_v11, 0.0 }
 0x285   : > { %1258 = vadd.xlane.f32.xlu1 %v1257_v12  ;;  %v1494_v12 = vld [vmem:[%s6037_s12 + $0x30] sm:$0xff] }
 0x30a   : > { %v1256_v14 = vpop.xlane.xlu1 %1255 }
 0x30b   : > { %4672 = vrcp.f32 %v1256_v14  ;;  %v1492_v14 = vld [vmem:[%s6037_s12 + $0x20] sm:$0xff] }
 0x30e   : > { %v1259_v15 = vpop.xlane.xlu1 %1258 }
 0x30f   : > { %4674 = vrcp.f32 %v1259_v15  ;;  %v1491_v15 = vld [vmem:[%s6037_s12 + $0x18] sm:$0xff] }
 0x318   : > { %v4673_v16 = vpop.eup %4672 }
 0x319   : > { %v1262_v17 = vmul.f32 %v4673_v16, %v4669_v8  ;;  %v1497_v8 = vld [vmem:[%s6037_s12 + $0x48] sm:$0xff]  ;;  %v1490_v16 = vld [vmem:[%s6037_s12 + $0x10] sm:$0xff] }
 0x31a   : > { %4399 = vmatpush3.msra.mxu0 %v1497_v8  ;;  %v1689_v8 = vld [vmem:[%s6041_s16 + $0x48] sm:$0xff] }
 0x31b   : > { %4348 = vmatprep.mubr.msk.f32.mxu1 %vm1241_vm0, %v1262_v17  ;;  %4400 = vmatprep.subr.mxu0 %v4688_v36  ;;  %v1489_v17 = vld [vmem:[%s6037_s12 + $0x8] sm:$0xff] }
 0x31c   : > { %v4675_v18 = vpop.eup %4674  ;;  %4401 = vmatpush3.msra.mxu0 %v1496_v10  ;;  %v1688_v10 = vld [vmem:[%s6041_s16 + $0x40] sm:$0xff] }
 0x31d   : > { %v1263_v19 = vmul.f32 %v4675_v18, %v4671_v11  ;;  %v1495_v11 = vld [vmem:[%s6037_s12 + $0x38] sm:$0xff]  ;;  %4402 = vmatprep.subr.mxu0 %v4688_v36  ;;  %v1488_v18 = vld [vmem:[%s6037_s12] sm:$0xff] }
 0x31e   : > { %4403 = vmatpush3.msra.mxu0 %v1495_v11  ;;  %v1681_v11 = vld [vmem:[%s6041_s16 + $0x8] sm:$0xff] }
 0x31f   : > { %4349 = vmatmul.mubr.msk.f32.vlgmr.msra.gmra.mxu1 %vm1241_vm0, %v1263_v19  ;;  %4404 = vmatprep.subr.mxu0 %v4688_v36 }
 0x320   : > { %4352 = vmatpush3.msra.mxu1 %v1360_v13  ;;  %v1493_v13 = vld [vmem:[%s6037_s12 + $0x28] sm:$0xff]  ;;  %4405 = vmatpush3.msra.mxu0 %v1494_v12  ;;  %v1680_v12 = vld [vmem:[%s6041_s16] sm:$0xff] }
 0x321   : > { %4353 = vmatprep.subr.mxu1 %v1359_v20  ;;  %4406 = vmatprep.subr.mxu0 %v4688_v36 }
 0x322   : > { %4354 = vmatpush3.msra.mxu1 %v1359_v20  ;;  %4407 = vmatpush3.msra.mxu0 %v1493_v13  ;;  %v1741_v13 = vld [vmem:[%s6041_s16 + $0x1e8] sm:$0xff] }
 0x323   : > { %4355 = vmatprep.subr.mxu1 %v1358_v21  ;;  %4408 = vmatprep.subr.mxu0 %v4688_v36 }
 0x324   : > { %4356 = vmatpush3.msra.mxu1 %v1358_v21  ;;  %4409 = vmatpush3.msra.mxu0 %v1492_v14  ;;  %v1743_v14 = vld [vmem:[%s6041_s16 + $0x1f8] sm:$0xff] }
 0x325   : > { %4357 = vmatprep.subr.mxu1 %v1357_v22  ;;  %4410 = vmatprep.subr.mxu0 %v4688_v36 }
 0x326   : > { %4358 = vmatpush3.msra.mxu1 %v1357_v22  ;;  %4411 = vmatpush3.msra.mxu0 %v1491_v15  ;;  %v1740_v15 = vld [vmem:[%s6041_s16 + $0x1e0] sm:$0xff] }
 0x327   : > { %4359 = vmatprep.subr.mxu1 %v1356_v23  ;;  %4412 = vmatprep.subr.mxu0 %v4688_v36 }
 0x328   : > { %4360 = vmatpush3.msra.mxu1 %v1356_v23  ;;  %4413 = vmatpush3.msra.mxu0 %v1490_v16  ;;  %v1742_v16 = vld [vmem:[%s6041_s16 + $0x1f0] sm:$0xff] }
 0x329   : > { %4361 = vmatprep.subr.mxu1 %v1355_v24  ;;  %4414 = vmatprep.subr.mxu0 %v4688_v36 }
 0x32a   : > { %4362 = vmatpush3.msra.mxu1 %v1355_v24  ;;  %4415 = vmatpush3.msra.mxu0 %v1489_v17 }
 0x32b   : > { %4363 = vmatprep.subr.mxu1 %v1354_v25  ;;  %4416 = vmatprep.subr.mxu0 %v4688_v36 }
 0x32c   : > { %4364 = vmatpush3.msra.mxu1 %v1354_v25  ;;  %4417 = vmatpush3.msra.mxu0 %v1488_v18  ;;  %v1733_v18 = vld [vmem:[%s6041_s16 + $0x1a8] sm:$0xff] }
 0x32d   : > { %4365 = vmatprep.subr.mxu1 %v1353_v26  ;;  %1834 = vmatprep.subr.mxu0 %v1739_v43  ;;  %v1693_v43 = vld [vmem:[%s6041_s16 + $0x68] sm:$0xff] }
 0x32e   : > { %4366 = vmatpush3.msra.mxu1 %v1353_v26  ;;  %v3818_v26 = vld [vmem:[%s6033_s8] ss:$0 sm:$0xff] }
 0x32f   : > { %4367 = vmatprep.subr.mxu1 %v1352_v27 }
 0x330   : > { %4368 = vmatpush3.msra.mxu1 %v1352_v27 }
 0x331   : > { %4369 = vmatprep.subr.mxu1 %v1351_v28 }
 0x332   : > { %4370 = vmatpush3.msra.mxu1 %v1351_v28 }
 0x333   : > { %4371 = vmatprep.subr.mxu1 %v1350_v30 }
 0x334   : > { %4372 = vmatpush3.msra.mxu1 %v1350_v30  ;;  %v3819_v30 = vld [vmem:[%s6034_s9] ss:$0 sm:$0xff] }
 0x335   : > { %4373 = vmatprep.subr.mxu1 %v1349_v31 }
 0x336   : > { %4374 = vmatpush3.msra.mxu1 %v1349_v31 }
 0x337   : > { %4375 = vmatprep.subr.mxu1 %v1348_v32 }
 0x338   : > { %4376 = vmatpush3.msra.mxu1 %v1348_v32 }
 0x339   : > { %4377 = vmatprep.subr.mxu1 %v1347_v33 }
 0x33a   : > { %4378 = vmatpush3.msra.mxu1 %v1347_v33 }
 0x33b   : > { %4379 = vmatprep.subr.mxu1 %v1346_v34 }
 0x33c   : > { %4380 = vmatpush3.msra.mxu1 %v1346_v34 }
 0x33d   : > { %4381 = vmatprep.subr.mxu1 %v1345_v35 }
 0x33e   : > { %4382 = vmatpush3.msra.mxu1 %v1345_v35 }
 0x33f   : > { %4421 = vmatprep.subr.mxu1 %v4688_v36 }
 0x3df   : > { %v4350_v39 = vpop.f32.mrf.mxu1 }
 0x3e1   : > { %v1336_v40 = vpop.f32.mrf.mxu1 }
 0x3e2   : > { %4383 = vmatprep.mubr.f32.mxu1 %v1336_v40 }
 0x3e3   : > { %4384 = vmatmul.mubr.f32.vlgmr.msra.gmra.mxu1 %v4350_v39 }
 0x3e4   : > { %4422 = vmatpush3.xpose.msk.msra.mxu1 %vm1582_vm1, %v1072_v42  ;;  %4437 = vmatprep.mubr.msk.f32.mxu1 %vm4689_vm2, %v4688_v36  ;;  %v1737_v42 = vld [vmem:[%s6041_s16 + $0x1c8] sm:$0xff] }
 0x3e5   : > { %4423 = vmatprep.subr.mxu1 %v4688_v36 }
 0x3e8   : > { %4424 = vmatpush3.xpose.msk.msra.mxu1 %vm1582_vm1, %v1071_v45  ;;  %v1731_v45 = vld [vmem:[%s6041_s16 + $0x198] sm:$0xff] }
 0x3e9   : > { %4425 = vmatprep.subr.mxu1 %v4688_v36 }
 0x3ec   : > { %4426 = vmatpush3.xpose.msk.msra.mxu1 %vm1582_vm1, %v1070_v44  ;;  %v1730_v44 = vld [vmem:[%s6041_s16 + $0x190] sm:$0xff] }
 0x3ed   : > { %4427 = vmatprep.subr.mxu1 %v4688_v36 }
 0x3f0   : > { %4428 = vmatpush3.xpose.msk.msra.mxu1 %vm1582_vm1, %v1069_v48  ;;  %v1715_v48 = vld [vmem:[%s6041_s16 + $0x118] sm:$0xff] }
 0x3f1   : > { %4429 = vmatprep.subr.mxu1 %v4688_v36 }
 0x3f4   : > { %4430 = vmatpush3.xpose.msk.msra.mxu1 %vm1582_vm1, %v1068_v49  ;;  %v1714_v49 = vld [vmem:[%s6041_s16 + $0x110] sm:$0xff] }
 0x3f5   : > { %4431 = vmatprep.subr.mxu1 %v4688_v36 }
 0x3f8   : > { %4432 = vmatpush3.xpose.msk.msra.mxu1 %vm1582_vm1, %v1067_v52  ;;  %v1699_v52 = vld [vmem:[%s6041_s16 + $0x98] sm:$0xff] }
 0x3f9   : > { %4433 = vmatprep.subr.mxu1 %v4688_v36 }
 0x3fc   : > { %4434 = vmatpush3.xpose.msk.msra.mxu1 %vm1582_vm1, %v1066_v53  ;;  %v1698_v53 = vld [vmem:[%s6041_s16 + $0x90] sm:$0xff] }
 0x3fd   : > { %4435 = vmatprep.subr.mxu1 %v4688_v36 }
 0x400   : > { %4436 = vmatpush3.xpose.msk.msra.mxu1 %vm1582_vm1, %v1065_v58  ;;  %v1690_v58 = vld [vmem:[%s6041_s16 + $0x50] sm:$0xff] }
 0x401   : > { %1763 = vmatprep.subr.mxu1 %v1737_v42  ;;  %v1702_v42 = vld [vmem:[%s6041_s16 + $0xb0] sm:$0xff] }
 0x4a3   : > { %v4385_v57 = vpop.f32.mrf.mxu1 }
 0x4a4   : > { %v1437_v59 = vadd.f32 %v4385_v57, %v5081_v29  ;;  %v1683_v57 = vld [vmem:[%s6041_s16 + $0x18] sm:$0xff] }
 0x4a5   : > { %v1427_v60 = vpop.f32.mrf.mxu1 }
 0x4a6   : > { %v1436_v54 = vadd.f32 %v1427_v60, %v5015_v9  ;;  %1440 = vadd.xlane.f32.xlu1 %v1437_v59  ;;  %v3820_v60 = vld [vmem:[%s6038_s13] ss:$0 sm:$0xff] }
 0x4a8   : > { %1438 = vadd.xlane.f32.xlu0 %v1436_v54 }
 0x52f   : > { %v1441_v55 = vpop.xlane.xlu1 %1440 }
 0x530   : > { %v1444_v62 = vmul.f32 0.0078125, %v1441_v55 }
 0x531   : > { %v1439_v63 = vpop.xlane.xlu0 %1438 }
 0x532   : > { %v5213_v0 = vsub.f32 %v1437_v59, %v1444_v62  ;;  %v1443_v1 = vmul.f32 0.0078125, %v1439_v63  ;;  %v1682_v59 = vld [vmem:[%s6041_s16 + $0x10] sm:$0xff]  ;;  %v1736_v63 = vld [vmem:[%s6041_s16 + $0x1c0] sm:$0xff] }
 0x534   : > { %v5215_v2 = vsub.f32 %v1436_v54, %v1443_v1  ;;  %v1448_v9 = vmul.f32 %v5213_v0, %v5213_v0  ;;  %v1728_v1 = vld [vmem:[%s6041_s16 + $0x180] sm:$0xff] }
 0x536   : > { %1451 = vadd.xlane.f32.xlu1 %v1448_v9  ;;  %v1447_v29 = vmul.f32 %v5215_v2, %v5215_v2  ;;  %v1720_v9 = vld [vmem:[%s6041_s16 + $0x140] sm:$0xff] }
 0x538   : > { %1449 = vadd.xlane.f32.xlu0 %v1447_v29  ;;  %v1713_v29 = vld [vmem:[%s6041_s16 + $0x108] sm:$0xff] }
 0x5bf   : > { %v1452_v19 = vpop.xlane.xlu1 %1451 }
 0x5c0   : > { %v1454_v20 = vmul.f32 0.0078125, %v1452_v19  ;;  %v1735_v19 = vld [vmem:[%s6041_s16 + $0x1b8] sm:$0xff] }
 0x5c1   : > { %v1450_v21 = vpop.xlane.xlu0 %1449 }
 0x5c2   : > { %v1456_v22 = vadd.f32 1e-06, %v1454_v20  ;;  %v1453_v23 = vmul.f32 0.0078125, %v1450_v21  ;;  %v1732_v20 = vld [vmem:[%s6041_s16 + $0x1a0] sm:$0xff]  ;;  %v1734_v21 = vld [vmem:[%s6041_s16 + $0x1b0] sm:$0xff] }
 0x5c4   : > { %4676 = vrsqrt.f32 %v1456_v22  ;;  %v1455_v24 = vadd.f32 1e-06, %v1453_v23  ;;  %v1725_v23 = vld [vmem:[%s6041_s16 + $0x168] sm:$0xff] }
 0x5c6   : > { %4678 = vrsqrt.f32 %v1455_v24  ;;  %v1727_v24 = vld [vmem:[%s6041_s16 + $0x178] sm:$0xff] }
 0x5d1   : > { %v4677_v25 = vpop.eup %4676 }
 0x5d2   : > { %v1460_v27 = vmul.f32 %v4677_v25, %v5213_v0  ;;  %v1729_v0 = vld [vmem:[%s6041_s16 + $0x188] sm:$0xff]  ;;  %v1724_v25 = vld [vmem:[%s6041_s16 + $0x160] sm:$0xff] }
 0x5d3   : > { %v4679_v28 = vpop.eup %4678 }
 0x5d4   : > { %v1459_v31 = vmul.f32 %v4679_v28, %v5215_v2  ;;  %v1469_v32 = vmul.f32 %v3818_v26, %v1460_v27  ;;  %v1721_v2 = vld [vmem:[%s6041_s16 + $0x148] sm:$0xff]  ;;  %v1719_v28 = vld [vmem:[%s6041_s16 + $0x138] sm:$0xff] }
 0x5d5   : > { %v1717_v27 = vld [vmem:[%s6041_s16 + $0x128] sm:$0xff] }
 0x5d6   : > { %v1468_v33 = vmul.f32 %v3818_v26, %v1459_v31  ;;  %v1478_v34 = vadd.f32 %v3819_v30, %v1469_v32  ;;  %v1726_v26 = vld [vmem:[%s6041_s16 + $0x170] sm:$0xff]  ;;  %v1709_v32 = vld [vmem:[%s6041_s16 + $0xe8] sm:$0xff] }
 0x5d7   : > { %v1718_v31 = vld [vmem:[%s6041_s16 + $0x130] sm:$0xff] }
 0x5d8   : > { %v1477_v35 = vadd.f32 %v3819_v30, %v1468_v33  ;;  %v1480_v37 = vrot.slane %v1478_v34, 7  ;;  %v1716_v30 = vld [vmem:[%s6041_s16 + $0x120] sm:$0xff]  ;;  %v1711_v33 = vld [vmem:[%s6041_s16 + $0xf8] sm:$0xff] }
 0x5da   : > { %v1485_v38 = vrot.slane %v1477_v35, 1  ;;  %v5292_v39 = vsel %vm1482_vm3, %v1477_v35, %v1480_v37  ;;  %v1710_v35 = vld [vmem:[%s6041_s16 + $0xf0] sm:$0xff]  ;;  %v1701_v37 = vld [vmem:[%s6041_s16 + $0xa8] sm:$0xff] }
 0x5dc   : > { %v1487_v40 = vsel %vm1482_vm3, %v1485_v38, %v1478_v34  ;;  %v1708_v34 = vld [vmem:[%s6041_s16 + $0xe0] sm:$0xff]  ;;  %v1703_v38 = vld [vmem:[%s6041_s16 + $0xb8] sm:$0xff] }
 0x5dd   : > { %4419 = vmatmul.mubr.f32.vlgmr.msra.gmra.mxu0 %v1487_v40  ;;  %v1700_v40 = vld [vmem:[%s6041_s16 + $0xa0] sm:$0xff] }
 0x5de   : > { %1882 = vmatprep.mubr.f32.mxu0 %v4688_v36  ;;  %1835 = vmatpush1.msra.mxu0 %v1738_v41  ;;  %v1695_v41 = vld [vmem:[%s6041_s16 + $0x78] sm:$0xff] }
 0x5df   : > { %1836 = vmatprep.subr.mxu0 %v1731_v45  ;;  %v1692_v45 = vld [vmem:[%s6041_s16 + $0x60] sm:$0xff] }
 0x5e0   : > { %1837 = vmatpush1.msra.mxu0 %v1730_v44  ;;  %v1694_v44 = vld [vmem:[%s6041_s16 + $0x70] sm:$0xff] }
 0x5e1   : > { %1838 = vmatprep.subr.mxu0 %v1723_v46  ;;  %v1685_v46 = vld [vmem:[%s6041_s16 + $0x28] sm:$0xff] }
 0x5e2   : > { %1839 = vmatpush1.msra.mxu0 %v1722_v47  ;;  %v1687_v47 = vld [vmem:[%s6041_s16 + $0x38] sm:$0xff] }
 0x5e3   : > { %1840 = vmatprep.subr.mxu0 %v1715_v48  ;;  %v1684_v48 = vld [vmem:[%s6041_s16 + $0x20] sm:$0xff] }
 0x5e4   : > { %1841 = vmatpush1.msra.mxu0 %v1714_v49  ;;  %v1686_v49 = vld [vmem:[%s6041_s16 + $0x30] sm:$0xff] }
 0x5e5   : > { %1842 = vmatprep.subr.mxu0 %v1707_v50  ;;  %v4490_v50 = vld [vmem:[%s6042_s17 + $0x2d4] ss:$120 sps:$4 sm:$0xff]  }
 0x5e6   : > { %1843 = vmatpush1.msra.mxu0 %v1706_v51  ;;  %v4493_v51 = vld [vmem:[%s6042_s17 + $0x2dc] ss:$120 sps:$4 sm:$0xff]  }
 0x5e7   : > { %1844 = vmatprep.subr.mxu0 %v1699_v52  ;;  %v4488_v52 = vld [vmem:[%s6042_s17 + $0x2d0] ss:$120 sps:$4 sm:$0xff]  }
 0x5e8   : > { %1845 = vmatpush1.msra.mxu0 %v1698_v53  ;;  %v4491_v53 = vld [vmem:[%s6042_s17 + $0x2d8] ss:$120 sps:$4 sm:$0xff]  }
 0x5e9   : > { %1846 = vmatprep.subr.mxu0 %v1691_v56  ;;  %v4496_v56 = vld [vmem:[%s6042_s17 + $0x1e4] ss:$120 sps:$4 sm:$0xff]  }
 0x5ea   : > { %1847 = vmatpush1.msra.mxu0 %v1690_v58  ;;  %v4499_v58 = vld [vmem:[%s6042_s17 + $0x1ec] ss:$120 sps:$4 sm:$0xff]  }
 0x5eb   : > { %1848 = vmatprep.subr.mxu0 %v1683_v57  ;;  %v4494_v57 = vld [vmem:[%s6042_s17 + $0x1e0] ss:$120 sps:$4 sm:$0xff]  }
 0x5ec   : > { %1849 = vmatpush1.msra.mxu0 %v1682_v59  ;;  %v4497_v59 = vld [vmem:[%s6042_s17 + $0x1e8] ss:$120 sps:$4 sm:$0xff]  }
 0x5ed   : > { %1976 = vmatprep.subr.mxu0 %v1743_v14  ;;  %v4527_v14 = vld [vmem:[%s6042_s17 + $0x108] ss:$120 sps:$4 sm:$0xff]  }
 0x69d   : > { %v1577_v54 = vpop.f32.mrf.mxu0 }
 0x69e   : > { %v1578_v61 = vadd.f32 %v3820_v60, %v1577_v54  ;;  %v4502_v60 = vld [vmem:[%s6042_s17 + $0xf4] ss:$120 sps:$4 sm:$0xff]  }
 0x69f   : > { %v4420_v55 = vpop.f32.mrf.mxu0  ;;  %v4505_v54 = vld [vmem:[%s6042_s17 + $0xfc] ss:$120 sps:$4 sm:$0xff]  }
 0x6a0   : > { %v1581_v62 = vmax.f32 %v1578_v61, 0.0  ;;  %v4690_v61 = vmov 0   ;;  %v4500_v55 = vld [vmem:[%s6042_s17 + $0xf0] ss:$120 sps:$4 sm:$0xff]  }
 0x6a2   : > { %4438 = vmatmul.mubr.msk.f32.vlgmr.msra.gmra.mxu1 %vm1582_vm1, %v1581_v62  ;;  %v4503_v62 = vld [vmem:[%s6042_s17 + $0xf8] ss:$120 sps:$4 sm:$0xff]  }
 0x6a3   : > { %1764 = vmatpush1.msra.mxu1 %v1736_v63  ;;  %1811 = vmatprep.mubr.f32.mxu1 %v4688_v36  ;;  %v4508_v63 = vld [vmem:[%s6042_s17 + $0x4] ss:$120 sps:$4 sm:$0xff]  }
 0x6a4   : > { %1765 = vmatprep.subr.mxu1 %v1729_v0  ;;  %v4511_v0 = vld [vmem:[%s6042_s17 + $0xc] ss:$120 sps:$4 sm:$0xff]  }
 0x6a5   : > { %1766 = vmatpush1.msra.mxu1 %v1728_v1  ;;  %v4506_v1 = vld [vmem:[%s6042_s17] ss:$120 sps:$4 sm:$0xff]  }
 0x6a6   : > { %1767 = vmatprep.subr.mxu1 %v1721_v2  ;;  %v4509_v2 = vld [vmem:[%s6042_s17 + $0x8] ss:$120 sps:$4 sm:$0xff]  }
 0x6a7   : > { %1768 = vmatpush1.msra.mxu1 %v1720_v9  ;;  %v4514_v9 = vld [vmem:[%s6042_s17 + $0x2e4] ss:$120 sps:$4 sm:$0xff]  }
 0x6a8   : > { %1769 = vmatprep.subr.mxu1 %v1713_v29  ;;  %v4517_v29 = vld [vmem:[%s6042_s17 + $0x2ec] ss:$120 sps:$4 sm:$0xff]  }
 0x6a9   : > { %1770 = vmatpush1.msra.mxu1 %v1712_v3  ;;  %v4512_v3 = vld [vmem:[%s6042_s17 + $0x2e0] ss:$120 sps:$4 sm:$0xff]  }
 0x6aa   : > { %1771 = vmatprep.subr.mxu1 %v1705_v4  ;;  %v4515_v4 = vld [vmem:[%s6042_s17 + $0x2e8] ss:$120 sps:$4 sm:$0xff]  }
 0x6ab   : > { %1772 = vmatpush1.msra.mxu1 %v1704_v5 }
 0x6ac   : > { %1773 = vmatprep.subr.mxu1 %v1697_v6  ;;  %v4520_v6 = vld [vmem:[%s6042_s17 + $0x1f4] ss:$120 sps:$4 sm:$0xff]  }
 0x6ad   : > { %1774 = vmatpush1.msra.mxu1 %v1696_v7  ;;  %v4523_v7 = vld [vmem:[%s6042_s17 + $0x1fc] ss:$120 sps:$4 sm:$0xff]  }
 0x6ae   : > { %1775 = vmatprep.subr.mxu1 %v1689_v8  ;;  %v4518_v8 = vld [vmem:[%s6042_s17 + $0x1f0] ss:$120 sps:$4 sm:$0xff]  }
 0x6af   : > { %1776 = vmatpush1.msra.mxu1 %v1688_v10  ;;  %v4521_v10 = vld [vmem:[%s6042_s17 + $0x1f8] ss:$120 sps:$4 sm:$0xff]  }
 0x6b0   : > { %1777 = vmatprep.subr.mxu1 %v1681_v11  ;;  %v4526_v11 = vld [vmem:[%s6042_s17 + $0x104] ss:$120 sps:$4 sm:$0xff]  }
 0x6b1   : > { %1778 = vmatpush1.msra.mxu1 %v1680_v12  ;;  %v4529_v12 = vld [vmem:[%s6042_s17 + $0x10c] ss:$120 sps:$4 sm:$0xff]  }
 0x6b2   : > { %1905 = vmatprep.subr.mxu1 %v1741_v13  ;;  %v4524_v13 = vld [vmem:[%s6042_s17 + $0x100] ss:$120 sps:$4 sm:$0xff]  }
 0x762   : > { %v5408_v17 = vpop.f32.mrf.mxu1 }
 0x763   : > { %3830 = vmatmul.mubr.msk.f32.vlgmr.msra.gmra.mxu1 %vm1241_vm0, %v5408_v17  ;;  %3831 = vmatmul.mubr.msk.f32.vlgmr.msra.gmra.mxu0 %vm1241_vm0, %v5408_v17  ;;  %v5568_v5 = vpack.c.bf16 %v5408_v17, %v5408_v17 }
 0x764   : > { %1906 = vmatpush1.msra.mxu1 %v1740_v15  ;;  %1977 = vmatpush1.msra.mxu0 %v1742_v16  ;;  %v4439_v22 = vpop.f32.mrf.mxu1  ;;  %v4532_v15 = vld [vmem:[%s6042_s17 + $0x14] ss:$120 sps:$4 sm:$0xff]  }
 0x765   : > { %1907 = vmatprep.subr.mxu1 %v1733_v18  ;;  %1978 = vmatprep.subr.mxu0 %v1735_v19  ;;  %v4535_v16 = vld [vmem:[%s6042_s17 + $0x1c] ss:$120 sps:$4 sm:$0xff]   ;;  %v4533_v18 = vld [vmem:[%s6042_s17 + $0x18] ss:$120 sps:$4 sm:$0xff]  }
 0x766   : > { %1908 = vmatpush1.msra.mxu1 %v1732_v20  ;;  %1979 = vmatpush1.msra.mxu0 %v1734_v21  ;;  %v4538_v19 = vld [vmem:[%s6042_s17 + $0x2f4] ss:$120 sps:$4 sm:$0xff]   ;;  %v4536_v21 = vld [vmem:[%s6042_s17 + $0x2f0] ss:$120 sps:$4 sm:$0xff]  }
 0x767   : > { %1909 = vmatprep.subr.mxu1 %v1725_v23  ;;  %1980 = vmatprep.subr.mxu0 %v1727_v24  ;;  %v4541_v20 = vld [vmem:[%s6042_s17 + $0x2fc] ss:$120 sps:$4 sm:$0xff]   ;;  %v4539_v22 = vld [vmem:[%s6042_s17 + $0x2f8] ss:$120 sps:$4 sm:$0xff]   ;;  %v4547_v24 = vld [vmem:[%s6042_s17 + $0x20c] ss:$120 sps:$4 sm:$0xff]  }
 0x768   : > { %1910 = vmatpush1.msra.mxu1 %v1724_v25  ;;  %1981 = vmatpush1.msra.mxu0 %v1726_v26  ;;  %v4544_v23 = vld [vmem:[%s6042_s17 + $0x204] ss:$120 sps:$4 sm:$0xff]   ;;  %v4542_v25 = vld [vmem:[%s6042_s17 + $0x200] ss:$120 sps:$4 sm:$0xff]  }
 0x769   : > { %1911 = vmatprep.subr.mxu1 %v1717_v27  ;;  %1982 = vmatprep.subr.mxu0 %v1719_v28  ;;  %v4545_v26 = vld [vmem:[%s6042_s17 + $0x208] ss:$120 sps:$4 sm:$0xff]   ;;  %v4550_v27 = vld [vmem:[%s6042_s17 + $0x114] ss:$120 sps:$4 sm:$0xff]  }
 0x76a   : > { %1912 = vmatpush1.msra.mxu1 %v1716_v30  ;;  %1983 = vmatpush1.msra.mxu0 %v1718_v31  ;;  %v4553_v28 = vld [vmem:[%s6042_s17 + $0x11c] ss:$120 sps:$4 sm:$0xff]   ;;  %v4548_v30 = vld [vmem:[%s6042_s17 + $0x110] ss:$120 sps:$4 sm:$0xff]  }
 0x76b   : > { %1913 = vmatprep.subr.mxu1 %v1709_v32  ;;  %1984 = vmatprep.subr.mxu0 %v1711_v33  ;;  %v4551_v31 = vld [vmem:[%s6042_s17 + $0x118] ss:$120 sps:$4 sm:$0xff]   ;;  %v4556_v32 = vld [vmem:[%s6042_s17 + $0x24] ss:$120 sps:$4 sm:$0xff]  }
 0x76c   : > { %1914 = vmatpush1.msra.mxu1 %v1708_v34  ;;  %1985 = vmatpush1.msra.mxu0 %v1710_v35  ;;  %v4559_v33 = vld [vmem:[%s6042_s17 + $0x2c] ss:$120 sps:$4 sm:$0xff]   ;;  %v4554_v34 = vld [vmem:[%s6042_s17 + $0x20] ss:$120 sps:$4 sm:$0xff]  }
 0x76d   : > { %1915 = vmatprep.subr.mxu1 %v1701_v37  ;;  %1986 = vmatprep.subr.mxu0 %v1703_v38  ;;  %v4557_v35 = vld [vmem:[%s6042_s17 + $0x28] ss:$120 sps:$4 sm:$0xff]   ;;  %v4562_v37 = vld [vmem:[%s6042_s17 + $0x304] ss:$120 sps:$4 sm:$0xff]  }
 0x76e   : > { %1916 = vmatpush1.msra.mxu1 %v1700_v40  ;;  %1987 = vmatpush1.msra.mxu0 %v1702_v42  ;;  %v4565_v38 = vld [vmem:[%s6042_s17 + $0x30c] ss:$120 sps:$4 sm:$0xff]   ;;  %v4560_v40 = vld [vmem:[%s6042_s17 + $0x300] ss:$120 sps:$4 sm:$0xff]  }
 0x76f   : > { %1917 = vmatprep.subr.mxu1 %v1693_v43  ;;  %1988 = vmatprep.subr.mxu0 %v1695_v41  ;;  %v4563_v42 = vld [vmem:[%s6042_s17 + $0x308] ss:$120 sps:$4 sm:$0xff]   ;;  %v4568_v43 = vld [vmem:[%s6042_s17 + $0x214] ss:$120 sps:$4 sm:$0xff]  }
 0x770   : > { %1918 = vmatpush1.msra.mxu1 %v1692_v45  ;;  %1989 = vmatpush1.msra.mxu0 %v1694_v44  ;;  %v4571_v41 = vld [vmem:[%s6042_s17 + $0x21c] ss:$120 sps:$4 sm:$0xff]   ;;  %v4566_v45 = vld [vmem:[%s6042_s17 + $0x210] ss:$120 sps:$4 sm:$0xff]  }
 0x771   : > { %1919 = vmatprep.subr.mxu1 %v1685_v46  ;;  %1990 = vmatprep.subr.mxu0 %v1687_v47  ;;  %v4569_v44 = vld [vmem:[%s6042_s17 + $0x218] ss:$120 sps:$4 sm:$0xff]   ;;  %v4574_v46 = vld [vmem:[%s6042_s17 + $0x124] ss:$120 sps:$4 sm:$0xff]  }
 0x772   : > { %1920 = vmatpush1.msra.mxu1 %v1684_v48  ;;  %1953 = vmatprep.mubr.f32.mxu1 %v4688_v36  ;;  %v4577_v47 = vld [vmem:[%s6042_s17 + $0x12c] ss:$120 sps:$4 sm:$0xff]   ;;  %v4572_v48 = vld [vmem:[%s6042_s17 + $0x120] ss:$120 sps:$4 sm:$0xff]  }
 0x773   : > { %1991 = vmatpush1.msra.mxu0 %v1686_v49  ;;  %2024 = vmatprep.mubr.f32.mxu0 %v4688_v36  ;;  %v4575_v49 = vld [vmem:[%s6042_s17 + $0x128] ss:$120 sps:$4 sm:$0xff]  }
 0x774   : > { %3832 = vmatmul.mubr.msk.f32.vlgmr.msra.gmra.mxu1 %vm1241_vm0, %v5408_v17  ;;  %3833 = vmatmul.mubr.msk.f32.vlgmr.msra.gmra.mxu0 %vm1241_vm0, %v5408_v17  ;;  %v4530_v17 = vld [vmem:[%s6042_s17 + $0x10] ss:$120 sps:$4 sm:$0xff]  }
 0x775   : > { %2763 = vmatprep.subr.bf16.mxu1 %v4490_v50  ;;  %2804 = vmatprep.subr.bf16.mxu0 %v4493_v51  ;;  %v4580_v50 = vld [vmem:[%s6042_s17 + $0x34] ss:$120 sps:$4 sm:$0xff]  }
 0x776   : > { %2764 = vmatpush1.bf16.msra.mxu1 %v4488_v52  ;;  %2805 = vmatpush1.bf16.msra.mxu0 %v4491_v53  ;;  %v4583_v51 = vld [vmem:[%s6042_s17 + $0x3c] ss:$120 sps:$4 sm:$0xff]   ;;  %v4578_v52 = vld [vmem:[%s6042_s17 + $0x30] ss:$120 sps:$4 sm:$0xff]  }
 0x777   : > { %2765 = vmatprep.subr.bf16.mxu1 %v4496_v56  ;;  %2806 = vmatprep.subr.bf16.mxu0 %v4499_v58  ;;  %v4581_v53 = vld [vmem:[%s6042_s17 + $0x38] ss:$120 sps:$4 sm:$0xff]   ;;  %v4586_v56 = vld [vmem:[%s6042_s17 + $0x314] ss:$120 sps:$4 sm:$0xff]  }
 0x778   : > { %2787 = vmatprep.mubr.bf16.mxu1 %v4690_v61  ;;  %2828 = vmatprep.mubr.bf16.mxu0 %v4690_v61  ;;  %v4589_v58 = vld [vmem:[%s6042_s17 + $0x31c] ss:$120 sps:$4 sm:$0xff]  }
 0x77a   : > { %2766 = vmatpush1.bf16.msra.mxu1 %v4494_v57  ;;  %2807 = vmatpush1.bf16.msra.mxu0 %v4497_v59  ;;  %v4584_v57 = vld [vmem:[%s6042_s17 + $0x310] ss:$120 sps:$4 sm:$0xff]  }
 0x77b   : > { %2767 = vmatprep.subr.bf16.mxu1 %v4502_v60  ;;  %2808 = vmatprep.subr.bf16.mxu0 %v4505_v54  ;;  %v4587_v59 = vld [vmem:[%s6042_s17 + $0x318] ss:$120 sps:$4 sm:$0xff]   ;;  %v4592_v60 = vld [vmem:[%s6042_s17 + $0x224] ss:$120 sps:$4 sm:$0xff]  }
 0x77c   : > { %v4595_v54 = vld [vmem:[%s6042_s17 + $0x22c] ss:$120 sps:$4 sm:$0xff]  }
 0x77e   : > { %2768 = vmatpush1.bf16.msra.mxu1 %v4500_v55  ;;  %2809 = vmatpush1.bf16.msra.mxu0 %v4503_v62  ;;  %v4590_v55 = vld [vmem:[%s6042_s17 + $0x220] ss:$120 sps:$4 sm:$0xff]  }
 0x77f   : > { %2769 = vmatprep.subr.bf16.mxu1 %v4508_v63  ;;  %2810 = vmatprep.subr.bf16.mxu0 %v4511_v0  ;;  %v4593_v62 = vld [vmem:[%s6042_s17 + $0x228] ss:$120 sps:$4 sm:$0xff]   ;;  %v4598_v63 = vld [vmem:[%s6042_s17 + $0x134] ss:$120 sps:$4 sm:$0xff]  }
 0x780   : > { %v4601_v0 = vld [vmem:[%s6042_s17 + $0x13c] ss:$120 sps:$4 sm:$0xff]  }
 0x782   : > { %2770 = vmatpush1.bf16.msra.mxu1 %v4506_v1  ;;  %2811 = vmatpush1.bf16.msra.mxu0 %v4509_v2  ;;  %v4596_v1 = vld [vmem:[%s6042_s17 + $0x130] ss:$120 sps:$4 sm:$0xff]  }
 0x783   : > { %2845 = vmatprep.subr.bf16.mxu1 %v4514_v9  ;;  %2886 = vmatprep.subr.bf16.mxu0 %v4517_v29  ;;  %v4599_v2 = vld [vmem:[%s6042_s17 + $0x138] ss:$120 sps:$4 sm:$0xff]   ;;  %v4604_v9 = vld [vmem:[%s6042_s17 + $0x44] ss:$120 sps:$4 sm:$0xff]  }
 0x784   : > { %v4607_v29 = vld [vmem:[%s6042_s17 + $0x4c] ss:$120 sps:$4 sm:$0xff]  }
 0x785   : > { %3954 = vmatmul.mubr.msk.bf16.vlgmr.msra.gmra.mxu1 %vm1241_vm0, %v5568_v5  ;;  %3955 = vmatmul.mubr.msk.bf16.vlgmr.msra.gmra.mxu0 %vm1241_vm0, %v5568_v5 }
 0x786   : > { %2846 = vmatpush1.bf16.msra.mxu1 %v4512_v3  ;;  %2887 = vmatpush1.bf16.msra.mxu0 %v4515_v4  ;;  %v4602_v3 = vld [vmem:[%s6042_s17 + $0x40] ss:$120 sps:$4 sm:$0xff]  }
 0x787   : > { %2847 = vmatprep.subr.bf16.mxu1 %v4520_v6  ;;  %2888 = vmatprep.subr.bf16.mxu0 %v4523_v7  ;;  %v4605_v4 = vld [vmem:[%s6042_s17 + $0x48] ss:$120 sps:$4 sm:$0xff]   ;;  %v4610_v6 = vld [vmem:[%s6042_s17 + $0x324] ss:$120 sps:$4 sm:$0xff]  }
 0x788   : > { %2869 = vmatprep.mubr.bf16.mxu1 %v4690_v61  ;;  %2910 = vmatprep.mubr.bf16.mxu0 %v4690_v61  ;;  %v4613_v7 = vld [vmem:[%s6042_s17 + $0x32c] ss:$120 sps:$4 sm:$0xff]  }
 0x78a   : > { %2848 = vmatpush1.bf16.msra.mxu1 %v4518_v8  ;;  %2889 = vmatpush1.bf16.msra.mxu0 %v4521_v10  ;;  %v4608_v8 = vld [vmem:[%s6042_s17 + $0x320] ss:$120 sps:$4 sm:$0xff]  }
 0x78b   : > { %2849 = vmatprep.subr.bf16.mxu1 %v4526_v11  ;;  %2890 = vmatprep.subr.bf16.mxu0 %v4529_v12  ;;  %v4611_v10 = vld [vmem:[%s6042_s17 + $0x328] ss:$120 sps:$4 sm:$0xff]   ;;  %v4616_v11 = vld [vmem:[%s6042_s17 + $0x234] ss:$120 sps:$4 sm:$0xff]  }
 0x78c   : > { %v4619_v12 = vld [vmem:[%s6042_s17 + $0x23c] ss:$120 sps:$4 sm:$0xff]  }
 0x78e   : > { %2850 = vmatpush1.bf16.msra.mxu1 %v4524_v13  ;;  %2891 = vmatpush1.bf16.msra.mxu0 %v4527_v14  ;;  %v4614_v13 = vld [vmem:[%s6042_s17 + $0x230] ss:$120 sps:$4 sm:$0xff]  }
 0x78f   : > { %2851 = vmatprep.subr.bf16.mxu1 %v4532_v15  ;;  %2892 = vmatprep.subr.bf16.mxu0 %v4535_v16  ;;  %v4617_v14 = vld [vmem:[%s6042_s17 + $0x238] ss:$120 sps:$4 sm:$0xff]   ;;  %v4622_v15 = vld [vmem:[%s6042_s17 + $0x144] ss:$120 sps:$4 sm:$0xff]  }
 0x790   : > { %v4625_v16 = vld [vmem:[%s6042_s17 + $0x14c] ss:$120 sps:$4 sm:$0xff]  }
 0x792   : > { %2852 = vmatpush1.bf16.msra.mxu1 %v4530_v17  ;;  %2893 = vmatpush1.bf16.msra.mxu0 %v4533_v18  ;;  %v4620_v17 = vld [vmem:[%s6042_s17 + $0x140] ss:$120 sps:$4 sm:$0xff]  }
 0x793   : > { %2927 = vmatprep.subr.bf16.mxu1 %v4538_v19  ;;  %2968 = vmatprep.subr.bf16.mxu0 %v4541_v20  ;;  %v4623_v18 = vld [vmem:[%s6042_s17 + $0x148] ss:$120 sps:$4 sm:$0xff]   ;;  %v4628_v19 = vld [vmem:[%s6042_s17 + $0x54] ss:$120 sps:$4 sm:$0xff]  }
 0x794   : > { %v4631_v20 = vld [vmem:[%s6042_s17 + $0x5c] ss:$120 sps:$4 sm:$0xff]  }
 0x795   : > { %3956 = vmatmul.mubr.msk.bf16.vlgmr.msra.gmra.mxu1 %vm1241_vm0, %v5568_v5  ;;  %3957 = vmatmul.mubr.msk.bf16.vlgmr.msra.gmra.mxu0 %vm1241_vm0, %v5568_v5 }
 0x796   : > { %2928 = vmatpush1.bf16.msra.mxu1 %v4536_v21  ;;  %2969 = vmatpush1.bf16.msra.mxu0 %v4539_v22  ;;  %v4626_v21 = vld [vmem:[%s6042_s17 + $0x50] ss:$120 sps:$4 sm:$0xff]  }
 0x797   : > { %2929 = vmatprep.subr.bf16.mxu1 %v4544_v23  ;;  %2970 = vmatprep.subr.bf16.mxu0 %v4547_v24  ;;  %v4629_v22 = vld [vmem:[%s6042_s17 + $0x58] ss:$120 sps:$4 sm:$0xff]   ;;  %v4634_v23 = vld [vmem:[%s6042_s17 + $0x334] ss:$120 sps:$4 sm:$0xff]  }
 0x798   : > { %2951 = vmatprep.mubr.bf16.mxu1 %v4690_v61  ;;  %2992 = vmatprep.mubr.bf16.mxu0 %v4690_v61  ;;  %v4637_v24 = vld [vmem:[%s6042_s17 + $0x33c] ss:$120 sps:$4 sm:$0xff]  }
 0x79a   : > { %2930 = vmatpush1.bf16.msra.mxu1 %v4542_v25  ;;  %2971 = vmatpush1.bf16.msra.mxu0 %v4545_v26  ;;  %v4632_v25 = vld [vmem:[%s6042_s17 + $0x330] ss:$120 sps:$4 sm:$0xff]  }
 0x79b   : > { %2931 = vmatprep.subr.bf16.mxu1 %v4550_v27  ;;  %2972 = vmatprep.subr.bf16.mxu0 %v4553_v28  ;;  %v4635_v26 = vld [vmem:[%s6042_s17 + $0x338] ss:$120 sps:$4 sm:$0xff]   ;;  %v4640_v27 = vld [vmem:[%s6042_s17 + $0x244] ss:$120 sps:$4 sm:$0xff]  }
 0x79c   : > { %v4643_v28 = vld [vmem:[%s6042_s17 + $0x24c] ss:$120 sps:$4 sm:$0xff]  }
 0x79e   : > { %2932 = vmatpush1.bf16.msra.mxu1 %v4548_v30  ;;  %2973 = vmatpush1.bf16.msra.mxu0 %v4551_v31  ;;  %v4638_v30 = vld [vmem:[%s6042_s17 + $0x240] ss:$120 sps:$4 sm:$0xff]  }
 0x79f   : > { %2933 = vmatprep.subr.bf16.mxu1 %v4556_v32  ;;  %2974 = vmatprep.subr.bf16.mxu0 %v4559_v33  ;;  %v4641_v31 = vld [vmem:[%s6042_s17 + $0x248] ss:$120 sps:$4 sm:$0xff]   ;;  %v4646_v32 = vld [vmem:[%s6042_s17 + $0x154] ss:$120 sps:$4 sm:$0xff]  }
 0x7a0   : > { %v4649_v33 = vld [vmem:[%s6042_s17 + $0x15c] ss:$120 sps:$4 sm:$0xff]  }
 0x7a2   : > { %2934 = vmatpush1.bf16.msra.mxu1 %v4554_v34  ;;  %2975 = vmatpush1.bf16.msra.mxu0 %v4557_v35  ;;  %v4644_v34 = vld [vmem:[%s6042_s17 + $0x150] ss:$120 sps:$4 sm:$0xff]  }
 0x7a3   : > { %3009 = vmatprep.subr.bf16.mxu1 %v4562_v37  ;;  %3050 = vmatprep.subr.bf16.mxu0 %v4565_v38  ;;  %v4647_v35 = vld [vmem:[%s6042_s17 + $0x158] ss:$120 sps:$4 sm:$0xff]   ;;  %v4652_v37 = vld [vmem:[%s6042_s17 + $0x64] ss:$120 sps:$4 sm:$0xff]  }
 0x7a4   : > { %v4655_v38 = vld [vmem:[%s6042_s17 + $0x6c] ss:$120 sps:$4 sm:$0xff]  }
 0x7a5   : > { %3958 = vmatmul.mubr.msk.bf16.vlgmr.msra.gmra.mxu1 %vm1241_vm0, %v5568_v5  ;;  %3959 = vmatmul.mubr.msk.bf16.vlgmr.msra.gmra.mxu0 %vm1241_vm0, %v5568_v5 }
 0x7a6   : > { %3010 = vmatpush1.bf16.msra.mxu1 %v4560_v40  ;;  %3051 = vmatpush1.bf16.msra.mxu0 %v4563_v42  ;;  %v4650_v40 = vld [vmem:[%s6042_s17 + $0x60] ss:$120 sps:$4 sm:$0xff]  }
 0x7a7   : > { %3011 = vmatprep.subr.bf16.mxu1 %v4568_v43  ;;  %3052 = vmatprep.subr.bf16.mxu0 %v4571_v41  ;;  %v4653_v42 = vld [vmem:[%s6042_s17 + $0x68] ss:$120 sps:$4 sm:$0xff]   ;;  %v4658_v43 = vld [vmem:[%s6042_s17 + $0x344] ss:$120 sps:$4 sm:$0xff]  }
 0x7a8   : > { %3033 = vmatprep.mubr.bf16.mxu1 %v4690_v61  ;;  %3074 = vmatprep.mubr.bf16.mxu0 %v4690_v61  ;;  %v4656_v41 = vld [vmem:[%s6042_s17 + $0x340] ss:$120 sps:$4 sm:$0xff]  }
 0x7aa   : > { %3012 = vmatpush1.bf16.msra.mxu1 %v4566_v45  ;;  %3053 = vmatpush1.bf16.msra.mxu0 %v4569_v44  ;;  %v3385_v45 = vld [vmem:[%s6039_s14 + $0x78] sm:$0xff]  ;;  %v4661_v44 = vld [vmem:[%s6042_s17 + $0x254] ss:$120 sps:$4 sm:$0xff]  }
 0x7ab   : > { %3013 = vmatprep.subr.bf16.mxu1 %v4574_v46  ;;  %3054 = vmatprep.subr.bf16.mxu0 %v4577_v47  ;;  %v3384_v46 = vld [vmem:[%s6039_s14 + $0x70] sm:$0xff] }
 0x7ac   : > { %v4659_v47 = vld [vmem:[%s6042_s17 + $0x250] ss:$120 sps:$4 sm:$0xff]  }
 0x7ae   : > { %3014 = vmatpush1.bf16.msra.mxu1 %v4572_v48  ;;  %3055 = vmatpush1.bf16.msra.mxu0 %v4575_v49  ;;  %v3383_v48 = vld [vmem:[%s6039_s14 + $0x68] sm:$0xff]  ;;  %v4664_v49 = vld [vmem:[%s6042_s17 + $0x164] ss:$120 sps:$4 sm:$0xff]  }
 0x7af   : > { %3015 = vmatprep.subr.bf16.mxu1 %v4580_v50  ;;  %3056 = vmatprep.subr.bf16.mxu0 %v4583_v51  ;;  %v3382_v50 = vld [vmem:[%s6039_s14 + $0x60] sm:$0xff] }
 0x7b0   : > { %v4662_v51 = vld [vmem:[%s6042_s17 + $0x160] ss:$120 sps:$4 sm:$0xff]  }
 0x7b2   : > { %3016 = vmatpush1.bf16.msra.mxu1 %v4578_v52  ;;  %3057 = vmatpush1.bf16.msra.mxu0 %v4581_v53  ;;  %v4667_v52 = vld [vmem:[%s6042_s17 + $0x74] ss:$120 sps:$4 sm:$0xff]  }
 0x7b3   : > { %3091 = vmatprep.subr.bf16.mxu1 %v4586_v56  ;;  %3132 = vmatprep.subr.bf16.mxu0 %v4589_v58  ;;  %v3380_v53 = vld [vmem:[%s6039_s14 + $0x50] sm:$0xff]  ;;  %v3379_v58 = vld [vmem:[%s6039_s14 + $0x48] sm:$0xff] }
 0x7b4   : > { %v4665_v56 = vld [vmem:[%s6042_s17 + $0x70] ss:$120 sps:$4 sm:$0xff]  }
 0x7b5   : > { %3960 = vmatmul.mubr.msk.bf16.vlgmr.msra.gmra.mxu1 %vm1241_vm0, %v5568_v5  ;;  %3961 = vmatmul.mubr.msk.bf16.vlgmr.msra.gmra.mxu0 %vm1241_vm0, %v5568_v5 }
 0x7b6   : > { %3092 = vmatpush1.bf16.msra.mxu1 %v4584_v57  ;;  %3133 = vmatpush1.bf16.msra.mxu0 %v4587_v59  ;;  %v3378_v57 = vld [vmem:[%s6039_s14 + $0x40] sm:$0xff]  ;;  %v3377_v59 = vld [vmem:[%s6039_s14 + $0x38] sm:$0xff] }
 0x7b7   : > { %3093 = vmatprep.subr.bf16.mxu1 %v4592_v60  ;;  %3134 = vmatprep.subr.bf16.mxu0 %v4595_v54  ;;  %v3376_v60 = vld [vmem:[%s6039_s14 + $0x30] sm:$0xff]  ;;  %v3375_v54 = vld [vmem:[%s6039_s14 + $0x28] sm:$0xff] }
 0x7b8   : > { %3115 = vmatprep.mubr.bf16.mxu1 %v4690_v61  ;;  %3156 = vmatprep.mubr.bf16.mxu0 %v4690_v61 }
 0x7ba   : > { %3094 = vmatpush1.bf16.msra.mxu1 %v4590_v55  ;;  %3135 = vmatpush1.bf16.msra.mxu0 %v4593_v62  ;;  %v3373_v55 = vld [vmem:[%s6039_s14 + $0x18] sm:$0xff]  ;;  %v3372_v62 = vld [vmem:[%s6039_s14 + $0x10] sm:$0xff] }
 0x7bb   : > { %3095 = vmatprep.subr.bf16.mxu1 %v4598_v63  ;;  %3136 = vmatprep.subr.bf16.mxu0 %v4601_v0  ;;  %v3371_v63 = vld [vmem:[%s6039_s14 + $0x8] sm:$0xff]  ;;  %v3370_v0 = vld [vmem:[%s6039_s14] sm:$0xff] }
 0x7be   : > { %3096 = vmatpush1.bf16.msra.mxu1 %v4596_v1  ;;  %3137 = vmatpush1.bf16.msra.mxu0 %v4599_v2  ;;  %v4691_v1 = vmov 1983009808  }
 0x7bf   : > { %3097 = vmatprep.subr.bf16.mxu1 %v4604_v9  ;;  %3138 = vmatprep.subr.bf16.mxu0 %v4607_v29  ;;  %v3474_v2 = vunpack.c.l.s4 %v4691_v1  ;;  %v3476_v9 = vlaneseq }
 0x7c1   : > { %v3475_v29 = vunpack.c.0.s8 %v3474_v2 }
 0x7c2   : > { %3098 = vmatpush1.bf16.msra.mxu1 %v4602_v3  ;;  %3139 = vmatpush1.bf16.msra.mxu0 %v4605_v4  ;;  %v3477_v3 = vshrl.u32 %v3476_v9, 7 }
 0x7c3   : > { %3173 = vmatprep.subr.bf16.mxu1 %v4610_v6  ;;  %3214 = vmatprep.subr.bf16.mxu0 %v4613_v7 }
 0x7c4   : > { %v5980_v7 = vsub.s32 %v3475_v29, %v3477_v3 }
 0x7c5   : > { %3962 = vmatmul.mubr.msk.bf16.vlgmr.msra.gmra.mxu1 %vm1241_vm0, %v5568_v5  ;;  %3963 = vmatmul.mubr.msk.bf16.vlgmr.msra.gmra.mxu0 %vm1241_vm0, %v5568_v5 }
 0x7c6   : > { %3174 = vmatpush1.bf16.msra.mxu1 %v4608_v8  ;;  %3215 = vmatpush1.bf16.msra.mxu0 %v4611_v10 }
 0x7c7   : > { %3175 = vmatprep.subr.bf16.mxu1 %v4616_v11  ;;  %3216 = vmatprep.subr.bf16.mxu0 %v4619_v12 }
 0x7c8   : > { %3197 = vmatprep.mubr.bf16.mxu1 %v4690_v61  ;;  %3238 = vmatprep.mubr.bf16.mxu0 %v4690_v61 }
 0x7ca   : > { %3176 = vmatpush1.bf16.msra.mxu1 %v4614_v13  ;;  %3217 = vmatpush1.bf16.msra.mxu0 %v4617_v14 }
 0x7cb   : > { %3177 = vmatprep.subr.bf16.mxu1 %v4622_v15  ;;  %3218 = vmatprep.subr.bf16.mxu0 %v4625_v16 }
 0x7ce   : > { %3178 = vmatpush1.bf16.msra.mxu1 %v4620_v17  ;;  %3219 = vmatpush1.bf16.msra.mxu0 %v4623_v18 }
 0x7cf   : > { %3179 = vmatprep.subr.bf16.mxu1 %v4628_v19  ;;  %3220 = vmatprep.subr.bf16.mxu0 %v4631_v20 }
 0x7d2   : > { %3180 = vmatpush1.bf16.msra.mxu1 %v4626_v21  ;;  %3221 = vmatpush1.bf16.msra.mxu0 %v4629_v22 }
 0x7d3   : > { %3255 = vmatprep.subr.bf16.mxu1 %v4634_v23  ;;  %3296 = vmatprep.subr.bf16.mxu0 %v4637_v24 }
 0x7d5   : > { %3964 = vmatmul.mubr.msk.bf16.vlgmr.msra.gmra.mxu1 %vm1241_vm0, %v5568_v5  ;;  %3965 = vmatmul.mubr.msk.bf16.vlgmr.msra.gmra.mxu0 %vm1241_vm0, %v5568_v5 }
 0x7d6   : > { %3256 = vmatpush1.bf16.msra.mxu1 %v4632_v25  ;;  %3297 = vmatpush1.bf16.msra.mxu0 %v4635_v26 }
 0x7d7   : > { %3257 = vmatprep.subr.bf16.mxu1 %v4640_v27  ;;  %3298 = vmatprep.subr.bf16.mxu0 %v4643_v28 }
 0x7d8   : > { %3279 = vmatprep.mubr.bf16.mxu1 %v4690_v61  ;;  %3320 = vmatprep.mubr.bf16.mxu0 %v4690_v61 }
 0x7da   : > { %3258 = vmatpush1.bf16.msra.mxu1 %v4638_v30  ;;  %3299 = vmatpush1.bf16.msra.mxu0 %v4641_v31 }
 0x7db   : > { %3259 = vmatprep.subr.bf16.mxu1 %v4646_v32  ;;  %3300 = vmatprep.subr.bf16.mxu0 %v4649_v33 }
 0x7de   : > { %3260 = vmatpush1.bf16.msra.mxu1 %v4644_v34  ;;  %3301 = vmatpush1.bf16.msra.mxu0 %v4647_v35 }
 0x7df   : > { %3261 = vmatprep.subr.bf16.mxu1 %v4652_v37  ;;  %3302 = vmatprep.subr.bf16.mxu0 %v4655_v38 }
 0x7e2   : > { %3262 = vmatpush1.bf16.msra.mxu1 %v4650_v40  ;;  %3303 = vmatpush1.bf16.msra.mxu0 %v4653_v42 }
 0x7e3   : > { %3337 = vmatprep.subr.bf16.mxu1 %v4658_v43  ;;  %4440 = vmatprep.subr.mxu0 %v4688_v36 }
 0x7e5   : > { %3966 = vmatmul.mubr.msk.bf16.vlgmr.msra.gmra.mxu1 %vm1241_vm0, %v5568_v5  ;;  %3967 = vmatmul.mubr.msk.bf16.vlgmr.msra.gmra.mxu0 %vm1241_vm0, %v5568_v5 }
 0x7e6   : > { %3338 = vmatpush1.bf16.msra.mxu1 %v4656_v41  ;;  %4441 = vmatpush3.msra.mxu0 %v3385_v45 }
 0x7e7   : > { %4442 = vmatprep.subr.mxu0 %v4688_v36  ;;  %3339 = vmatprep.subr.bf16.mxu1 %v4661_v44 }
 0x7e8   : > { %4443 = vmatpush3.msra.mxu0 %v3384_v46  ;;  %3361 = vmatprep.mubr.bf16.mxu1 %v4690_v61  ;;  %v3381_v61 = vld [vmem:[%s6039_s14 + $0x58] sm:$0xff] }
 0x7e9   : > { %4444 = vmatprep.subr.mxu0 %v4688_v36  ;;  %4472 = vmatprep.mubr.msk.f32.mxu0 %vm4689_vm2, %v4688_v36 }
 0x7ea   : > { %3340 = vmatpush1.bf16.msra.mxu1 %v4659_v47  ;;  %4445 = vmatpush3.msra.mxu0 %v3383_v48 }
 0x7eb   : > { %4446 = vmatprep.subr.mxu0 %v4688_v36  ;;  %3341 = vmatprep.subr.bf16.mxu1 %v4664_v49 }
 0x7ec   : > { %4447 = vmatpush3.msra.mxu0 %v3382_v50 }
 0x7ed   : > { %4448 = vmatprep.subr.mxu0 %v4688_v36 }
 0x7ee   : > { %3342 = vmatpush1.bf16.msra.mxu1 %v4662_v51  ;;  %4449 = vmatpush3.msra.mxu0 %v3381_v61 }
 0x7ef   : > { %4450 = vmatprep.subr.mxu0 %v4688_v36  ;;  %3343 = vmatprep.subr.bf16.mxu1 %v4667_v52 }
 0x7f0   : > { %4451 = vmatpush3.msra.mxu0 %v3380_v53 }
 0x7f1   : > { %4452 = vmatprep.subr.mxu0 %v4688_v36 }
 0x7f2   : > { %3344 = vmatpush1.bf16.msra.mxu1 %v4665_v56  ;;  %4453 = vmatpush3.msra.mxu0 %v3379_v58 }
 0x7f3   : > { %4454 = vmatprep.subr.mxu0 %v4688_v36 }
 0x7f4   : > { %4455 = vmatpush3.msra.mxu0 %v3378_v57 }
 0x7f5   : > { %3968 = vmatmul.mubr.msk.bf16.vlgmr.msra.gmra.mxu1 %vm1241_vm0, %v5568_v5  ;;  %4456 = vmatprep.subr.mxu0 %v4688_v36  ;;  %v3374_v5 = vld [vmem:[%s6039_s14 + $0x20] sm:$0xff] }
 0x7f6   : > { %4457 = vmatpush3.msra.mxu0 %v3377_v59 }
 0x7f7   : > { %4458 = vmatprep.subr.mxu0 %v4688_v36 }
 0x7f8   : > { %4459 = vmatpush3.msra.mxu0 %v3376_v60 }
 0x7f9   : > { %4460 = vmatprep.subr.mxu0 %v4688_v36 }
 0x7fa   : > { %4461 = vmatpush3.msra.mxu0 %v3375_v54 }
 0x7fb   : > { %4462 = vmatprep.subr.mxu0 %v4688_v36 }
 0x7fc   : > { %4463 = vmatpush3.msra.mxu0 %v3374_v5 }
 0x7fd   : > { %4464 = vmatprep.subr.mxu0 %v4688_v36 }
 0x7fe   : > { %4465 = vmatpush3.msra.mxu0 %v3373_v55 }
 0x7ff   : > { %4466 = vmatprep.subr.mxu0 %v4688_v36 }
 0x800   : > { %4467 = vmatpush3.msra.mxu0 %v3372_v62 }
 0x801   : > { %4468 = vmatprep.subr.mxu0 %v4688_v36 }
 0x802   : > { %4469 = vmatpush3.msra.mxu0 %v3371_v63 }
 0x803   : > { %4470 = vmatprep.subr.mxu0 %v4688_v36 }
 0x804   : > { %4471 = vmatpush3.msra.mxu0 %v3370_v0 }
 0x805   : > { %4473 = vmatmul.mubr.f32.vlgmr.msra.gmra.mxu0 %v5292_v39 }
 0x823   : > { %v1813_v4 = vpop.f32.mrf.mxu1  ;;  %v1884_v6 = vpop.f32.mrf.mxu0 }
 0x825   : > { %v1815_v8 = vpop.f32.mrf.mxu1  ;;  %v1886_v10 = vpop.f32.mrf.mxu0 }
 0x826   : > { %v3471_v11 = vcombine.low %v1813_v4, %v1815_v8  ;;  %v3472_v12 = vcombine.low %v1884_v6, %v1886_v10 }
 0x828   : > { %v3479_v13 = vrot.slane %v3471_v11, %v5980_v7  ;;  %v3486_v36 = vrot.slane %v3472_v12, %v5980_v7 }
 0x82a   : > { %v3487_v39 = vcombine.low %v3479_v13, %v3486_v36 }
 0x82c   : > { %3507 = vst [vmem:[%s645_s22] sm:$0xff] %v3487_v39 }
 0x834   : > { %v1955_v14 = vpop.f32.mrf.mxu1  ;;  %v2026_v15 = vpop.f32.mrf.mxu0 }
 0x836   : > { %v1957_v16 = vpop.f32.mrf.mxu1  ;;  %v2028_v17 = vpop.f32.mrf.mxu0 }
 0x837   : > { %v3488_v18 = vcombine.low %v1955_v14, %v1957_v16  ;;  %v3489_v19 = vcombine.low %v2026_v15, %v2028_v17 }
 0x839   : > { %v3496_v20 = vrot.slane %v3488_v18, %v5980_v7  ;;  %v3503_v21 = vrot.slane %v3489_v19, %v5980_v7 }
 0x83b   : > { %v3504_v22 = vcombine.low %v3496_v20, %v3503_v21 }
 0x83d   : > { %3508 = vst [vmem:[%s645_s22 + $0x8] sm:$0xff] %v3504_v22 }
 0x845   : > { %v2789_v23 = vpop.f32.mrf.mxu1  ;;  %v2830_v24 = vpop.f32.mrf.mxu0 }
 0x847   : > { %v2791_v25 = vpop.f32.mrf.mxu1  ;;  %v2832_v26 = vpop.f32.mrf.mxu0 }
 0x848   : > { %v3539_v27 = vcombine.low %v2789_v23, %v2791_v25  ;;  %v3540_v28 = vcombine.low %v2830_v24, %v2832_v26 }
 0x849   : > { %v2793_v30 = vpop.f32.mrf.mxu1  ;;  %v2834_v31 = vpop.f32.mrf.mxu0 }
 0x84a   : > { %v3547_v32 = vrot.slane %v3539_v27, %v5980_v7  ;;  %v3554_v33 = vrot.slane %v3540_v28, %v5980_v7 }
 0x84b   : > { %v2794_v34 = vpop.f32.mrf.mxu1  ;;  %v2835_v35 = vpop.f32.mrf.mxu0 }
 0x84c   : > { %v3555_v37 = vcombine.low %v3547_v32, %v3554_v33 }
 0x84e   : > { %3674 = vst [vmem:[%s5996_s27] sm:$0xff] %v3555_v37 }
 0x855   : > { %v2871_v38 = vpop.f32.mrf.mxu1  ;;  %v2912_v40 = vpop.f32.mrf.mxu0 }
 0x857   : > { %v2873_v42 = vpop.f32.mrf.mxu1  ;;  %v2914_v43 = vpop.f32.mrf.mxu0 }
 0x858   : > { %v3556_v41 = vcombine.low %v2871_v38, %v2873_v42  ;;  %v3557_v45 = vcombine.low %v2912_v40, %v2914_v43 }
 0x859   : > { %v2875_v44 = vpop.f32.mrf.mxu1  ;;  %v2916_v46 = vpop.f32.mrf.mxu0 }
 0x85a   : > { %v3564_v47 = vrot.slane %v3556_v41, %v5980_v7  ;;  %v3571_v48 = vrot.slane %v3557_v45, %v5980_v7 }
 0x85b   : > { %v2876_v49 = vpop.f32.mrf.mxu1  ;;  %v2917_v50 = vpop.f32.mrf.mxu0 }
 0x85c   : > { %v3572_v51 = vcombine.low %v3564_v47, %v3571_v48 }
 0x85e   : > { %3675 = vst [vmem:[%s5996_s27 + $0x8] sm:$0xff] %v3572_v51 }
 0x865   : > { %v2953_v61 = vpop.f32.mrf.mxu1  ;;  %v2994_v52 = vpop.f32.mrf.mxu0 }
 0x867   : > { %v2955_v53 = vpop.f32.mrf.mxu1  ;;  %v2996_v56 = vpop.f32.mrf.mxu0 }
 0x868   : > { %v3573_v58 = vcombine.low %v2953_v61, %v2955_v53  ;;  %v3574_v57 = vcombine.low %v2994_v52, %v2996_v56 }
 0x869   : > { %v2957_v59 = vpop.f32.mrf.mxu1  ;;  %v2998_v60 = vpop.f32.mrf.mxu0 }
 0x86a   : > { %v3581_v54 = vrot.slane %v3573_v58, %v5980_v7  ;;  %v3588_v5 = vrot.slane %v3574_v57, %v5980_v7  ;;  %v3969_v60 = vld [vmem:[#allocation2] ss:$0 sm:$0xff] }
 0x86b   : > { %v2958_v55 = vpop.f32.mrf.mxu1  ;;  %v2999_v62 = vpop.f32.mrf.mxu0 }
 0x86c   : > { %v3589_v63 = vcombine.low %v3581_v54, %v3588_v5 }
 0x86e   : > { %3676 = vst [vmem:[%s5996_s27 + $0x10] sm:$0xff] %v3589_v63 }
 0x875   : > { %v3035_v0 = vpop.f32.mrf.mxu1  ;;  %v3076_v1 = vpop.f32.mrf.mxu0 }
 0x877   : > { %v3037_v2 = vpop.f32.mrf.mxu1  ;;  %v3078_v9 = vpop.f32.mrf.mxu0 }
 0x878   : > { %v3590_v29 = vcombine.low %v3035_v0, %v3037_v2  ;;  %v3591_v3 = vcombine.low %v3076_v1, %v3078_v9 }
 0x879   : > { %v3039_v4 = vpop.f32.mrf.mxu1  ;;  %v3080_v6 = vpop.f32.mrf.mxu0 }
 0x87a   : > { %v3598_v8 = vrot.slane %v3590_v29, %v5980_v7  ;;  %v3605_v10 = vrot.slane %v3591_v3, %v5980_v7 }
 0x87b   : > { %v3040_v11 = vpop.f32.mrf.mxu1  ;;  %v3081_v12 = vpop.f32.mrf.mxu0 }
 0x87c   : > { %v3606_v13 = vcombine.low %v3598_v8, %v3605_v10 }
 0x87e   : > { %3677 = vst [vmem:[%s5996_s27 + $0x18] sm:$0xff] %v3606_v13 }
 0x885   : > { %v3117_v36 = vpop.f32.mrf.mxu1  ;;  %v3158_v39 = vpop.f32.mrf.mxu0 }
 0x887   : > { %v3119_v14 = vpop.f32.mrf.mxu1  ;;  %v3160_v15 = vpop.f32.mrf.mxu0 }
 0x888   : > { %v3607_v16 = vcombine.low %v3117_v36, %v3119_v14  ;;  %v3608_v17 = vcombine.low %v3158_v39, %v3160_v15 }
 0x889   : > { %v3121_v18 = vpop.f32.mrf.mxu1  ;;  %v3162_v19 = vpop.f32.mrf.mxu0 }
 0x88a   : > { %v3615_v20 = vrot.slane %v3607_v16, %v5980_v7  ;;  %v3622_v21 = vrot.slane %v3608_v17, %v5980_v7 }
 0x88b   : > { %v3122_v22 = vpop.f32.mrf.mxu1  ;;  %v3163_v23 = vpop.f32.mrf.mxu0 }
 0x88c   : > { %v3623_v24 = vcombine.low %v3615_v20, %v3622_v21 }
 0x88e   : > { %3678 = vst [vmem:[%s5996_s27 + $0x20] sm:$0xff] %v3623_v24 }
 0x895   : > { %v3199_v25 = vpop.f32.mrf.mxu1  ;;  %v3240_v26 = vpop.f32.mrf.mxu0 }
 0x897   : > { %v3201_v27 = vpop.f32.mrf.mxu1  ;;  %v3242_v28 = vpop.f32.mrf.mxu0 }
 0x898   : > { %v3624_v30 = vcombine.low %v3199_v25, %v3201_v27  ;;  %v3625_v31 = vcombine.low %v3240_v26, %v3242_v28 }
 0x899   : > { %v3203_v32 = vpop.f32.mrf.mxu1  ;;  %v3244_v33 = vpop.f32.mrf.mxu0 }
 0x89a   : > { %v3632_v34 = vrot.slane %v3624_v30, %v5980_v7  ;;  %v3639_v35 = vrot.slane %v3625_v31, %v5980_v7 }
 0x89b   : > { %v3204_v37 = vpop.f32.mrf.mxu1  ;;  %v3245_v38 = vpop.f32.mrf.mxu0 }
 0x89c   : > { %v3640_v40 = vcombine.low %v3632_v34, %v3639_v35 }
 0x89e   : > { %3679 = vst [vmem:[%s5996_s27 + $0x28] sm:$0xff] %v3640_v40 }
 0x8a5   : > { %v3281_v42 = vpop.f32.mrf.mxu1  ;;  %v3322_v43 = vpop.f32.mrf.mxu0 }
 0x8a7   : > { %v3283_v41 = vpop.f32.mrf.mxu1  ;;  %v3324_v45 = vpop.f32.mrf.mxu0 }
 0x8a8   : > { %v3641_v44 = vcombine.low %v3281_v42, %v3283_v41  ;;  %v3642_v46 = vcombine.low %v3322_v43, %v3324_v45 }
 0x8a9   : > { %v3285_v47 = vpop.f32.mrf.mxu1  ;;  %v3326_v48 = vpop.f32.mrf.mxu0 }
 0x8aa   : > { %v3649_v49 = vrot.slane %v3641_v44, %v5980_v7  ;;  %v3656_v50 = vrot.slane %v3642_v46, %v5980_v7 }
 0x8ab   : > { %v3286_v51 = vpop.f32.mrf.mxu1  ;;  %v3327_v61 = vpop.f32.mrf.mxu0 }
 0x8ac   : > { %v3657_v52 = vcombine.low %v3649_v49, %v3656_v50 }
 0x8ae   : > { %3680 = vst [vmem:[%s5996_s27 + $0x30] sm:$0xff] %v3657_v52 }
 0x8b5   : > { %v3363_v53 = vpop.f32.mrf.mxu1 }
 0x8b7   : > { %v3365_v56 = vpop.f32.mrf.mxu1 }
 0x8b8   : > { %v3658_v58 = vcombine.low %v3363_v53, %v3365_v56 }
 0x8b9   : > { %v3367_v57 = vpop.f32.mrf.mxu1 }
 0x8ba   : > { %3970 = vst.sshfl [vmem:[%s5996_s27 + $0x38] sm:$0x33 pattern:$0x76325410] %v3658_v58 }
 0x8bb   : > { %v3368_v59 = vpop.f32.mrf.mxu1 }
 0x8c5   : > { %v3459_v54 = vpop.f32.mrf.mxu0 }
 0x8c6   : > { %v3460_v5 = vadd.f32 %v3969_v60, %v3459_v54 }
 0x8c7   : > { %v4474_v7 = vpop.f32.mrf.mxu0 }
 0x8c8   : > { %3683 = vst.msk [vmem:[%s654_s21] sm:$0x3] %vm3682_vm4, %v3460_v5 }
 0x8c9 PF: > { %s33_s23 = sadd.s32 1, %s4686_s23  }
 0x8ca   : > { %p30_p4 = scmp.ge.s32.totalorder %s33_s23, 4  }
 0x8cc   :  { %32 = sbr.rel (!%p30_p4) target bundleno = 6 (0x6), region = 146 }

</bundles_post_ra>
